<compile_context>
chip_gen: v5e
topology: v5e:2x2
jax: 0.10.0
libtpu: 0.0.40
codegen_flags: <defaults>
</compile_context>

<pallas_src>
import functools

import jax
import jax.numpy as jnp
from jax.experimental import pallas as pl
from jax.experimental.pallas import tpu as pltpu

_PAR = pltpu.CompilerParams(dimension_semantics=("parallel",))
_FC_TILE_OUT = 512   # fc output-dim block; streams the bf16 weight in 1 MiB tiles


# ------------------------- K1: features + grams ----------------------------- #

def _features_kernel(cF_ref, sF_ref,
                     lw_ref, lb_ref, pw_ref, pb_ref,
                     c1w_ref, c1b_ref, c2w_ref, c2b_ref, c3w_ref, c3b_ref,
                     s1w_ref, s1b_ref, s2w_ref, s2b_ref, s3w_ref, s3b_ref,
                     cc_ref, smean_ref, grams_ref):
    f32 = jnp.float32
    ms = grams_ref.shape[1]
    cF = cF_ref[0]                                   # (Cc, N)
    sF = sF_ref[0]                                   # (256, sN)

    # lifting: 256 -> 32 style channels
    sF = jnp.dot(lw_ref[...], sF, preferred_element_type=f32) + lb_ref[...]

    # per-channel spatial means and centering (stay in VMEM)
    cMean = jnp.mean(cF, axis=1, keepdims=True)      # (Cc, 1)
    cFc = cF - cMean
    sMean = jnp.mean(sF, axis=1, keepdims=True)      # (32, 1)
    sFc = sF - sMean
    smean_ref[0] = sMean

    # compress(cF - cMean)
    cc_ref[0] = jnp.dot(pw_ref[...], cFc, preferred_element_type=f32) + pb_ref[...]

    def leaky(v):
        return jnp.where(v > 0, v, 0.2 * v)          # LeakyReLU(0.2), as in the module

    def gram(x, w1, b1, w2, b2, w3, b3):
        inv_n = 1.0 / x.shape[-1]                    # static -> free scalar multiply
        f1 = leaky(jnp.dot(w1, x, preferred_element_type=f32) + b1)
        f2 = leaky(jnp.dot(w2, f1, preferred_element_type=f32) + b2)
        f3 = jnp.dot(w3, f2, preferred_element_type=f32) + b3
        g = jax.lax.dot_general(f3, f3, (((1,), (1,)), ((), ())),
                                preferred_element_type=f32)
        return g * inv_n

    # Combined lane-denser gram output: content gram in lanes [0, ms),
    # style gram in lanes [ms, 2*ms) -> single output stream per grid step.
    grams_ref[0, :, 0:ms] = gram(cFc, c1w_ref[...], c1b_ref[...], c2w_ref[...],
                                 c2b_ref[...], c3w_ref[...], c3b_ref[...])
    grams_ref[0, :, ms:2 * ms] = gram(sFc, s1w_ref[...], s1b_ref[...],
                                      s2w_ref[...], s2b_ref[...],
                                      s3w_ref[...], s3b_ref[...])


def features(cF3, sF3, params, matrix_size):
    B, Cc, N = cF3.shape
    _, sC, sN = sF3.shape
    ms = matrix_size
    cn, sn = params["cnet"], params["snet"]
    weights = [params["lifting"][0], params["lifting"][1],
               params["compress"][0], params["compress"][1],
               cn["c1"][0], cn["c1"][1], cn["c2"][0], cn["c2"][1],
               cn["c3"][0], cn["c3"][1],
               sn["c1"][0], sn["c1"][1], sn["c2"][0], sn["c2"][1],
               sn["c3"][0], sn["c3"][1]]

    def wspec(a):
        return pl.BlockSpec(a.shape, lambda i: (0, 0))

    return pl.pallas_call(
        _features_kernel,
        out_shape=(jax.ShapeDtypeStruct((B, ms, N), jnp.float32),      # compressed content
                   jax.ShapeDtypeStruct((B, Cc, 1), jnp.float32),      # style mean
                   jax.ShapeDtypeStruct((B, ms, 2 * ms), jnp.float32)),  # [cGram | sGram]
        grid=(B,),
        in_specs=[pl.BlockSpec((1, Cc, N), lambda i: (i, 0, 0)),
                  pl.BlockSpec((1, sC, sN), lambda i: (i, 0, 0))]
                 + [wspec(a) for a in weights],
        out_specs=(pl.BlockSpec((1, ms, N), lambda i: (i, 0, 0)),
                   pl.BlockSpec((1, Cc, 1), lambda i: (i, 0, 0)),
                   pl.BlockSpec((1, ms, 2 * ms), lambda i: (i, 0, 0))),
        compiler_params=_PAR,
    )(cF3, sF3, *weights)


# --------------------- K2: fused fc, output-dim blocked ---------------------- #

def _fc_kernel(g_ref, w_ref, b_ref, y_ref):
    # lhs (resident, 16 KB) cast to bf16 in-kernel; bf16 x bf16 MXU matmul with
    # f32 accumulation.  Weight tile (1024, TO) bf16 streams/double-buffers.
    g16 = g_ref[...].astype(jnp.bfloat16)
    y_ref[...] = (jnp.dot(g16, w_ref[...], preferred_element_type=jnp.float32)
                  + b_ref[...])


def fc_packed(lhs, wcat, bcat):
    # lhs: (2B, F) f32 stacked [content grams; style grams]
    # wcat: (F, 2F) bf16 = [cnet wT | snet wT] (pre-transposed/concatenated at init)
    # bcat: (1, 2F) f32  = [cnet b | snet b]
    M, K = lhs.shape
    _, O2 = wcat.shape
    to = _FC_TILE_OUT if O2 % _FC_TILE_OUT == 0 else O2

    return pl.pallas_call(
        _fc_kernel,
        out_shape=jax.ShapeDtypeStruct((M, O2), jnp.float32),
        grid=(O2 // to,),
        in_specs=[pl.BlockSpec((M, K), lambda j: (0, 0)),    # grams stay resident
                  pl.BlockSpec((K, to), lambda j: (0, j)),   # weight tiles streamed
                  pl.BlockSpec((1, to), lambda j: (0, j))],
        out_specs=pl.BlockSpec((M, to), lambda j: (0, j)),   # lane-dense output blocks
        compiler_params=pltpu.CompilerParams(dimension_semantics=("parallel",)),
    )(lhs, wcat, bcat)


# ------------------------- K3: transform + unzip ----------------------------- #

def _transform_unzip_kernel(sm_ref, cm_ref, cc_ref, smean_ref, uw_ref, ub_ref,
                            out_ref, tm_ref):
    f32 = jnp.float32
    tm = jnp.dot(sm_ref[0], cm_ref[0], preferred_element_type=f32)       # (ms, ms)
    tf = jnp.dot(tm, cc_ref[0], preferred_element_type=f32)              # (ms, N)
    out_ref[0] = (jnp.dot(uw_ref[...], tf, preferred_element_type=f32)
                  + ub_ref[...] + smean_ref[0])
    tm_ref[0] = tm


def transform_unzip(sM, cM, cc, sMean, unzip_w, unzip_b):
    B, ms, _ = sM.shape
    N = cc.shape[-1]
    Cout = unzip_w.shape[0]
    return pl.pallas_call(
        _transform_unzip_kernel,
        out_shape=(jax.ShapeDtypeStruct((B, Cout, N), jnp.float32),
                   jax.ShapeDtypeStruct((B, ms, ms), jnp.float32)),
        grid=(B,),
        in_specs=[pl.BlockSpec((1, ms, ms), lambda i: (i, 0, 0)),
                  pl.BlockSpec((1, ms, ms), lambda i: (i, 0, 0)),
                  pl.BlockSpec((1, ms, N), lambda i: (i, 0, 0)),
                  pl.BlockSpec((1, Cout, 1), lambda i: (i, 0, 0)),
                  pl.BlockSpec((Cout, ms), lambda i: (0, 0)),
                  pl.BlockSpec((Cout, 1), lambda i: (0, 0))],
        out_specs=(pl.BlockSpec((1, Cout, N), lambda i: (i, 0, 0)),
                   pl.BlockSpec((1, ms, ms), lambda i: (i, 0, 0))),
        compiler_params=_PAR,
    )(sM, cM, cc, sMean, unzip_w, unzip_b)


# ------------------------------ parameters ----------------------------------- #

def _conv_init(key, cout, cin):
    k1, k2 = jax.random.split(key)
    bound = 1.0 / float(cin) ** 0.5
    w = jax.random.uniform(k1, (cout, cin), jnp.float32, -bound, bound)
    b = jax.random.uniform(k2, (cout, 1), jnp.float32, -bound, bound)   # kernel-ready shape
    return w, b


def _fc_init(key, nfeat):
    k1, k2 = jax.random.split(key)
    bound = 1.0 / float(nfeat) ** 0.5
    w = jax.random.uniform(k1, (nfeat, nfeat), jnp.float32, -bound, bound)  # torch (O, F)
    b = jax.random.uniform(k2, (1, nfeat), jnp.float32, -bound, bound)
    # Transposed ONCE at init (torch Linear is x @ w.T) and stored bf16: the fc
    # weights are ~90% of the model's HBM bytes, bf16 halves the dominant read.
    return w.T.astype(jnp.bfloat16), b


def init_mullayer_params(key, matrix_size=32, in_channel=32):
    keys = jax.random.split(key, 11)

    def cnn_init(ks, in_ch):
        return {"c1": _conv_init(ks[0], 128, in_ch),
                "c2": _conv_init(ks[1], 64, 128),
                "c3": _conv_init(ks[2], matrix_size, 64),
                "fc": _fc_init(ks[3], matrix_size * matrix_size)}

    params = {"lifting": _conv_init(keys[0], 32, 256),
              "compress": _conv_init(keys[1], matrix_size, in_channel),
              "unzip": _conv_init(keys[2], in_channel, matrix_size),
              "cnet": cnn_init(keys[3:7], in_channel),
              "snet": cnn_init(keys[7:11], in_channel)}

    # Single packed fc weight/bias built ONCE at init: one (F, 2F) bf16 weight
    # stream and one (1, 2F) bias for the fused K2 call.
    cwT, cb = params["cnet"]["fc"]
    swT, sb = params["snet"]["fc"]
    params["fc_packed"] = (jnp.concatenate([cwT, swT], axis=1),
                           jnp.concatenate([cb, sb], axis=1))
    return params


# ------------------------------ forward pass --------------------------------- #

def mullayer_forward(params, cF, sF, matrix_size=32):
    # cF: (B, 32, H, W), sF: (B, 256, sH, sW)  -> (out, transmatrix)
    # TODO(synk): the trans=False branch of the original module returns None (bug);
    # only trans=True is implemented.
    B, Cc, H, W = cF.shape
    sB, sC, sH, sW = sF.shape
    ms = matrix_size
    F = ms * ms
    cF3 = cF.reshape(B, Cc, H * W).astype(jnp.float32)
    sF3 = sF.reshape(sB, sC, sH * sW).astype(jnp.float32)

    cc, sMean, grams = features(cF3, sF3, params, ms)

    # KB-scale lane-changing reshapes / stacking done as free XLA ops between calls.
    cg = grams[:, :, :ms].reshape(B, F)              # row-major == torch .view
    sg = grams[:, :, ms:].reshape(B, F)
    lhs = jnp.concatenate([cg, sg], axis=0)          # (2B, F)

    wcat, bcat = params["fc_packed"]
    y = fc_packed(lhs, wcat, bcat)                   # (2B, 2F); off-diag blocks unused
    cM = y[:B, :F].reshape(B, ms, ms)
    sM = y[B:, F:].reshape(B, ms, ms)

    out, transmatrix = transform_unzip(sM, cM, cc, sMean,
                                       params["unzip"][0], params["unzip"][1])
    return out.reshape(B, Cc, H, W), transmatrix


# --------------------------- pure-JAX reference ------------------------------ #

def _ref_forward(params, cF, sF, matrix_size=32):
    hi = jax.lax.Precision.HIGHEST

    def conv(x, wb):
        w, b = wb
        return jnp.einsum("oc,bcn->bon", w, x, precision=hi) + b[None, :, :]

    def leaky(v):
        return jnp.where(v > 0, v, 0.2 * v)

    B, Cc, H, W = cF.shape
    sB, sC, sH, sW = sF.shape
    cF3 = cF.reshape(B, Cc, H * W)
    sF3 = sF.reshape(sB, sC, sH * sW)
    sFl = conv(sF3, params["lifting"])
    cMean = jnp.mean(cF3, axis=2, keepdims=True)
    cFc = cF3 - cMean
    sMean = jnp.mean(sFl, axis=2, keepdims=True)
    sFc = sFl - sMean
    cc = conv(cFc, params["compress"])

    def cnn(x, p):
        f1 = leaky(conv(x, p["c1"]))
        f2 = leaky(conv(f1, p["c2"]))
        f3 = conv(f2, p["c3"])
        gram = jnp.einsum("bin,bjn->bij", f3, f3, precision=hi) / x.shape[-1]
        wT, b = p["fc"]
        y = jnp.dot(gram.reshape(x.shape[0], -1), wT.astype(jnp.float32),
                    precision=hi) + b
        return y.reshape(x.shape[0], matrix_size, matrix_size)

    cM = cnn(cFc, params["cnet"])
    sM = cnn(sFc, params["snet"])
    tm = jnp.einsum("bij,bjk->bik", sM, cM, precision=hi)
    tf = jnp.einsum("bij,bjn->bin", tm, cc, precision=hi)
    w, b = params["unzip"]
    out = jnp.einsum("oc,bcn->bon", w, tf, precision=hi) + b[None, :, :] + sMean
    return out.reshape(B, Cc, H, W), tm


# ----------------------------------- main ------------------------------------ #

if __name__ == "__main__":
    key = jax.random.PRNGKey(0)
    kp, kc, ks = jax.random.split(key, 3)

    MATRIX_SIZE, IN_CHANNEL = 32, 32
    B, H, W = 2, 16, 16
    params = init_mullayer_params(kp, MATRIX_SIZE, IN_CHANNEL)

    cF = jax.random.normal(kc, (B, IN_CHANNEL, H, W), jnp.float32)
    sF = jax.random.normal(ks, (B, 256, H, W), jnp.float32)

    fwd = jax.jit(functools.partial(mullayer_forward, matrix_size=MATRIX_SIZE))
    out, tm = fwd(params, cF, sF)
    out = jax.block_until_ready(out)
    tm = jax.block_until_ready(tm)

    ref_out, ref_tm = _ref_forward(params, cF, sF, MATRIX_SIZE)
    assert out.shape == (B, IN_CHANNEL, H, W) and tm.shape == (B, MATRIX_SIZE, MATRIX_SIZE)
    assert jnp.allclose(out, ref_out, rtol=1e-2, atol=1e-2)
    assert jnp.allclose(tm, ref_tm, rtol=1e-2, atol=1e-2)

    print("KERNEL_OK")
</pallas_src>

<mosaic_0001>
module attributes {stable_mosaic.version = 11 : i64} {
  func.func @_fc_kernel(%arg0: i32, %arg1: memref<4x1024xf32, #tpu.memory_space<vmem>>, %arg2: memref<1024x512xbf16, #tpu.memory_space<vmem>>, %arg3: memref<1x512xf32, #tpu.memory_space<vmem>>, %arg4: memref<4x512xf32, #tpu.memory_space<vmem>>) attributes {dimension_semantics = [#tpu.dimension_semantics<parallel>], iteration_bounds = array<i64: 4>, scalar_prefetch = 0 : i64, scratch_operands = 0 : i64, tpu.core_type = #tpu.core_type<tc>, window_params = [{pipeline_mode = #tpu.pipeline_mode<synchronous>, transform_indices = @transform_0, window_bounds = array<i64: 4, 1024>}, {transform_indices = @transform_1, window_bounds = array<i64: 1024, 512>}, {transform_indices = @transform_2, window_bounds = array<i64: 1, 512>}, {transform_indices = @transform_3, window_bounds = array<i64: 4, 512>}]} {
    %c0 = arith.constant 0 : index
    %c0_0 = arith.constant 0 : index
    %0 = vector.load %arg1[%c0, %c0_0] : memref<4x1024xf32, #tpu.memory_space<vmem>>, vector<4x1024xf32>
    %1 = arith.truncf %0 : vector<4x1024xf32> to vector<4x1024xbf16>
    %c0_1 = arith.constant 0 : index
    %c0_2 = arith.constant 0 : index
    %2 = vector.load %arg2[%c0_1, %c0_2] : memref<1024x512xbf16, #tpu.memory_space<vmem>>, vector<1024x512xbf16>
    %cst = arith.constant dense<0.000000e+00> : vector<4x512xf32>
    %3 = tpu.matmul %1, %2, %cst {dimension_numbers = #tpu.dot_dimension_numbers<[1], [0], [0], [1], [0, 0, 1, 1], [], []>} : vector<4x1024xbf16>, vector<1024x512xbf16>, vector<4x512xf32> -> vector<4x512xf32>
    %c0_3 = arith.constant 0 : index
    %c0_4 = arith.constant 0 : index
    %4 = vector.load %arg3[%c0_3, %c0_4] : memref<1x512xf32, #tpu.memory_space<vmem>>, vector<1x512xf32>
    %5 = vector.broadcast %4 : vector<1x512xf32> to vector<4x512xf32>
    %6 = arith.addf %3, %5 : vector<4x512xf32>
    %c0_5 = arith.constant 0 : index
    %c0_6 = arith.constant 0 : index
    %7 = vector.load %arg4[%c0_5, %c0_6] : memref<4x512xf32, #tpu.memory_space<vmem>>, vector<4x512xf32>
    tpu.vector_store %arg4[%c0_5, %c0_6], %6 {strides = array<i32>} : memref<4x512xf32, #tpu.memory_space<vmem>>, vector<4x512xf32>,
    return
  }
  func.func @transform_0(%arg0: i32) -> (i32, i32) {
    %c0_i32 = arith.constant 0 : i32
    %c0_i32_0 = arith.constant 0 : i32
    %c0_i32_1 = arith.constant 0 : i32
    return %c0_i32, %c0_i32_0 : i32, i32
  }
  func.func @transform_1(%arg0: i32) -> (i32, i32) {
    %c0_i32 = arith.constant 0 : i32
    %c0_i32_0 = arith.constant 0 : i32
    return %c0_i32, %arg0 : i32, i32
  }
  func.func @transform_2(%arg0: i32) -> (i32, i32) {
    %c0_i32 = arith.constant 0 : i32
    %c0_i32_0 = arith.constant 0 : i32
    return %c0_i32, %arg0 : i32, i32
  }
  func.func @transform_3(%arg0: i32) -> (i32, i32) {
    %c0_i32 = arith.constant 0 : i32
    %c0_i32_0 = arith.constant 0 : i32
    return %c0_i32, %arg0 : i32, i32
  }
}

module attributes {stable_mosaic.version = 11 : i64} {
  func.func @_features_kernel(%arg0: i32, %arg1: memref<1x32x256xf32, #tpu.memory_space<vmem>>, %arg2: memref<1x256x256xf32, #tpu.memory_space<vmem>>, %arg3: memref<32x256xf32, #tpu.memory_space<vmem>>, %arg4: memref<32x1xf32, #tpu.memory_space<vmem>>, %arg5: memref<32x32xf32, #tpu.memory_space<vmem>>, %arg6: memref<32x1xf32, #tpu.memory_space<vmem>>, %arg7: memref<128x32xf32, #tpu.memory_space<vmem>>, %arg8: memref<128x1xf32, #tpu.memory_space<vmem>>, %arg9: memref<64x128xf32, #tpu.memory_space<vmem>>, %arg10: memref<64x1xf32, #tpu.memory_space<vmem>>, %arg11: memref<32x64xf32, #tpu.memory_space<vmem>>, %arg12: memref<32x1xf32, #tpu.memory_space<vmem>>, %arg13: memref<128x32xf32, #tpu.memory_space<vmem>>, %arg14: memref<128x1xf32, #tpu.memory_space<vmem>>, %arg15: memref<64x128xf32, #tpu.memory_space<vmem>>, %arg16: memref<64x1xf32, #tpu.memory_space<vmem>>, %arg17: memref<32x64xf32, #tpu.memory_space<vmem>>, %arg18: memref<32x1xf32, #tpu.memory_space<vmem>>, %arg19: memref<1x32x256xf32, #tpu.memory_space<vmem>>, %arg20: memref<1x32x1xf32, #tpu.memory_space<vmem>>, %arg21: memref<1x32x64xf32, #tpu.memory_space<vmem>>) attributes {dimension_semantics = [#tpu.dimension_semantics<parallel>], iteration_bounds = array<i64: 2>, scalar_prefetch = 0 : i64, scratch_operands = 0 : i64, tpu.core_type = #tpu.core_type<tc>, window_params = [{transform_indices = @transform_0, window_bounds = array<i64: 1, 32, 256>}, {transform_indices = @transform_1, window_bounds = array<i64: 1, 256, 256>}, {pipeline_mode = #tpu.pipeline_mode<synchronous>, transform_indices = @transform_2, window_bounds = array<i64: 32, 256>}, {pipeline_mode = #tpu.pipeline_mode<synchronous>, transform_indices = @transform_3, window_bounds = array<i64: 32, 1>}, {pipeline_mode = #tpu.pipeline_mode<synchronous>, transform_indices = @transform_4, window_bounds = array<i64: 32, 32>}, {pipeline_mode = #tpu.pipeline_mode<synchronous>, transform_indices = @transform_5, window_bounds = array<i64: 32, 1>}, {pipeline_mode = #tpu.pipeline_mode<synchronous>, transform_indices = @transform_6, window_bounds = array<i64: 128, 32>}, {pipeline_mode = #tpu.pipeline_mode<synchronous>, transform_indices = @transform_7, window_bounds = array<i64: 128, 1>}, {pipeline_mode = #tpu.pipeline_mode<synchronous>, transform_indices = @transform_8, window_bounds = array<i64: 64, 128>}, {pipeline_mode = #tpu.pipeline_mode<synchronous>, transform_indices = @transform_9, window_bounds = array<i64: 64, 1>}, {pipeline_mode = #tpu.pipeline_mode<synchronous>, transform_indices = @transform_10, window_bounds = array<i64: 32, 64>}, {pipeline_mode = #tpu.pipeline_mode<synchronous>, transform_indices = @transform_11, window_bounds = array<i64: 32, 1>}, {pipeline_mode = #tpu.pipeline_mode<synchronous>, transform_indices = @transform_12, window_bounds = array<i64: 128, 32>}, {pipeline_mode = #tpu.pipeline_mode<synchronous>, transform_indices = @transform_13, window_bounds = array<i64: 128, 1>}, {pipeline_mode = #tpu.pipeline_mode<synchronous>, transform_indices = @transform_14, window_bounds = array<i64: 64, 128>}, {pipeline_mode = #tpu.pipeline_mode<synchronous>, transform_indices = @transform_15, window_bounds = array<i64: 64, 1>}, {pipeline_mode = #tpu.pipeline_mode<synchronous>, transform_indices = @transform_16, window_bounds = array<i64: 32, 64>}, {pipeline_mode = #tpu.pipeline_mode<synchronous>, transform_indices = @transform_17, window_bounds = array<i64: 32, 1>}, {transform_indices = @transform_18, window_bounds = array<i64: 1, 32, 256>}, {transform_indices = @transform_19, window_bounds = array<i64: 1, 32, 1>}, {transform_indices = @transform_20, window_bounds = array<i64: 1, 32, 64>}]} {
    %c0 = arith.constant 0 : index
    %c0_0 = arith.constant 0 : index
    %c0_1 = arith.constant 0 : index
    %0 = vector.load %arg1[%c0, %c0_0, %c0_1] : memref<1x32x256xf32, #tpu.memory_space<vmem>>, vector<1x32x256xf32>
    %1 = vector.shape_cast %0 : vector<1x32x256xf32> to vector<32x256xf32>
    %c0_2 = arith.constant 0 : index
    %c0_3 = arith.constant 0 : index
    %c0_4 = arith.constant 0 : index
    %2 = vector.load %arg2[%c0_2, %c0_3, %c0_4] : memref<1x256x256xf32, #tpu.memory_space<vmem>>, vector<1x256x256xf32>
    %3 = vector.shape_cast %2 : vector<1x256x256xf32> to vector<256x256xf32>
    %c0_5 = arith.constant 0 : index
    %c0_6 = arith.constant 0 : index
    %4 = vector.load %arg3[%c0_5, %c0_6] : memref<32x256xf32, #tpu.memory_space<vmem>>, vector<32x256xf32>
    %cst = arith.constant dense<0.000000e+00> : vector<32x256xf32>
    %5 = tpu.matmul %4, %3, %cst {dimension_numbers = #tpu.dot_dimension_numbers<[1], [0], [0], [1], [0, 0, 1, 1], [], []>} : vector<32x256xf32>, vector<256x256xf32>, vector<32x256xf32> -> vector<32x256xf32>
    %c0_7 = arith.constant 0 : index
    %c0_8 = arith.constant 0 : index
    %6 = vector.load %arg4[%c0_7, %c0_8] : memref<32x1xf32, #tpu.memory_space<vmem>>, vector<32x1xf32>
    %7 = vector.broadcast %6 : vector<32x1xf32> to vector<32x256xf32>
    %8 = arith.addf %5, %7 : vector<32x256xf32>
    %cst_9 = arith.constant dense<0.000000e+00> : vector<32xf32>
    %9 = vector.multi_reduction <add>, %1, %cst_9 [1] : vector<32x256xf32> to vector<32xf32>
    %10 = vector.shape_cast %9 : vector<32xf32> to vector<32x1xf32>
    %cst_10 = arith.constant 2.560000e+02 : f32
    %11 = vector.broadcast %cst_10 : f32 to vector<32x1xf32>
    %12 = arith.divf %10, %11 : vector<32x1xf32>
    %13 = vector.broadcast %12 : vector<32x1xf32> to vector<32x256xf32>
    %14 = arith.subf %1, %13 : vector<32x256xf32>
    %cst_11 = arith.constant dense<0.000000e+00> : vector<32xf32>
    %15 = vector.multi_reduction <add>, %8, %cst_11 [1] : vector<32x256xf32> to vector<32xf32>
    %16 = vector.shape_cast %15 : vector<32xf32> to vector<32x1xf32>
    %cst_12 = arith.constant 2.560000e+02 : f32
    %17 = vector.broadcast %cst_12 : f32 to vector<32x1xf32>
    %18 = arith.divf %16, %17 : vector<32x1xf32>
    %19 = vector.broadcast %18 : vector<32x1xf32> to vector<32x256xf32>
    %20 = arith.subf %8, %19 : vector<32x256xf32>
    %c0_13 = arith.constant 0 : index
    %c0_14 = arith.constant 0 : index
    %c0_15 = arith.constant 0 : index
    %21 = vector.load %arg20[%c0_13, %c0_14, %c0_15] : memref<1x32x1xf32, #tpu.memory_space<vmem>>, vector<1x32x1xf32>
    %22 = vector.shape_cast %21 : vector<1x32x1xf32> to vector<32x1xf32>
    %23 = vector.shape_cast %18 : vector<32x1xf32> to vector<1x32x1xf32>
    tpu.vector_store %arg20[%c0_13, %c0_14, %c0_15], %23 {strides = array<i32>} : memref<1x32x1xf32, #tpu.memory_space<vmem>>, vector<1x32x1xf32>,
    %c0_16 = arith.constant 0 : index
    %c0_17 = arith.constant 0 : index
    %24 = vector.load %arg5[%c0_16, %c0_17] : memref<32x32xf32, #tpu.memory_space<vmem>>, vector<32x32xf32>
    %cst_18 = arith.constant dense<0.000000e+00> : vector<32x256xf32>
    %25 = tpu.matmul %24, %14, %cst_18 {dimension_numbers = #tpu.dot_dimension_numbers<[1], [0], [0], [1], [0, 0, 1, 1], [], []>} : vector<32x32xf32>, vector<32x256xf32>, vector<32x256xf32> -> vector<32x256xf32>
    %c0_19 = arith.constant 0 : index
    %c0_20 = arith.constant 0 : index
    %26 = vector.load %arg6[%c0_19, %c0_20] : memref<32x1xf32, #tpu.memory_space<vmem>>, vector<32x1xf32>
    %27 = vector.broadcast %26 : vector<32x1xf32> to vector<32x256xf32>
    %28 = arith.addf %25, %27 : vector<32x256xf32>
    %c0_21 = arith.constant 0 : index
    %c0_22 = arith.constant 0 : index
    %c0_23 = arith.constant 0 : index
    %29 = vector.load %arg19[%c0_21, %c0_22, %c0_23] : memref<1x32x256xf32, #tpu.memory_space<vmem>>, vector<1x32x256xf32>
    %30 = vector.shape_cast %29 : vector<1x32x256xf32> to vector<32x256xf32>
    %31 = vector.shape_cast %28 : vector<32x256xf32> to vector<1x32x256xf32>
    tpu.vector_store %arg19[%c0_21, %c0_22, %c0_23], %31 {strides = array<i32>} : memref<1x32x256xf32, #tpu.memory_space<vmem>>, vector<1x32x256xf32>,
    %c0_24 = arith.constant 0 : index
    %c0_25 = arith.constant 0 : index
    %32 = vector.load %arg7[%c0_24, %c0_25] : memref<128x32xf32, #tpu.memory_space<vmem>>, vector<128x32xf32>
    %c0_26 = arith.constant 0 : index
    %c0_27 = arith.constant 0 : index
    %33 = vector.load %arg8[%c0_26, %c0_27] : memref<128x1xf32, #tpu.memory_space<vmem>>, vector<128x1xf32>
    %c0_28 = arith.constant 0 : index
    %c0_29 = arith.constant 0 : index
    %34 = vector.load %arg9[%c0_28, %c0_29] : memref<64x128xf32, #tpu.memory_space<vmem>>, vector<64x128xf32>
    %c0_30 = arith.constant 0 : index
    %c0_31 = arith.constant 0 : index
    %35 = vector.load %arg10[%c0_30, %c0_31] : memref<64x1xf32, #tpu.memory_space<vmem>>, vector<64x1xf32>
    %c0_32 = arith.constant 0 : index
    %c0_33 = arith.constant 0 : index
    %36 = vector.load %arg11[%c0_32, %c0_33] : memref<32x64xf32, #tpu.memory_space<vmem>>, vector<32x64xf32>
    %c0_34 = arith.constant 0 : index
    %c0_35 = arith.constant 0 : index
    %37 = vector.load %arg12[%c0_34, %c0_35] : memref<32x1xf32, #tpu.memory_space<vmem>>, vector<32x1xf32>
    %cst_36 = arith.constant dense<0.000000e+00> : vector<128x256xf32>
    %38 = tpu.matmul %32, %14, %cst_36 {dimension_numbers = #tpu.dot_dimension_numbers<[1], [0], [0], [1], [0, 0, 1, 1], [], []>} : vector<128x32xf32>, vector<32x256xf32>, vector<128x256xf32> -> vector<128x256xf32>
    %39 = vector.broadcast %33 : vector<128x1xf32> to vector<128x256xf32>
    %40 = arith.addf %38, %39 : vector<128x256xf32>
    %cst_37 = arith.constant 0.000000e+00 : f32
    %41 = vector.broadcast %cst_37 : f32 to vector<128x256xf32>
    %42 = arith.cmpf ogt, %40, %41 : vector<128x256xf32>
    %cst_38 = arith.constant 2.000000e-01 : f32
    %43 = vector.broadcast %cst_38 : f32 to vector<128x256xf32>
    %44 = arith.mulf %43, %40 : vector<128x256xf32>
    %45 = arith.select %42, %40, %44 : vector<128x256xi1>, vector<128x256xf32>
    %cst_39 = arith.constant dense<0.000000e+00> : vector<64x256xf32>
    %46 = tpu.matmul %34, %45, %cst_39 {dimension_numbers = #tpu.dot_dimension_numbers<[1], [0], [0], [1], [0, 0, 1, 1], [], []>} : vector<64x128xf32>, vector<128x256xf32>, vector<64x256xf32> -> vector<64x256xf32>
    %47 = vector.broadcast %35 : vector<64x1xf32> to vector<64x256xf32>
    %48 = arith.addf %46, %47 : vector<64x256xf32>
    %cst_40 = arith.constant 0.000000e+00 : f32
    %49 = vector.broadcast %cst_40 : f32 to vector<64x256xf32>
    %50 = arith.cmpf ogt, %48, %49 : vector<64x256xf32>
    %cst_41 = arith.constant 2.000000e-01 : f32
    %51 = vector.broadcast %cst_41 : f32 to vector<64x256xf32>
    %52 = arith.mulf %51, %48 : vector<64x256xf32>
    %53 = arith.select %50, %48, %52 : vector<64x256xi1>, vector<64x256xf32>
    %cst_42 = arith.constant dense<0.000000e+00> : vector<32x256xf32>
    %54 = tpu.matmul %36, %53, %cst_42 {dimension_numbers = #tpu.dot_dimension_numbers<[1], [0], [0], [1], [0, 0, 1, 1], [], []>} : vector<32x64xf32>, vector<64x256xf32>, vector<32x256xf32> -> vector<32x256xf32>
    %55 = vector.broadcast %37 : vector<32x1xf32> to vector<32x256xf32>
    %56 = arith.addf %54, %55 : vector<32x256xf32>
    %cst_43 = arith.constant dense<0.000000e+00> : vector<32x32xf32>
    %57 = tpu.matmul %56, %56, %cst_43 {dimension_numbers = #tpu.dot_dimension_numbers<[1], [1], [0], [0], [0, 0, 1, 0], [], []>} : vector<32x256xf32>, vector<32x256xf32>, vector<32x32xf32> -> vector<32x32xf32>
    %cst_44 = arith.constant 3.906250e-03 : f32
    %58 = vector.broadcast %cst_44 : f32 to vector<32x32xf32>
    %59 = arith.mulf %57, %58 : vector<32x32xf32>
    %c0_45 = arith.constant 0 : index
    %c0_46 = arith.constant 0 : index
    %c0_47 = arith.constant 0 : index
    %60 = vector.load %arg21[%c0_45, %c0_46, %c0_47] : memref<1x32x64xf32, #tpu.memory_space<vmem>>, vector<1x32x32xf32>
    %61 = vector.shape_cast %60 : vector<1x32x32xf32> to vector<32x32xf32>
    %62 = vector.shape_cast %59 : vector<32x32xf32> to vector<1x32x32xf32>
    tpu.vector_store %arg21[%c0_45, %c0_46, %c0_47], %62 {strides = array<i32>} : memref<1x32x64xf32, #tpu.memory_space<vmem>>, vector<1x32x32xf32>,
    %c0_48 = arith.constant 0 : index
    %c0_49 = arith.constant 0 : index
    %63 = vector.load %arg13[%c0_48, %c0_49] : memref<128x32xf32, #tpu.memory_space<vmem>>, vector<128x32xf32>
    %c0_50 = arith.constant 0 : index
    %c0_51 = arith.constant 0 : index
    %64 = vector.load %arg14[%c0_50, %c0_51] : memref<128x1xf32, #tpu.memory_space<vmem>>, vector<128x1xf32>
    %c0_52 = arith.constant 0 : index
    %c0_53 = arith.constant 0 : index
    %65 = vector.load %arg15[%c0_52, %c0_53] : memref<64x128xf32, #tpu.memory_space<vmem>>, vector<64x128xf32>
    %c0_54 = arith.constant 0 : index
    %c0_55 = arith.constant 0 : index
    %66 = vector.load %arg16[%c0_54, %c0_55] : memref<64x1xf32, #tpu.memory_space<vmem>>, vector<64x1xf32>
    %c0_56 = arith.constant 0 : index
    %c0_57 = arith.constant 0 : index
    %67 = vector.load %arg17[%c0_56, %c0_57] : memref<32x64xf32, #tpu.memory_space<vmem>>, vector<32x64xf32>
    %c0_58 = arith.constant 0 : index
    %c0_59 = arith.constant 0 : index
    %68 = vector.load %arg18[%c0_58, %c0_59] : memref<32x1xf32, #tpu.memory_space<vmem>>, vector<32x1xf32>
    %cst_60 = arith.constant dense<0.000000e+00> : vector<128x256xf32>
    %69 = tpu.matmul %63, %20, %cst_60 {dimension_numbers = #tpu.dot_dimension_numbers<[1], [0], [0], [1], [0, 0, 1, 1], [], []>} : vector<128x32xf32>, vector<32x256xf32>, vector<128x256xf32> -> vector<128x256xf32>
    %70 = vector.broadcast %64 : vector<128x1xf32> to vector<128x256xf32>
    %71 = arith.addf %69, %70 : vector<128x256xf32>
    %cst_61 = arith.constant 0.000000e+00 : f32
    %72 = vector.broadcast %cst_61 : f32 to vector<128x256xf32>
    %73 = arith.cmpf ogt, %71, %72 : vector<128x256xf32>
    %cst_62 = arith.constant 2.000000e-01 : f32
    %74 = vector.broadcast %cst_62 : f32 to vector<128x256xf32>
    %75 = arith.mulf %74, %71 : vector<128x256xf32>
    %76 = arith.select %73, %71, %75 : vector<128x256xi1>, vector<128x256xf32>
    %cst_63 = arith.constant dense<0.000000e+00> : vector<64x256xf32>
    %77 = tpu.matmul %65, %76, %cst_63 {dimension_numbers = #tpu.dot_dimension_numbers<[1], [0], [0], [1], [0, 0, 1, 1], [], []>} : vector<64x128xf32>, vector<128x256xf32>, vector<64x256xf32> -> vector<64x256xf32>
    %78 = vector.broadcast %66 : vector<64x1xf32> to vector<64x256xf32>
    %79 = arith.addf %77, %78 : vector<64x256xf32>
    %cst_64 = arith.constant 0.000000e+00 : f32
    %80 = vector.broadcast %cst_64 : f32 to vector<64x256xf32>
    %81 = arith.cmpf ogt, %79, %80 : vector<64x256xf32>
    %cst_65 = arith.constant 2.000000e-01 : f32
    %82 = vector.broadcast %cst_65 : f32 to vector<64x256xf32>
    %83 = arith.mulf %82, %79 : vector<64x256xf32>
    %84 = arith.select %81, %79, %83 : vector<64x256xi1>, vector<64x256xf32>
    %cst_66 = arith.constant dense<0.000000e+00> : vector<32x256xf32>
    %85 = tpu.matmul %67, %84, %cst_66 {dimension_numbers = #tpu.dot_dimension_numbers<[1], [0], [0], [1], [0, 0, 1, 1], [], []>} : vector<32x64xf32>, vector<64x256xf32>, vector<32x256xf32> -> vector<32x256xf32>
    %86 = vector.broadcast %68 : vector<32x1xf32> to vector<32x256xf32>
    %87 = arith.addf %85, %86 : vector<32x256xf32>
    %cst_67 = arith.constant dense<0.000000e+00> : vector<32x32xf32>
    %88 = tpu.matmul %87, %87, %cst_67 {dimension_numbers = #tpu.dot_dimension_numbers<[1], [1], [0], [0], [0, 0, 1, 0], [], []>} : vector<32x256xf32>, vector<32x256xf32>, vector<32x32xf32> -> vector<32x32xf32>
    %cst_68 = arith.constant 3.906250e-03 : f32
    %89 = vector.broadcast %cst_68 : f32 to vector<32x32xf32>
    %90 = arith.mulf %88, %89 : vector<32x32xf32>
    %c0_69 = arith.constant 0 : index
    %c0_70 = arith.constant 0 : index
    %c32 = arith.constant 32 : index
    %91 = vector.load %arg21[%c0_69, %c0_70, %c32] : memref<1x32x64xf32, #tpu.memory_space<vmem>>, vector<1x32x32xf32>
    %92 = vector.shape_cast %91 : vector<1x32x32xf32> to vector<32x32xf32>
    %93 = vector.shape_cast %90 : vector<32x32xf32> to vector<1x32x32xf32>
    tpu.vector_store %arg21[%c0_69, %c0_70, %c32], %93 {strides = array<i32>} : memref<1x32x64xf32, #tpu.memory_space<vmem>>, vector<1x32x32xf32>,
    return
  }
  func.func @transform_0(%arg0: i32) -> (i32, i32, i32) {
    %c0_i32 = arith.constant 0 : i32
    %c0_i32_0 = arith.constant 0 : i32
    %c0_i32_1 = arith.constant 0 : i32
    return %arg0, %c0_i32, %c0_i32_0 : i32, i32, i32
  }
  func.func @transform_1(%arg0: i32) -> (i32, i32, i32) {
    %c0_i32 = arith.constant 0 : i32
    %c0_i32_0 = arith.constant 0 : i32
    %c0_i32_1 = arith.constant 0 : i32
    return %arg0, %c0_i32, %c0_i32_0 : i32, i32, i32
  }
  func.func @transform_2(%arg0: i32) -> (i32, i32) {
    %c0_i32 = arith.constant 0 : i32
    %c0_i32_0 = arith.constant 0 : i32
    %c0_i32_1 = arith.constant 0 : i32
    return %c0_i32, %c0_i32_0 : i32, i32
  }
  func.func @transform_3(%arg0: i32) -> (i32, i32) {
    %c0_i32 = arith.constant 0 : i32
    %c0_i32_0 = arith.constant 0 : i32
    %c0_i32_1 = arith.constant 0 : i32
    return %c0_i32, %c0_i32_0 : i32, i32
  }
  func.func @transform_4(%arg0: i32) -> (i32, i32) {
    %c0_i32 = arith.constant 0 : i32
    %c0_i32_0 = arith.constant 0 : i32
    %c0_i32_1 = arith.constant 0 : i32
    return %c0_i32, %c0_i32_0 : i32, i32
  }
  func.func @transform_5(%arg0: i32) -> (i32, i32) {
    %c0_i32 = arith.constant 0 : i32
    %c0_i32_0 = arith.constant 0 : i32
    %c0_i32_1 = arith.constant 0 : i32
    return %c0_i32, %c0_i32_0 : i32, i32
  }
  func.func @transform_6(%arg0: i32) -> (i32, i32) {
    %c0_i32 = arith.constant 0 : i32
    %c0_i32_0 = arith.constant 0 : i32
    %c0_i32_1 = arith.constant 0 : i32
    return %c0_i32, %c0_i32_0 : i32, i32
  }
  func.func @transform_7(%arg0: i32) -> (i32, i32) {
    %c0_i32 = arith.constant 0 : i32
    %c0_i32_0 = arith.constant 0 : i32
    %c0_i32_1 = arith.constant 0 : i32
    return %c0_i32, %c0_i32_0 : i32, i32
  }
  func.func @transform_8(%arg0: i32) -> (i32, i32) {
    %c0_i32 = arith.constant 0 : i32
    %c0_i32_0 = arith.constant 0 : i32
    %c0_i32_1 = arith.constant 0 : i32
    return %c0_i32, %c0_i32_0 : i32, i32
  }
  func.func @transform_9(%arg0: i32) -> (i32, i32) {
    %c0_i32 = arith.constant 0 : i32
    %c0_i32_0 = arith.constant 0 : i32
    %c0_i32_1 = arith.constant 0 : i32
    return %c0_i32, %c0_i32_0 : i32, i32
  }
  func.func @transform_10(%arg0: i32) -> (i32, i32) {
    %c0_i32 = arith.constant 0 : i32
    %c0_i32_0 = arith.constant 0 : i32
    %c0_i32_1 = arith.constant 0 : i32
    return %c0_i32, %c0_i32_0 : i32, i32
  }
  func.func @transform_11(%arg0: i32) -> (i32, i32) {
    %c0_i32 = arith.constant 0 : i32
    %c0_i32_0 = arith.constant 0 : i32
    %c0_i32_1 = arith.constant 0 : i32
    return %c0_i32, %c0_i32_0 : i32, i32
  }
  func.func @transform_12(%arg0: i32) -> (i32, i32) {
    %c0_i32 = arith.constant 0 : i32
    %c0_i32_0 = arith.constant 0 : i32
    %c0_i32_1 = arith.constant 0 : i32
    return %c0_i32, %c0_i32_0 : i32, i32
  }
  func.func @transform_13(%arg0: i32) -> (i32, i32) {
    %c0_i32 = arith.constant 0 : i32
    %c0_i32_0 = arith.constant 0 : i32
    %c0_i32_1 = arith.constant 0 : i32
    return %c0_i32, %c0_i32_0 : i32, i32
  }
  func.func @transform_14(%arg0: i32) -> (i32, i32) {
    %c0_i32 = arith.constant 0 : i32
    %c0_i32_0 = arith.constant 0 : i32
    %c0_i32_1 = arith.constant 0 : i32
    return %c0_i32, %c0_i32_0 : i32, i32
  }
  func.func @transform_15(%arg0: i32) -> (i32, i32) {
    %c0_i32 = arith.constant 0 : i32
    %c0_i32_0 = arith.constant 0 : i32
    %c0_i32_1 = arith.constant 0 : i32
    return %c0_i32, %c0_i32_0 : i32, i32
  }
  func.func @transform_16(%arg0: i32) -> (i32, i32) {
    %c0_i32 = arith.constant 0 : i32
    %c0_i32_0 = arith.constant 0 : i32
    %c0_i32_1 = arith.constant 0 : i32
    return %c0_i32, %c0_i32_0 : i32, i32
  }
  func.func @transform_17(%arg0: i32) -> (i32, i32) {
    %c0_i32 = arith.constant 0 : i32
    %c0_i32_0 = arith.constant 0 : i32
    %c0_i32_1 = arith.constant 0 : i32
    return %c0_i32, %c0_i32_0 : i32, i32
  }
  func.func @transform_18(%arg0: i32) -> (i32, i32, i32) {
    %c0_i32 = arith.constant 0 : i32
    %c0_i32_0 = arith.constant 0 : i32
    %c0_i32_1 = arith.constant 0 : i32
    return %arg0, %c0_i32, %c0_i32_0 : i32, i32, i32
  }
  func.func @transform_19(%arg0: i32) -> (i32, i32, i32) {
    %c0_i32 = arith.constant 0 : i32
    %c0_i32_0 = arith.constant 0 : i32
    %c0_i32_1 = arith.constant 0 : i32
    return %arg0, %c0_i32, %c0_i32_0 : i32, i32, i32
  }
  func.func @transform_20(%arg0: i32) -> (i32, i32, i32) {
    %c0_i32 = arith.constant 0 : i32
    %c0_i32_0 = arith.constant 0 : i32
    %c0_i32_1 = arith.constant 0 : i32
    return %arg0, %c0_i32, %c0_i32_0 : i32, i32, i32
  }
}

module attributes {stable_mosaic.version = 11 : i64} {
  func.func @_transform_unzip_kernel(%arg0: i32, %arg1: memref<1x32x32xf32, #tpu.memory_space<vmem>>, %arg2: memref<1x32x32xf32, #tpu.memory_space<vmem>>, %arg3: memref<1x32x256xf32, #tpu.memory_space<vmem>>, %arg4: memref<1x32x1xf32, #tpu.memory_space<vmem>>, %arg5: memref<32x32xf32, #tpu.memory_space<vmem>>, %arg6: memref<32x1xf32, #tpu.memory_space<vmem>>, %arg7: memref<1x32x256xf32, #tpu.memory_space<vmem>>, %arg8: memref<1x32x32xf32, #tpu.memory_space<vmem>>) attributes {dimension_semantics = [#tpu.dimension_semantics<parallel>], iteration_bounds = array<i64: 2>, scalar_prefetch = 0 : i64, scratch_operands = 0 : i64, tpu.core_type = #tpu.core_type<tc>, window_params = [{transform_indices = @transform_0, window_bounds = array<i64: 1, 32, 32>}, {transform_indices = @transform_1, window_bounds = array<i64: 1, 32, 32>}, {transform_indices = @transform_2, window_bounds = array<i64: 1, 32, 256>}, {transform_indices = @transform_3, window_bounds = array<i64: 1, 32, 1>}, {pipeline_mode = #tpu.pipeline_mode<synchronous>, transform_indices = @transform_4, window_bounds = array<i64: 32, 32>}, {pipeline_mode = #tpu.pipeline_mode<synchronous>, transform_indices = @transform_5, window_bounds = array<i64: 32, 1>}, {transform_indices = @transform_6, window_bounds = array<i64: 1, 32, 256>}, {transform_indices = @transform_7, window_bounds = array<i64: 1, 32, 32>}]} {
    %c0 = arith.constant 0 : index
    %c0_0 = arith.constant 0 : index
    %c0_1 = arith.constant 0 : index
    %0 = vector.load %arg1[%c0, %c0_0, %c0_1] : memref<1x32x32xf32, #tpu.memory_space<vmem>>, vector<1x32x32xf32>
    %1 = vector.shape_cast %0 : vector<1x32x32xf32> to vector<32x32xf32>
    %c0_2 = arith.constant 0 : index
    %c0_3 = arith.constant 0 : index
    %c0_4 = arith.constant 0 : index
    %2 = vector.load %arg2[%c0_2, %c0_3, %c0_4] : memref<1x32x32xf32, #tpu.memory_space<vmem>>, vector<1x32x32xf32>
    %3 = vector.shape_cast %2 : vector<1x32x32xf32> to vector<32x32xf32>
    %cst = arith.constant dense<0.000000e+00> : vector<32x32xf32>
    %4 = tpu.matmul %1, %3, %cst {dimension_numbers = #tpu.dot_dimension_numbers<[1], [0], [0], [1], [0, 0, 1, 1], [], []>} : vector<32x32xf32>, vector<32x32xf32>, vector<32x32xf32> -> vector<32x32xf32>
    %c0_5 = arith.constant 0 : index
    %c0_6 = arith.constant 0 : index
    %c0_7 = arith.constant 0 : index
    %5 = vector.load %arg3[%c0_5, %c0_6, %c0_7] : memref<1x32x256xf32, #tpu.memory_space<vmem>>, vector<1x32x256xf32>
    %6 = vector.shape_cast %5 : vector<1x32x256xf32> to vector<32x256xf32>
    %cst_8 = arith.constant dense<0.000000e+00> : vector<32x256xf32>
    %7 = tpu.matmul %4, %6, %cst_8 {dimension_numbers = #tpu.dot_dimension_numbers<[1], [0], [0], [1], [0, 0, 1, 1], [], []>} : vector<32x32xf32>, vector<32x256xf32>, vector<32x256xf32> -> vector<32x256xf32>
    %c0_9 = arith.constant 0 : index
    %c0_10 = arith.constant 0 : index
    %8 = vector.load %arg5[%c0_9, %c0_10] : memref<32x32xf32, #tpu.memory_space<vmem>>, vector<32x32xf32>
    %cst_11 = arith.constant dense<0.000000e+00> : vector<32x256xf32>
    %9 = tpu.matmul %8, %7, %cst_11 {dimension_numbers = #tpu.dot_dimension_numbers<[1], [0], [0], [1], [0, 0, 1, 1], [], []>} : vector<32x32xf32>, vector<32x256xf32>, vector<32x256xf32> -> vector<32x256xf32>
    %c0_12 = arith.constant 0 : index
    %c0_13 = arith.constant 0 : index
    %10 = vector.load %arg6[%c0_12, %c0_13] : memref<32x1xf32, #tpu.memory_space<vmem>>, vector<32x1xf32>
    %11 = vector.broadcast %10 : vector<32x1xf32> to vector<32x256xf32>
    %12 = arith.addf %9, %11 : vector<32x256xf32>
    %c0_14 = arith.constant 0 : index
    %c0_15 = arith.constant 0 : index
    %c0_16 = arith.constant 0 : index
    %13 = vector.load %arg4[%c0_14, %c0_15, %c0_16] : memref<1x32x1xf32, #tpu.memory_space<vmem>>, vector<1x32x1xf32>
    %14 = vector.shape_cast %13 : vector<1x32x1xf32> to vector<32x1xf32>
    %15 = vector.broadcast %14 : vector<32x1xf32> to vector<32x256xf32>
    %16 = arith.addf %12, %15 : vector<32x256xf32>
    %c0_17 = arith.constant 0 : index
    %c0_18 = arith.constant 0 : index
    %c0_19 = arith.constant 0 : index
    %17 = vector.load %arg7[%c0_17, %c0_18, %c0_19] : memref<1x32x256xf32, #tpu.memory_space<vmem>>, vector<1x32x256xf32>
    %18 = vector.shape_cast %17 : vector<1x32x256xf32> to vector<32x256xf32>
    %19 = vector.shape_cast %16 : vector<32x256xf32> to vector<1x32x256xf32>
    tpu.vector_store %arg7[%c0_17, %c0_18, %c0_19], %19 {strides = array<i32>} : memref<1x32x256xf32, #tpu.memory_space<vmem>>, vector<1x32x256xf32>,
    %c0_20 = arith.constant 0 : index
    %c0_21 = arith.constant 0 : index
    %c0_22 = arith.constant 0 : index
    %20 = vector.load %arg8[%c0_20, %c0_21, %c0_22] : memref<1x32x32xf32, #tpu.memory_space<vmem>>, vector<1x32x32xf32>
    %21 = vector.shape_cast %20 : vector<1x32x32xf32> to vector<32x32xf32>
    %22 = vector.shape_cast %4 : vector<32x32xf32> to vector<1x32x32xf32>
    tpu.vector_store %arg8[%c0_20, %c0_21, %c0_22], %22 {strides = array<i32>} : memref<1x32x32xf32, #tpu.memory_space<vmem>>, vector<1x32x32xf32>,
    return
  }
  func.func @transform_0(%arg0: i32) -> (i32, i32, i32) {
    %c0_i32 = arith.constant 0 : i32
    %c0_i32_0 = arith.constant 0 : i32
    %c0_i32_1 = arith.constant 0 : i32
    return %arg0, %c0_i32, %c0_i32_0 : i32, i32, i32
  }
  func.func @transform_1(%arg0: i32) -> (i32, i32, i32) {
    %c0_i32 = arith.constant 0 : i32
    %c0_i32_0 = arith.constant 0 : i32
    %c0_i32_1 = arith.constant 0 : i32
    return %arg0, %c0_i32, %c0_i32_0 : i32, i32, i32
  }
  func.func @transform_2(%arg0: i32) -> (i32, i32, i32) {
    %c0_i32 = arith.constant 0 : i32
    %c0_i32_0 = arith.constant 0 : i32
    %c0_i32_1 = arith.constant 0 : i32
    return %arg0, %c0_i32, %c0_i32_0 : i32, i32, i32
  }
  func.func @transform_3(%arg0: i32) -> (i32, i32, i32) {
    %c0_i32 = arith.constant 0 : i32
    %c0_i32_0 = arith.constant 0 : i32
    %c0_i32_1 = arith.constant 0 : i32
    return %arg0, %c0_i32, %c0_i32_0 : i32, i32, i32
  }
  func.func @transform_4(%arg0: i32) -> (i32, i32) {
    %c0_i32 = arith.constant 0 : i32
    %c0_i32_0 = arith.constant 0 : i32
    %c0_i32_1 = arith.constant 0 : i32
    return %c0_i32, %c0_i32_0 : i32, i32
  }
  func.func @transform_5(%arg0: i32) -> (i32, i32) {
    %c0_i32 = arith.constant 0 : i32
    %c0_i32_0 = arith.constant 0 : i32
    %c0_i32_1 = arith.constant 0 : i32
    return %c0_i32, %c0_i32_0 : i32, i32
  }
  func.func @transform_6(%arg0: i32) -> (i32, i32, i32) {
    %c0_i32 = arith.constant 0 : i32
    %c0_i32_0 = arith.constant 0 : i32
    %c0_i32_1 = arith.constant 0 : i32
    return %arg0, %c0_i32, %c0_i32_0 : i32, i32, i32
  }
  func.func @transform_7(%arg0: i32) -> (i32, i32, i32) {
    %c0_i32 = arith.constant 0 : i32
    %c0_i32_0 = arith.constant 0 : i32
    %c0_i32_1 = arith.constant 0 : i32
    return %arg0, %c0_i32, %c0_i32_0 : i32, i32, i32
  }
}

</mosaic_0001>

<bundles_post_ra>
// kernel: mullayer_forward.5
= control target key start
LH: loop header
LB: loop body
LE: loop exit
PB: predicated region body
PF: predicated region fallthrough
CT: control target
= control target key end

     0   :  { %s1245_s0 = inlined_call_operand.vmem [shape: f32[2,32,32], index: 0, kind: input, shape index: {}]   ;;  %s1246_s1 = inlined_call_operand.vmem [shape: f32[2,32,32], index: 1, kind: input, shape index: {}]   ;;  %s1247_s2 = inlined_call_operand.vmem [shape: f32[2,32,256], index: 2, kind: input, shape index: {}]   ;;  %s1248_s3 = inlined_call_operand.vmem [shape: f32[2,32,1], index: 3, kind: input, shape index: {}]   ;;  %s1249_s4 = inlined_call_operand.hbm [shape: f32[32,32], index: 4, kind: input, shape index: {}]   ;;  %s1250_s5 = inlined_call_operand.vmem [shape: f32[32,1], index: 5, kind: input, shape index: {}]   ;;  %s1251_s6 = inlined_call_operand.vmem [shape: f32[2,32,256], index: 6, kind: output, shape index: {0}]   ;;  %s1252_s7 = inlined_call_operand.hbm [shape: f32[2,32,32], index: 7, kind: output, shape index: {1}]  }
   0x1   :  { %1254 = sst [smem:[#allocation8_spill]] %s1245_s0 }
   0x2   :  { %13 = vsyncpa [#allocation3], 0 }
   0x3   :  { %14 = vsyncpa [#allocation4], 0 }
   0x4   :  { %16 = vsyncpa [#allocation4 + $0x1], 0  ;;  %s1058_s24 = smov 0   ;;  %s1060_s25 = smov 0  }
   0x5   :  { %s1062_s26 = smov 0   ;;  %s1064_s27 = smov 0  }
   0x6 LB: > { %s1079_s28 = sadd.s32 4294967295, %s1010_s27   ;;  %s796_s29 = sadd.s32 4294967294, %s1010_s27   ;;  %s1010_s27 = sphi %s1064_s27, %s1262_s27   ;;  %s1006_s26 = sphi %s1062_s26, %s1261_s26   ;;  %s1002_s25 = sphi %s1060_s25, %s1260_s25   ;;  %s998_s24 = sphi %s1058_s24, %s1259_s24  }
   0x7   : > { %s1083_s30 = sadd.s32 1, %s1010_s27   ;;  %s201_s8 = sadd.s32 1, %s1006_s26 }
   0x8   : > { %s198_s9 = ssub.s32 %s1010_s27, %s1083_s30  ;;  %p211_p0 = scmp.ne.s32.totalorder %s1006_s26, %s1002_s25 }
   0x9   : > { %p199_p1 = scmp.eq.s32.totalorder %s198_s9, 0  ;;  %p212_p2 = scmp.eq.s32.totalorder %s1079_s28, 1 }
   0xa   : > { %p217_p3 = scmp.ne.s32.totalorder %s1002_s25, %s998_s24  ;;  %p218_p4 = scmp.eq.s32.totalorder %s796_s29, 1 }
   0xb   : > { %s1094_s10 = scalar_select %p199_p1, %s1006_s26, %s201_s8  }
   0xc   : > { %p1096_p5 = por %p212_p2, %p211_p0  ;;  %p1100_p6 = por %p218_p4, %p217_p3 }
   0xd   : > { %p797_p7 = scmp.ge.s32.totalorder %s1010_s27, 1  ;;  %p225_p8 = scmp.lt.s32.totalorder %s1010_s27, 3 }
   0xe   : > { %p870_p9 = scmp.eq.s32.totalorder %s1079_s28, 0  ;;  %s236_s15 = sshll.u32 %s1249_s4, 4  ;;  %s237_s15 = int_to_ptr.hbm [resolvable:$true] %s236_s15 }
   0xf   : > { %p226_p10 = pnand %p797_p7, %p225_p8  ;;  %s1012_s16 = smov [#allocation2]  }
  0x10   : > { %s238_s17 = sshll.u32 %s1012_s16, 4  ;;  %s1013_s18 = smov 128   ;;  %s239_s17 = int_to_ptr.vmem [resolvable:$true] %s238_s17 }
  0x11   : > { %p862_p11 = pneg %p226_p10  ;;  %s1014_s19 = smov 8  }
  0x12   : > { %289 = sbr.rel (%p226_p10) target bundleno = 483 (0x1e3), region = 44 }
  0x13   : > { %p863_p12 = pnand %p870_p9, %p862_p11 }
  0x15   : > { %865 = dma.hbm_to_vmem [thread:$0]  (!%p863_p12), %s237_s15, 512, %s239_s17, [#allocation3], %s1013_s18, %s1013_s18, %s1014_s19  }
  0x17   : > { %989 = dma.done.wait (%p870_p9), [#allocation3], 512  }
  0x18   : > { %991 = vsyncadd (%p870_p9), [#allocation3], 4294966784  ;;  %p342_p13 = scmp.lt.s32.totalorder %s1079_s28, 1  ;;  %s1257_s0 = sld [smem:[#allocation8_spill]]  ;;  %vm375_vm0 = vcmask 261120   ;;  %v501_v23 = vld [vmem:[%s1250_s5 + $0x10] sm:$0xff] }
  0x19   : > { %s339_s18 = sand.u32 1, %s1002_s25   ;;  %v499_v24 = vld [vmem:[%s1250_s5] sm:$0xff]  ;;  %v1015_v25 = vmov 0   ;;  %v502_v28 = vld [vmem:[%s1250_s5 + $0x18] sm:$0xff]  ;;  %v500_v29 = vld [vmem:[%s1250_s5 + $0x8] sm:$0xff]  ;;  %s843_s9 = sshll.u32 %s1079_s28, 5 }
  0x1a   : > { %s1118_s20 = scalar_select %p342_p13, %s1079_s28, 1  ;;  %912 = vset.pattern.permute.xlu1 %v1015_v25  ;;  %911 = vset.pattern.permute.xlu0 %v1015_v25  ;;  %v495_v34 = vld [vmem:[#allocation2] sm:$0xff]  ;;  %v496_v37 = vld [vmem:[#allocation2 + $0x8] sm:$0xff]  ;;  %v497_v39 = vld [vmem:[#allocation2 + $0x10] sm:$0xff] }
  0x1b   : > { %s802_s19 = sshll.u32 %s339_s18, 5  ;;  %515 = vperm.xlu1 %912, %v501_v23   ;;  %505 = vperm.xlu0 %911, %v499_v24   ;;  %v498_v40 = vld [vmem:[#allocation2 + $0x18] sm:$0xff]  ;;  %s657_s15 = scalar_lea.hbm %s1252_s7, %s843_s9 }
  0x1c   : > { %s1121_s21 = sshll.u32 %s1118_s20, 5  ;;  %s1253_s8 = sshll.u32 %s1118_s20, 6  ;;  %913 = vset.pattern.permute.xlu2 %v1015_v25 }
  0x1d   : > { %s351_s29 = scalar_lea.vmem %s1246_s1, %s1121_s21  ;;  %s1137_s17 = scalar_lea.vmem %s1247_s2, %s1253_s8 }
  0x1e   : > { %v374_v0 = vld [vmem:[%s351_s29 + $0x18] sm:$0xff]  ;;  %v373_v1 = vld [vmem:[%s351_s29 + $0x10] sm:$0xff]  ;;  %v372_v2 = vld [vmem:[%s351_s29 + $0x8] sm:$0xff]  ;;  %s346_s14 = scalar_lea.vmem %s1257_s0, %s1121_s21  ;;  %s1154_s22 = scalar_lea.vmem [#allocation5], %s802_s19 }
  0x1f   : > { %400 = vmatpush.msra.mxu0 %v374_v0  ;;  %844 = vmatpush.msra.mxu1 %v374_v0  ;;  %v371_v3 = vld [vmem:[%s351_s29] sm:$0xff]  ;;  %v368_v5 = vld [vmem:[%s346_s14 + $0x8] sm:$0xff]  ;;  %v369_v6 = vld [vmem:[%s346_s14 + $0x10] sm:$0xff]  ;;  %s361_s29 = scalar_lea.vmem %s1248_s3, %s1121_s21  ;;  %s658_s21 = sshll.u32 %s1154_s22, 4  ;;  %s659_s21 = int_to_ptr.vmem [resolvable:$true] %s658_s21 }
  0x20   : > { %845 = vmatpush.msra.mxu2 %v374_v0  ;;  %846 = vmatpush.msra.mxu3 %v374_v0  ;;  %v367_v4 = vld [vmem:[%s346_s14] sm:$0xff]  ;;  %v370_v7 = vld [vmem:[%s346_s14 + $0x18] sm:$0xff]  ;;  %v423_v8 = vld [vmem:[%s1137_s17 + $0x30] sm:$0xff]  ;;  %s660_s16 = sshll.u32 %s657_s15, 4  ;;  %s661_s16 = int_to_ptr.hbm [resolvable:$true] %s660_s16 }
  0x21   : > { %401 = vmatpush.msra.mxu0 %v373_v1  ;;  %847 = vmatpush.msra.mxu1 %v373_v1  ;;  %v424_v9 = vld [vmem:[%s1137_s17 + $0x38] sm:$0xff]  ;;  %v421_v10 = vld [vmem:[%s1137_s17 + $0x20] sm:$0xff]  ;;  %v422_v11 = vld [vmem:[%s1137_s17 + $0x28] sm:$0xff]  ;;  %s958_s19 = sshra.s32 %s661_s16, 4  ;;  %s959_s19 = int_to_ptr.hbm [resolvable:$true] %s958_s19 }
  0x22   : > { %848 = vmatpush.msra.mxu2 %v373_v1  ;;  %849 = vmatpush.msra.mxu3 %v373_v1  ;;  %v419_v12 = vld [vmem:[%s1137_s17 + $0x10] sm:$0xff]  ;;  %v420_v13 = vld [vmem:[%s1137_s17 + $0x18] sm:$0xff]  ;;  %v417_v14 = vld [vmem:[%s1137_s17] sm:$0xff]  ;;  %s960_s23 = scalar_lea.hbm %s959_s19, 32  ;;  %p965_p3 = scmp.lt.s32.totalorder %s959_s19, %s1252_s7 }
  0x23   : > { %402 = vmatpush.msra.mxu0 %v372_v2  ;;  %850 = vmatpush.msra.mxu1 %v372_v2  ;;  %v418_v15 = vld [vmem:[%s1137_s17 + $0x8] sm:$0xff]  ;;  %v596_v32 = vld [vmem:[%s361_s29 + $0x18] sm:$0xff]  ;;  %v595_v33 = vld [vmem:[%s361_s29 + $0x10] sm:$0xff]  ;;  %s643_s17 = scalar_lea.sflag [#allocation4], %s339_s18  ;;  %p961_p0 = scmp.ne.s32.totalorder %s959_s19, %s960_s23 }
  0x24   : > { %851 = vmatpush.msra.mxu2 %v372_v2  ;;  %852 = vmatpush.msra.mxu3 %v372_v2  ;;  %v593_v36 = vld [vmem:[%s361_s29] sm:$0xff]  ;;  %v594_v38 = vld [vmem:[%s361_s29 + $0x8] sm:$0xff]  ;;  %s964_s29 = scalar_lea.hbm %s1252_s7, 64 }
  0x25   : > { %403 = vmatpush.msra.mxu0 %v371_v3  ;;  %853 = vmatpush.msra.mxu1 %v371_v3  ;;  %p962_p1 = pnand %p961_p0, %p1096_p5  ;;  %p966_p4 = scmp.lt.s32.totalorder %s964_s29, %s960_s23 }
  0x26   : > { %813 = vmatmul.msk.f32.vlgmr.msra.gmra.mxu0 %vm375_vm0, %v367_v4  ;;  %814 = vmatmul.msk.f32.vlgmr.msra.gmra.mxu1 %vm375_vm0, %v368_v5 }
  0x27   : > { %854 = vmatpush.msra.mxu2 %v371_v3  ;;  %855 = vmatpush.msra.mxu3 %v371_v3  ;;  %p963_p2 = pneg %p962_p1  ;;  %p967_p7 = por %p966_p4, %p965_p3 }
  0x28   : > { %815 = vmatmul.msk.f32.vlgmr.msra.gmra.mxu2 %vm375_vm0, %v369_v6  ;;  %816 = vmatmul.msk.f32.vlgmr.msra.gmra.mxu3 %vm375_vm0, %v370_v7 }
  0x29   : > { %449 = vmatpush.msrb.mxu1 %v423_v8  ;;  %478 = vmatpush.msrb.mxu2 %v424_v9  ;;  %p968_p8 = pnand %p967_p7, %p963_p2 }
  0x2a   : > { %520 = vperm.xlu1 %912, %v502_v28   ;;  %510 = vperm.xlu0 %911, %v500_v29  }
  0x2b   : > { %450 = vmatpush.msrb.mxu1 %v421_v10  ;;  %479 = vmatpush.msrb.mxu2 %v422_v11 }
  0x2c   : > { %599 = vperm.xlu2 %913, %v593_v36  }
  0x2d   : > { %451 = vmatpush.msrb.mxu1 %v419_v12  ;;  %480 = vmatpush.msrb.mxu2 %v420_v13 }
  0x2f   : > { %452 = vmatpush.msrb.mxu1 %v417_v14  ;;  %481 = vmatpush.msrb.mxu2 %v418_v15 }
  0x32   : > { %614 = vperm.xlu1 %912, %v596_v32   ;;  %609 = vperm.xlu0 %911, %v595_v33  }
  0x34   : > { %604 = vperm.xlu2 %913, %v594_v38  }
  0xa3   : > { %v405_v16 = vpop.f32.mrf.mxu0  ;;  %v408_v17 = vpop.f32.mrf.mxu1 }
  0xa4   : > { %633 = vst.msk [vmem:[%s1154_s22] sm:$0xff] %vm375_vm0, %v405_v16  ;;  %817 = vmatmul.msk.f32.vlgmr.msrb.gmra.mxu1 %vm375_vm0, %v405_v16  ;;  %821 = vmatmul.msk.f32.vlgmr.msrb.gmra.mxu2 %vm375_vm0, %v405_v16 }
  0xa5   : > { %634 = vst.msk [vmem:[%s1154_s22 + $0x8] sm:$0xff] %vm375_vm0, %v408_v17 }
  0xab   : > { %v411_v18 = vpop.f32.mrf.mxu2  ;;  %v414_v19 = vpop.f32.mrf.mxu3 }
  0xac   : > { %818 = vmatmul.msk.f32.gmra.mxu1 %vm375_vm0, %v408_v17  ;;  %822 = vmatmul.msk.f32.gmra.mxu2 %vm375_vm0, %v408_v17  ;;  %635 = vst.msk [vmem:[%s1154_s22 + $0x10] sm:$0xff] %vm375_vm0, %v411_v18 }
  0xad   : > { %636 = vst.msk [vmem:[%s1154_s22 + $0x18] sm:$0xff] %vm375_vm0, %v414_v19 }
  0xb4   : > { %819 = vmatmul.msk.f32.gmra.mxu1 %vm375_vm0, %v411_v18  ;;  %823 = vmatmul.msk.f32.gmra.mxu2 %vm375_vm0, %v411_v18 }
  0xbc   : > { %820 = vmatmul.msk.f32.gmra.mxu1 %vm375_vm0, %v414_v19  ;;  %824 = vmatmul.msk.f32.gmra.mxu2 %vm375_vm0, %v414_v19 }
 0x121   : > { %v454_v20 = vpop.f32.mrf.mxu1 }
 0x127   : > { %v483_v21 = vpop.f32.mrf.mxu2 }
 0x129   : > { %v457_v22 = vpop.f32.mrf.mxu1 }
 0x12f   : > { %v486_v26 = vpop.f32.mrf.mxu2 }
 0x131   : > { %v460_v27 = vpop.f32.mrf.mxu1 }
 0x137   : > { %v489_v30 = vpop.f32.mrf.mxu2 }
 0x139   : > { %v463_v31 = vpop.f32.mrf.mxu1 }
 0x13a   : > { %547 = vmatpush.msrb.mxu3 %v463_v31 }
 0x13c   : > { %548 = vmatpush.msrb.mxu3 %v460_v27 }
 0x13e   : > { %549 = vmatpush.msrb.mxu3 %v457_v22 }
 0x13f   : > { %v492_v35 = vpop.f32.mrf.mxu2 }
 0x140   : > { %550 = vmatpush.msrb.mxu3 %v454_v20  ;;  %576 = vmatpush.msrb.mxu0 %v492_v35 }
 0x141   : > { %825 = vmatmul.msk.f32.vlgmr.msrb.gmra.mxu3 %vm375_vm0, %v495_v34 }
 0x142   : > { %577 = vmatpush.msrb.mxu0 %v489_v30 }
 0x144   : > { %578 = vmatpush.msrb.mxu0 %v486_v26 }
 0x146   : > { %579 = vmatpush.msrb.mxu0 %v483_v21 }
 0x147   : > { %829 = vmatmul.msk.f32.vlgmr.msrb.gmra.mxu0 %vm375_vm0, %v495_v34 }
 0x149   : > { %826 = vmatmul.msk.f32.gmra.mxu3 %vm375_vm0, %v496_v37 }
 0x14f   : > { %830 = vmatmul.msk.f32.gmra.mxu0 %vm375_vm0, %v496_v37 }
 0x151   : > { %827 = vmatmul.msk.f32.gmra.mxu3 %vm375_vm0, %v497_v39 }
 0x157   : > { %831 = vmatmul.msk.f32.gmra.mxu0 %vm375_vm0, %v497_v39 }
 0x159   : > { %828 = vmatmul.msk.f32.gmra.mxu3 %vm375_vm0, %v498_v40 }
 0x15f   : > { %832 = vmatmul.msk.f32.gmra.mxu0 %vm375_vm0, %v498_v40 }
 0x160   : > { %971 = shalt.err (!%p968_p8)
}
 0x161   : > { %s1016_s18 = smov 128   ;;  %s1017_s9 = smov 8   ;;  %v506_v41 = vpop.permute.xlu0 %505  ;;  %v600_v42 = vpop.permute.xlu2 %599 }
 0x162   : > { %860 = dma.vmem_to_hbm [thread:$0]  (%p1096_p5), %s659_s21, 512, %s661_s16, %s643_s17, %s1016_s18, %s1016_s18, %s1017_s9   ;;  %v516_v49 = vpop.permute.xlu1 %515 }
 0x163   : > { %s1258_s13 = sshll.u32 %s1118_s20, 6 }
 0x164   : > { %s1218_s8 = scalar_lea.vmem %s1251_s6, %s1258_s13 }
 0x169   : > { %v511_v50 = vpop.permute.xlu0 %510  ;;  %v605_v51 = vpop.permute.xlu2 %604 }
 0x16a   : > { %v521_v58 = vpop.permute.xlu1 %520 }
 0x171   : > { %v610_v63 = vpop.permute.xlu0 %609 }
 0x172   : > { %v615_v6 = vpop.permute.xlu1 %614 }
 0x1c4   : > { %v552_v43 = vpop.f32.mrf.mxu3  ;;  %v581_v44 = vpop.f32.mrf.mxu0 }
 0x1c5   : > { %v553_v45 = vadd.f32 %v552_v43, %v506_v41  ;;  %v582_v46 = vadd.f32 %v581_v44, %v506_v41 }
 0x1c7   : > { %v617_v47 = vadd.f32 %v600_v42, %v553_v45  ;;  %v618_v48 = vadd.f32 %v600_v42, %v582_v46 }
 0x1c9   : > { %625 = vst [vmem:[%s1218_s8] sm:$0xff] %v617_v47 }
 0x1ca   : > { %626 = vst [vmem:[%s1218_s8 + $0x8] sm:$0xff] %v618_v48 }
 0x1cc   : > { %v555_v52 = vpop.f32.mrf.mxu3  ;;  %v584_v53 = vpop.f32.mrf.mxu0 }
 0x1cd   : > { %v556_v54 = vadd.f32 %v555_v52, %v511_v50  ;;  %v585_v55 = vadd.f32 %v584_v53, %v511_v50 }
 0x1cf   : > { %v619_v56 = vadd.f32 %v605_v51, %v556_v54  ;;  %v620_v57 = vadd.f32 %v605_v51, %v585_v55 }
 0x1d1   : > { %627 = vst [vmem:[%s1218_s8 + $0x10] sm:$0xff] %v619_v56 }
 0x1d2   : > { %628 = vst [vmem:[%s1218_s8 + $0x18] sm:$0xff] %v620_v57 }
 0x1d4   : > { %v558_v59 = vpop.f32.mrf.mxu3  ;;  %v587_v60 = vpop.f32.mrf.mxu0 }
 0x1d5   : > { %v559_v61 = vadd.f32 %v558_v59, %v516_v49  ;;  %v588_v62 = vadd.f32 %v587_v60, %v516_v49 }
 0x1d7   : > { %v621_v0 = vadd.f32 %v610_v63, %v559_v61  ;;  %v622_v1 = vadd.f32 %v610_v63, %v588_v62 }
 0x1d9   : > { %629 = vst [vmem:[%s1218_s8 + $0x20] sm:$0xff] %v621_v0 }
 0x1da   : > { %630 = vst [vmem:[%s1218_s8 + $0x28] sm:$0xff] %v622_v1 }
 0x1dc   : > { %v561_v2 = vpop.f32.mrf.mxu3  ;;  %v590_v3 = vpop.f32.mrf.mxu0 }
 0x1dd   : > { %v562_v4 = vadd.f32 %v561_v2, %v521_v58  ;;  %v591_v5 = vadd.f32 %v590_v3, %v521_v58 }
 0x1df   : > { %v623_v7 = vadd.f32 %v615_v6, %v562_v4  ;;  %v624_v8 = vadd.f32 %v615_v6, %v591_v5 }
 0x1e1   : > { %631 = vst [vmem:[%s1218_s8 + $0x30] sm:$0xff] %v623_v7 }
 0x1e2   : > { %632 = vst [vmem:[%s1218_s8 + $0x38] sm:$0xff] %v624_v8 }
 0x1e3 PF: > { %p872_p5 = scmp.ge.s32.totalorder %s1010_s27, 2  ;;  %s683_s11 = sand.u32 1, %s998_s24  }
 0x1e4   : > { %s684_s20 = scalar_lea.sflag [#allocation4], %s683_s11 }
 0x1e5   : > { %p867_p9 = pnand %p872_p5, %p1100_p6 }
 0x1e7   : > { %p868_p10 = pneg %p867_p9 }
 0x1e9   : > { %993 = dma.done.wait (%p868_p10), %s684_s20, 512  }
 0x1ea   : > { %995 = vsyncadd (%p868_p10), %s684_s20, 4294966784  ;;  %p19_p11 = scmp.ge.s32.totalorder %s1083_s30, 4   ;;  %s1259_s24 = smov %s1002_s25 }
 0x1eb   : > { %s1260_s25 = smov %s1006_s26  ;;  %s1261_s26 = smov %s1094_s10 }
 0x1ec   : > { %s1262_s27 = smov %s1083_s30  ;;  %21 = sbr.rel (!%p19_p11) target bundleno = 6 (0x6), region = 105 }
 0x1f1   :  { %690 = vsyncpa [#allocation3], 1 }
 0x1f2   :  { %692 = vsyncpa [#allocation3 + $0x1], 1 }
 0x1f3   :  { %693 = vsyncpa [#allocation4], 1 }
 0x1f4   :  { %695 = vsyncpa [#allocation4 + $0x1], 1 }

// kernel: mullayer_forward.3
= control target key start
LH: loop header
LB: loop body
LE: loop exit
PB: predicated region body
PF: predicated region fallthrough
CT: control target
= control target key end

     0   :  { %s4517_s0 = inlined_call_operand.vmem [shape: f32[2,32,256], index: 0, kind: input, shape index: {}]   ;;  %s4518_s1 = inlined_call_operand.vmem [shape: f32[2,256,256], index: 1, kind: input, shape index: {}]   ;;  %s4519_s2 = inlined_call_operand.hbm [shape: f32[32,256], index: 2, kind: input, shape index: {}]   ;;  %s4520_s3 = inlined_call_operand.vmem [shape: f32[32,1], index: 3, kind: input, shape index: {}]   ;;  %s4521_s4 = inlined_call_operand.hbm [shape: f32[32,32], index: 4, kind: input, shape index: {}]   ;;  %s4522_s5 = inlined_call_operand.vmem [shape: f32[32,1], index: 5, kind: input, shape index: {}]   ;;  %s4523_s6 = inlined_call_operand.vmem [shape: f32[128,32], index: 6, kind: input, shape index: {}]   ;;  %s4524_s7 = inlined_call_operand.vmem [shape: f32[128,1], index: 7, kind: input, shape index: {}]   ;;  %s4525_s8 = inlined_call_operand.hbm [shape: f32[64,128], index: 8, kind: input, shape index: {}]   ;;  %s4526_s9 = inlined_call_operand.vmem [shape: f32[64,1], index: 9, kind: input, shape index: {}]   ;;  %s4527_s10 = inlined_call_operand.hbm [shape: f32[32,64], index: 10, kind: input, shape index: {}]   ;;  %s4528_s11 = inlined_call_operand.vmem [shape: f32[32,1], index: 11, kind: input, shape index: {}]   ;;  %s4529_s12 = inlined_call_operand.vmem [shape: f32[128,32], index: 12, kind: input, shape index: {}]   ;;  %s4530_s13 = inlined_call_operand.vmem [shape: f32[128,1], index: 13, kind: input, shape index: {}]   ;;  %s4531_s14 = inlined_call_operand.hbm [shape: f32[64,128], index: 14, kind: input, shape index: {}]   ;;  %s4532_s15 = inlined_call_operand.vmem [shape: f32[64,1], index: 15, kind: input, shape index: {}]   ;;  %s4533_s16 = inlined_call_operand.hbm [shape: f32[32,64], index: 16, kind: input, shape index: {}]   ;;  %s4534_s17 = inlined_call_operand.vmem [shape: f32[32,1], index: 17, kind: input, shape index: {}]   ;;  %s4535_s18 = inlined_call_operand.vmem [shape: f32[2,32,256], index: 18, kind: output, shape index: {0}]   ;;  %s4536_s19 = inlined_call_operand.vmem [shape: f32[2,32,1], index: 19, kind: output, shape index: {1}]   ;;  %s4537_s20 = inlined_call_operand.vmem [shape: f32[2,32,64], index: 20, kind: output, shape index: {2}]  }
   0x1   :  { %4582 = sst [smem:[#allocation55_spill]] %s4517_s0 }
   0x2   :  { %4583 = sst [smem:[#allocation56_spill]] %s4518_s1 }
   0x3   :  { %4584 = sst [smem:[#allocation57_spill]] %s4519_s2 }
   0x4   :  { %4585 = sst [smem:[#allocation58_spill]] %s4520_s3 }
   0x5   :  { %4586 = sst [smem:[#allocation59_spill]] %s4521_s4 }
   0x6   :  { %4587 = sst [smem:[#allocation60_spill]] %s4527_s10 }
   0x7   :  { %4588 = sst [smem:[#allocation61_spill]] %s4529_s12 }
   0x8   :  { %4589 = sst [smem:[#allocation62_spill]] %s4537_s20 }
   0x9   :  { %26 = vsyncpa [#allocation3], 0 }
   0xa   :  { %27 = vsyncpa [#allocation5], 0 }
   0xb   :  { %28 = vsyncpa [#allocation8], 0 }
   0xc   :  { %29 = vsyncpa [#allocation11], 0  ;;  %s3402_s1 = smov 0  }
   0xd LB: > { %4590 = sst [smem:[#allocation16_spill]] %s3282_s1  ;;  %s3411_s25 = sadd.s32 4294967295, %s3282_s1   ;;  %s3282_s1 = sphi %s3402_s1, %s35_s1  }
   0xe   : > { %s4591_s24 = sld [smem:[#allocation59_spill]]  ;;  %p2847_p0 = scmp.ge.s32.totalorder %s3282_s1, 1 }
   0xf   : > { %p506_p1 = scmp.lt.s32.totalorder %s3282_s1, 3  ;;  %p3042_p2 = scmp.eq.s32.totalorder %s3411_s25, 0 }
  0x10   : > { %s3284_s26 = smov [#allocation4]   ;;  %s4593_s10 = sld [smem:[#allocation60_spill]] }
  0x11   : > { %p3416_p3 = pnand %p2847_p0, %p506_p1  ;;  %s536_s27 = sshll.u32 %s3284_s26, 4  ;;  %s537_s27 = int_to_ptr.vmem [resolvable:$true] %s536_s27 }
  0x12   : > { %s3285_s0 = smov [#allocation7]   ;;  %s3286_s1 = smov 128  }
  0x13   : > { %p3023_p4 = pneg %p3416_p3  ;;  %s576_s21 = sshll.u32 %s3285_s0, 4  ;;  %s577_s21 = int_to_ptr.vmem [resolvable:$true] %s576_s21 }
  0x14   : > { %s534_s2 = sshll.u32 %s4591_s24, 4  ;;  %s4595_s24 = sld [smem:[#allocation57_spill]]  ;;  %s535_s2 = int_to_ptr.hbm [resolvable:$true] %s534_s2 }
  0x15   : > { %p3427_p5 = pnand %p3042_p2, %p3023_p4  ;;  %s3287_s20 = smov 8  }
  0x16   : > { %s574_s29 = sshll.u32 %s4593_s10, 4  ;;  %s3288_s28 = smov [#allocation2]   ;;  %s575_s29 = int_to_ptr.hbm [resolvable:$true] %s574_s29 }
  0x17   : > { %3029 = dma.hbm_to_vmem [thread:$0]  (!%p3427_p5), %s535_s2, 512, %s537_s27, [#allocation5], %s3286_s1, %s3286_s1, %s3287_s20  }
  0x18   : > { %3035 = dma.hbm_to_vmem [thread:$0]  (!%p3427_p5), %s575_s29, 512, %s577_s21, [#allocation8], %s3286_s1, %s3286_s1, %s3287_s20  }
  0x19   : > { %s519_s4 = sshll.u32 %s3288_s28, 4  ;;  %s3289_s0 = smov 256   ;;  %s520_s4 = int_to_ptr.vmem [resolvable:$true] %s519_s4 }
  0x1a   : > { %s517_s26 = sshll.u32 %s4595_s24, 4  ;;  %s3290_s22 = smov 16   ;;  %s518_s26 = int_to_ptr.hbm [resolvable:$true] %s517_s26 }
  0x1b   : > { %3026 = dma.hbm_to_vmem [thread:$0]  (!%p3427_p5), %s518_s26, 1024, %s520_s4, [#allocation3], %s3289_s0, %s3289_s0, %s3290_s22  }
  0x1c   : > { %s557_s10 = sshll.u32 %s4525_s8, 4  ;;  %s3291_s2 = smov [#allocation6]   ;;  %s558_s10 = int_to_ptr.hbm [resolvable:$true] %s557_s10 }
  0x1d   : > { %s559_s27 = sshll.u32 %s3291_s2, 4  ;;  %s597_s21 = sshll.u32 %s4531_s14, 4  ;;  %s560_s27 = int_to_ptr.vmem [resolvable:$true] %s559_s27  ;;  %s598_s21 = int_to_ptr.hbm [resolvable:$true] %s597_s21 }
  0x1e   : > { %3032 = dma.hbm_to_vmem [thread:$0]  (!%p3427_p5), %s558_s10, 1024, %s560_s27, [#allocation5], %s3286_s1, %s3286_s1, %s3287_s20  }
  0x1f   : > { %s3292_s26 = smov [#allocation9]   ;;  %s614_s22 = sshll.u32 %s4533_s16, 4  ;;  %s615_s22 = int_to_ptr.hbm [resolvable:$true] %s614_s22 }
  0x20   : > { %s599_s28 = sshll.u32 %s3292_s26, 4  ;;  %s3293_s12 = smov [#allocation10]   ;;  %s600_s28 = int_to_ptr.vmem [resolvable:$true] %s599_s28 }
  0x21   : > { %3038 = dma.hbm_to_vmem [thread:$0]  (!%p3427_p5), %s598_s21, 1024, %s600_s28, [#allocation8], %s3286_s1, %s3286_s1, %s3287_s20  }
  0x22   : > { %s616_s23 = sshll.u32 %s3293_s12, 4  ;;  %651 = sbr.rel (%p3416_p3) target bundleno = 1503 (0x5df), region = 92  ;;  %s617_s23 = int_to_ptr.vmem [resolvable:$true] %s616_s23 }
  0x23   : > { %3041 = dma.hbm_to_vmem [thread:$0]  (!%p3427_p5), %s615_s22, 512, %s617_s23, [#allocation11], %s3286_s1, %s3286_s1, %s3287_s20  }
  0x27   : > { %3265 = dma.done.wait (%p3042_p2), [#allocation3], 1024  }
  0x28   : > { %3267 = vsyncadd (%p3042_p2), [#allocation3], 4294966272 }
  0x29   : > { %3269 = dma.done.wait (%p3042_p2), [#allocation5], 1536  }
  0x2a   : > { %3271 = vsyncadd (%p3042_p2), [#allocation5], 4294965760 }
  0x2b   : > { %3273 = dma.done.wait (%p3042_p2), [#allocation8], 1536  }
  0x2c   : > { %3275 = vsyncadd (%p3042_p2), [#allocation8], 4294965760 }
  0x2d   : > { %3277 = dma.done.wait (%p3042_p2), [#allocation11], 512  }
  0x2e   : > { %3279 = vsyncadd (%p3042_p2), [#allocation11], 4294966784  ;;  %p750_p6 = scmp.lt.s32.totalorder %s3411_s25, 1  ;;  %v3294_v0 = vmov 0   ;;  %s4596_s30 = sld [smem:[#allocation56_spill]]  ;;  %v1193_v15 = vld [vmem:[%s4524_s7 + $0x78] sm:$0xff] }
  0x2f   : > { %3075 = vset.pattern.permute.xlu2 %v3294_v0  ;;  %3077 = vset.pattern.permute.xlu1 %v3294_v0  ;;  %s4597_s29 = sld [smem:[#allocation55_spill]]  ;;  %v1192_v38 = vld [vmem:[%s4524_s7 + $0x70] sm:$0xff]  ;;  %v1189_v55 = vld [vmem:[%s4524_s7 + $0x58] sm:$0xff]  ;;  %vm1083_vm1 = vcmask 261120   ;;  %vm1050_vm2 = vcmask 7168  }
  0x30   : > { %s4681_s25 = smov (!%p750_p6, %s3411_s25), 1  ;;  %3076 = vset.pattern.permute.xlu0 %v3294_v0  ;;  %1295 = vperm.xlu2 %3075, %v1193_v15   ;;  %s4598_s27 = sld [smem:[#allocation58_spill]] }
  0x31   : > { %s2963_s10 = sshll.u32 %s4681_s25, 9  ;;  %s2962_s20 = sshll.u32 %s4681_s25, 6 }
  0x32   : > { %s4185_s4 = scalar_lea.vmem %s4535_s18, %s2962_s20  ;;  %s4645_s22 = sld [smem:[#allocation61_spill]] }
  0x34   : > { %s3497_s24 = scalar_lea.vmem %s4596_s30, %s2963_s10  ;;  %s4672_s30 = sld [smem:[#allocation62_spill]] }
  0x35   : > { %s3504_s21 = scalar_lea.vmem %s4597_s29, %s2962_s20  ;;  %v814_v1 = vld [vmem:[%s3497_s24 + $0xf8] sm:$0xff]  ;;  %v812_v2 = vld [vmem:[%s3497_s24 + $0xe8] sm:$0xff]  ;;  %v813_v12 = vld [vmem:[%s3497_s24 + $0xf0] sm:$0xff] }
  0x36   : > { %v846_v3 = vld [vmem:[%s3497_s24 + $0x1f8] sm:$0xff]  ;;  %937 = vmatpush.msra.mxu2 %v814_v1  ;;  %v3510_v4 = vld [vmem:[%s3504_s21 + $0x30] sm:$0xff]  ;;  %v844_v10 = vld [vmem:[%s3497_s24 + $0x1e8] sm:$0xff]  ;;  %879 = vmatpush.msra.mxu0 %v813_v12 }
  0x37   : > { %966 = vmatpush.msra.mxu3 %v846_v3  ;;  %v3513_v5 = vld [vmem:[%s3504_s21 + $0x38] sm:$0xff]  ;;  %v3516_v6 = vld [vmem:[%s3504_s21 + $0x10] sm:$0xff]  ;;  %v808_v14 = vld [vmem:[%s3497_s24 + $0xc8] sm:$0xff] }
  0x38   : > { %v1004_v7 = vadd.f32 %v3513_v5, %v3510_v4  ;;  %v3521_v8 = vld [vmem:[%s3504_s21 + $0x18] sm:$0xff]  ;;  %938 = vmatpush.msra.mxu2 %v812_v2  ;;  %v811_v16 = vld [vmem:[%s3497_s24 + $0xe0] sm:$0xff]  ;;  %v845_v17 = vld [vmem:[%s3497_s24 + $0x1f0] sm:$0xff]  ;;  %1290 = vperm.xlu2 %3075, %v1192_v38  }
  0x39   : > { %v810_v9 = vld [vmem:[%s3497_s24 + $0xd8] sm:$0xff]  ;;  %v998_v11 = vadd.f32 %v3521_v8, %v3516_v6  ;;  %967 = vmatpush.msra.mxu3 %v844_v10  ;;  %v840_v19 = vld [vmem:[%s3497_s24 + $0x1c8] sm:$0xff]  ;;  %v809_v20 = vld [vmem:[%s3497_s24 + $0xd0] sm:$0xff]  ;;  %880 = vmatpush.msra.mxu0 %v811_v16 }
  0x3a   : > { %v842_v13 = vld [vmem:[%s3497_s24 + $0x1d8] sm:$0xff]  ;;  %1005 = vadd.xlane.f32.xlu0 %v1004_v7  ;;  %939 = vmatpush.msra.mxu2 %v810_v9  ;;  %v843_v21 = vld [vmem:[%s3497_s24 + $0x1e0] sm:$0xff]  ;;  %v3544_v24 = vld [vmem:[%s3504_s21 + $0x28] sm:$0xff] }
  0x3b   : > { %999 = vadd.xlane.f32.xlu1 %v998_v11  ;;  %v806_v18 = vld [vmem:[%s3497_s24 + $0xb8] sm:$0xff]  ;;  %968 = vmatpush.msra.mxu3 %v842_v13  ;;  %v3541_v23 = vld [vmem:[%s3504_s21 + $0x20] sm:$0xff]  ;;  %v804_v26 = vld [vmem:[%s3497_s24 + $0xa8] sm:$0xff] }
  0x3c   : > { %v838_v22 = vld [vmem:[%s3497_s24 + $0x1b8] sm:$0xff]  ;;  %940 = vmatpush.msra.mxu2 %v808_v14  ;;  %v3547_v25 = vld [vmem:[%s3504_s21] sm:$0xff]  ;;  %908 = vmatpush.msra.mxu1 %v845_v17  ;;  %v1001_v27 = vadd.f32 %v3544_v24, %v3541_v23  ;;  %v3553_v28 = vld [vmem:[%s3504_s21 + $0x8] sm:$0xff] }
  0x3d   : > { %969 = vmatpush.msra.mxu3 %v840_v19  ;;  %v807_v29 = vld [vmem:[%s3497_s24 + $0xc0] sm:$0xff]  ;;  %881 = vmatpush.msra.mxu0 %v809_v20  ;;  %v995_v30 = vadd.f32 %v3553_v28, %v3547_v25  ;;  %v841_v31 = vld [vmem:[%s3497_s24 + $0x1d0] sm:$0xff]  ;;  %v802_v32 = vld [vmem:[%s3497_s24 + $0x98] sm:$0xff] }
  0x3e   : > { %941 = vmatpush.msra.mxu2 %v806_v18  ;;  %909 = vmatpush.msra.mxu1 %v843_v21  ;;  %v836_v33 = vld [vmem:[%s3497_s24 + $0x1a8] sm:$0xff]  ;;  %v805_v34 = vld [vmem:[%s3497_s24 + $0xb0] sm:$0xff]  ;;  %v839_v35 = vld [vmem:[%s3497_s24 + $0x1c0] sm:$0xff] }
  0x3f   : > { %970 = vmatpush.msra.mxu3 %v838_v22  ;;  %882 = vmatpush.msra.mxu0 %v807_v29  ;;  %v800_v36 = vld [vmem:[%s3497_s24 + $0x88] sm:$0xff]  ;;  %v834_v37 = vld [vmem:[%s3497_s24 + $0x198] sm:$0xff]  ;;  %v803_v39 = vld [vmem:[%s3497_s24 + $0xa0] sm:$0xff] }
  0x40   : > { %942 = vmatpush.msra.mxu2 %v804_v26  ;;  %910 = vmatpush.msra.mxu1 %v841_v31  ;;  %v837_v40 = vld [vmem:[%s3497_s24 + $0x1b0] sm:$0xff]  ;;  %v798_v41 = vld [vmem:[%s3497_s24 + $0x78] sm:$0xff]  ;;  %v832_v42 = vld [vmem:[%s3497_s24 + $0x188] sm:$0xff] }
  0x41   : > { %971 = vmatpush.msra.mxu3 %v836_v33  ;;  %883 = vmatpush.msra.mxu0 %v805_v34  ;;  %v801_v43 = vld [vmem:[%s3497_s24 + $0x90] sm:$0xff]  ;;  %v835_v44 = vld [vmem:[%s3497_s24 + $0x1a0] sm:$0xff]  ;;  %v796_v45 = vld [vmem:[%s3497_s24 + $0x68] sm:$0xff] }
  0x42   : > { %1002 = vadd.xlane.f32.xlu0 %v1001_v27  ;;  %943 = vmatpush.msra.mxu2 %v802_v32  ;;  %v830_v46 = vld [vmem:[%s3497_s24 + $0x178] sm:$0xff]  ;;  %v799_v47 = vld [vmem:[%s3497_s24 + $0x80] sm:$0xff]  ;;  %v833_v48 = vld [vmem:[%s3497_s24 + $0x190] sm:$0xff] }
  0x43   : > { %996 = vadd.xlane.f32.xlu1 %v995_v30  ;;  %911 = vmatpush.msra.mxu1 %v839_v35  ;;  %v794_v49 = vld [vmem:[%s3497_s24 + $0x58] sm:$0xff]  ;;  %v828_v50 = vld [vmem:[%s3497_s24 + $0x168] sm:$0xff]  ;;  %v797_v51 = vld [vmem:[%s3497_s24 + $0x70] sm:$0xff] }
  0x44   : > { %944 = vmatpush.msra.mxu2 %v800_v36  ;;  %972 = vmatpush.msra.mxu3 %v834_v37  ;;  %v831_v52 = vld [vmem:[%s3497_s24 + $0x180] sm:$0xff]  ;;  %v792_v53 = vld [vmem:[%s3497_s24 + $0x48] sm:$0xff]  ;;  %v826_v54 = vld [vmem:[%s3497_s24 + $0x158] sm:$0xff] }
  0x45   : > { %884 = vmatpush.msra.mxu0 %v803_v39  ;;  %912 = vmatpush.msra.mxu1 %v837_v40  ;;  %v795_v56 = vld [vmem:[%s3497_s24 + $0x60] sm:$0xff]  ;;  %v829_v57 = vld [vmem:[%s3497_s24 + $0x170] sm:$0xff]  ;;  %v790_v58 = vld [vmem:[%s3497_s24 + $0x38] sm:$0xff] }
  0x46   : > { %945 = vmatpush.msra.mxu2 %v798_v41  ;;  %973 = vmatpush.msra.mxu3 %v832_v42  ;;  %v824_v59 = vld [vmem:[%s3497_s24 + $0x148] sm:$0xff]  ;;  %v793_v60 = vld [vmem:[%s3497_s24 + $0x50] sm:$0xff]  ;;  %v827_v61 = vld [vmem:[%s3497_s24 + $0x160] sm:$0xff] }
  0x47   : > { %885 = vmatpush.msra.mxu0 %v801_v43  ;;  %913 = vmatpush.msra.mxu1 %v835_v44  ;;  %v788_v62 = vld [vmem:[%s3497_s24 + $0x28] sm:$0xff]  ;;  %v822_v63 = vld [vmem:[%s3497_s24 + $0x138] sm:$0xff]  ;;  %v791_v0 = vld [vmem:[%s3497_s24 + $0x40] sm:$0xff] }
  0x48   : > { %946 = vmatpush.msra.mxu2 %v796_v45  ;;  %974 = vmatpush.msra.mxu3 %v830_v46  ;;  %v825_v1 = vld [vmem:[%s3497_s24 + $0x150] sm:$0xff]  ;;  %v786_v2 = vld [vmem:[%s3497_s24 + $0x18] sm:$0xff]  ;;  %v820_v3 = vld [vmem:[%s3497_s24 + $0x128] sm:$0xff] }
  0x49   : > { %886 = vmatpush.msra.mxu0 %v799_v47  ;;  %914 = vmatpush.msra.mxu1 %v833_v48  ;;  %v789_v7 = vld [vmem:[%s3497_s24 + $0x30] sm:$0xff]  ;;  %v823_v9 = vld [vmem:[%s3497_s24 + $0x140] sm:$0xff]  ;;  %v784_v10 = vld [vmem:[%s3497_s24 + $0x8] sm:$0xff] }
  0x4a   : > { %947 = vmatpush.msra.mxu2 %v794_v49  ;;  %975 = vmatpush.msra.mxu3 %v828_v50  ;;  %v818_v11 = vld [vmem:[%s3497_s24 + $0x118] sm:$0xff]  ;;  %v847_v12 = vld [vmem:[#allocation2] sm:$0xff]  ;;  %v1188_v13 = vld [vmem:[%s4524_s7 + $0x50] sm:$0xff]  ;;  %v3295_v49 = vmov 256.0  }
  0x4b   : > { %887 = vmatpush.msra.mxu0 %v797_v51  ;;  %915 = vmatpush.msra.mxu1 %v831_v52  ;;  %v787_v14 = vld [vmem:[%s3497_s24 + $0x20] sm:$0xff]  ;;  %v821_v15 = vld [vmem:[%s3497_s24 + $0x130] sm:$0xff]  ;;  %v816_v16 = vld [vmem:[%s3497_s24 + $0x108] sm:$0xff]  ;;  %3078 = vrcp.f32 %v3295_v49 }
  0x4c   : > { %948 = vmatpush.msra.mxu2 %v792_v53  ;;  %976 = vmatpush.msra.mxu3 %v826_v54  ;;  %v848_v17 = vld [vmem:[#allocation2 + $0x8] sm:$0xff]  ;;  %v785_v18 = vld [vmem:[%s3497_s24 + $0x10] sm:$0xff]  ;;  %v819_v19 = vld [vmem:[%s3497_s24 + $0x120] sm:$0xff] }
  0x4d   : > { %1275 = vperm.xlu2 %3075, %v1189_v55   ;;  %888 = vmatpush.msra.mxu0 %v795_v56  ;;  %v1191_v20 = vld [vmem:[%s4524_s7 + $0x68] sm:$0xff]  ;;  %v1190_v21 = vld [vmem:[%s4524_s7 + $0x60] sm:$0xff]  ;;  %v817_v26 = vld [vmem:[%s3497_s24 + $0x110] sm:$0xff] }
  0x4e   : > { %916 = vmatpush.msra.mxu1 %v829_v57  ;;  %949 = vmatpush.msra.mxu2 %v790_v58  ;;  %v783_v22 = vld [vmem:[%s3497_s24] sm:$0xff]  ;;  %v849_v29 = vld [vmem:[#allocation2 + $0x10] sm:$0xff]  ;;  %v1187_v30 = vld [vmem:[%s4524_s7 + $0x48] sm:$0xff] }
  0x4f   : > { %977 = vmatpush.msra.mxu3 %v824_v59  ;;  %889 = vmatpush.msra.mxu0 %v793_v60  ;;  %v815_v27 = vld [vmem:[%s3497_s24 + $0x100] sm:$0xff]  ;;  %v850_v31 = vld [vmem:[#allocation2 + $0x18] sm:$0xff]  ;;  %v852_v36 = vld [vmem:[#allocation2 + $0x28] sm:$0xff]  ;;  %s2965_s24 = sshll.u32 %s4681_s25, 5  ;;  %s3296_s25 = smov 32  }
  0x50   : > { %917 = vmatpush.msra.mxu1 %v827_v61  ;;  %950 = vmatpush.msra.mxu2 %v788_v62  ;;  %v1182_v32 = vld [vmem:[%s4524_s7 + $0x20] sm:$0xff]  ;;  %v1185_v33 = vld [vmem:[%s4524_s7 + $0x38] sm:$0xff]  ;;  %v1179_v37 = vld [vmem:[%s4524_s7 + $0x8] sm:$0xff]  ;;  %s769_s12 = scalar_lea.vmem %s4536_s19, %s2965_s24  ;;  %s4465_s2 = scalar_lea.vmem %s4672_s30, %s2965_s24 }
  0x51   : > { %978 = vmatpush.msra.mxu3 %v822_v63  ;;  %890 = vmatpush.msra.mxu0 %v791_v0  ;;  %v851_v34 = vld [vmem:[#allocation2 + $0x20] sm:$0xff]  ;;  %v1183_v38 = vld [vmem:[%s4524_s7 + $0x28] sm:$0xff]  ;;  %v853_v39 = vld [vmem:[#allocation2 + $0x30] sm:$0xff]  ;;  %v3079_v51 = vpop.eup %3078 }
  0x52   : > { %918 = vmatpush.msra.mxu1 %v825_v1  ;;  %951 = vmatpush.msra.mxu2 %v786_v2  ;;  %v1186_v35 = vld [vmem:[%s4524_s7 + $0x40] sm:$0xff]  ;;  %v1184_v40 = vld [vmem:[%s4524_s7 + $0x30] sm:$0xff]  ;;  %v854_v41 = vld [vmem:[#allocation2 + $0x38] sm:$0xff]  ;;  %v1008_v52 = vmul.f32 256.0, %v3079_v51  ;;  %vm1012_vm0 = vweird.f32 %v3079_v51 }
  0x53   : > { %979 = vmatpush.msra.mxu3 %v820_v3  ;;  %891 = vmatpush.msra.mxu0 %v789_v7  ;;  %v857_v42 = vld [vmem:[%s4598_s27 + $0x10] sm:$0xff]  ;;  %v1181_v44 = vld [vmem:[%s4524_s7 + $0x18] sm:$0xff]  ;;  %v1178_v46 = vld [vmem:[%s4524_s7] sm:$0xff] }
  0x54   : > { %919 = vmatpush.msra.mxu1 %v823_v9  ;;  %952 = vmatpush.msra.mxu2 %v784_v10  ;;  %v1180_v43 = vld [vmem:[%s4524_s7 + $0x10] sm:$0xff]  ;;  %v858_v45 = vld [vmem:[%s4598_s27 + $0x18] sm:$0xff]  ;;  %v855_v47 = vld [vmem:[%s4598_s27] sm:$0xff]  ;;  %v1009_v53 = vsub.f32 1.0, %v1008_v52 }
  0x55   : > { %980 = vmatpush.msra.mxu3 %v818_v11  ;;  %953 = vmatmul.f32.vlgmr.msra.gmra.mxu2 %v847_v12  ;;  %v856_v48 = vld [vmem:[%s4598_s27 + $0x8] sm:$0xff]  ;;  %v1168_v52 = vld [vmem:[%s4523_s6 + $0x30] sm:$0xff] }
  0x56   : > { %1270 = vperm.xlu2 %3075, %v1188_v13   ;;  %892 = vmatpush.msra.mxu0 %v787_v14  ;;  %v1010_v55 = vmul.f32 %v3079_v51, %v1009_v53 }
  0x57   : > { %920 = vmatpush.msra.mxu1 %v821_v15  ;;  %981 = vmatpush.msra.mxu3 %v816_v16 }
  0x58   : > { %982 = vmatmul.f32.vlgmr.msra.gmra.mxu3 %v848_v17  ;;  %893 = vmatpush.msra.mxu0 %v785_v18  ;;  %v1011_v56 = vadd.f32 %v3079_v51, %v1010_v55 }
  0x59   : > { %921 = vmatpush.msra.mxu1 %v819_v19  ;;  %1285 = vperm.xlu0 %3076, %v1191_v20  }
  0x5a   : > { %894 = vmatpush.msra.mxu0 %v783_v22  ;;  %v3668_v58 = vsel %vm1012_vm0, %v3079_v51, %v1011_v56 }
  0x5b   : > { %922 = vmatpush.msra.mxu1 %v817_v26  ;;  %895 = vmatmul.f32.vlgmr.msra.gmra.mxu0 %v847_v12 }
  0x5c   : > { %1280 = vperm.xlu1 %3077, %v1190_v21  }
  0x5d   : > { %923 = vmatpush.msra.mxu1 %v815_v27  ;;  %956 = vmatmul.f32.gmra.mxu2 %v849_v29 }
  0x5e   : > { %924 = vmatmul.f32.vlgmr.msra.gmra.mxu1 %v848_v17  ;;  %1265 = vperm.xlu2 %3075, %v1187_v30   ;;  %v1165_v17 = vld [vmem:[%s4523_s6 + $0x18] sm:$0xff] }
  0x60   : > { %985 = vmatmul.f32.gmra.mxu3 %v850_v31 }
  0x61   : > { %1240 = vperm.xlu0 %3076, %v1182_v32  }
  0x63   : > { %898 = vmatmul.f32.gmra.mxu0 %v849_v29  ;;  %v1166_v29 = vld [vmem:[%s4523_s6 + $0x20] sm:$0xff] }
  0x64   : > { %1255 = vperm.xlu1 %3077, %v1185_v33  }
  0x65   : > { %959 = vmatmul.f32.gmra.mxu2 %v851_v34 }
  0x66   : > { %927 = vmatmul.f32.gmra.mxu1 %v850_v31  ;;  %1260 = vperm.xlu2 %3075, %v1186_v35  }
  0x68   : > { %988 = vmatmul.f32.gmra.mxu3 %v852_v36 }
  0x69   : > { %1225 = vperm.xlu0 %3076, %v1179_v37  }
  0x6b   : > { %901 = vmatmul.f32.gmra.mxu0 %v851_v34 }
  0x6c   : > { %1245 = vperm.xlu1 %3077, %v1183_v38  }
  0x6d   : > { %962 = vmatmul.f32.gmra.mxu2 %v853_v39 }
  0x6e   : > { %930 = vmatmul.f32.gmra.mxu1 %v852_v36  ;;  %1250 = vperm.xlu2 %3075, %v1184_v40  }
  0x70   : > { %991 = vmatmul.f32.gmra.mxu3 %v854_v41 }
  0x71   : > { %871 = vperm.xlu0 %3076, %v857_v42  }
  0x73   : > { %904 = vmatmul.f32.gmra.mxu0 %v853_v39  ;;  %v1167_v39 = vld [vmem:[%s4523_s6 + $0x28] sm:$0xff] }
  0x74   : > { %1230 = vperm.xlu1 %3077, %v1180_v43  }
  0x76   : > { %933 = vmatmul.f32.gmra.mxu1 %v854_v41  ;;  %1235 = vperm.xlu2 %3075, %v1181_v44  }
  0x7c   : > { %876 = vperm.xlu1 %3077, %v858_v45  }
  0x7e   : > { %1220 = vperm.xlu2 %3075, %v1178_v46  }
  0x84   : > { %861 = vperm.xlu1 %3077, %v855_v47  }
  0x86   : > { %866 = vperm.xlu2 %3075, %v856_v48  }
  0x8a   : > { %v3662_v50 = vpop.permute.xlu2 %1295 }
  0x92   : > { %v3664_v54 = vpop.permute.xlu2 %1290 }
  0xa7   : > { %v3666_v57 = vpop.permute.xlu2 %1275 }
  0xad   : > { %v1006_v59 = vpop.xlane.xlu0 %1005 }
  0xae   : > { %v1017_v60 = vmul.f32 %v3668_v58, %v1006_v59  ;;  %v1000_v61 = vpop.xlane.xlu1 %999 }
  0xaf   : > { %v1015_v1 = vmul.f32 %v3668_v58, %v1000_v61 }
  0xb0   : > { %v1024_v62 = vsub.f32 %v3510_v4, %v1017_v60  ;;  %v1025_v63 = vsub.f32 %v3513_v5, %v1017_v60  ;;  %v3673_v0 = vpop.permute.xlu2 %1270 }
  0xb1   : > { %v1020_v5 = vsub.f32 %v3516_v6, %v1015_v1  ;;  %v1021_v12 = vsub.f32 %v3521_v8, %v1015_v1  ;;  %v1162_v6 = vld [vmem:[%s4523_s6] sm:$0xff] }
  0xb2   : > { %1108 = vmatpush.msrb.mxu0 %v1024_v62  ;;  %1137 = vmatpush.msrb.mxu1 %v1025_v63 }
  0xb3   : > { %1358 = vmatpush.msrb.mxu2 %v1024_v62  ;;  %1423 = vmatpush.msrb.mxu3 %v1025_v63 }
  0xb5   : > { %v1003_v2 = vpop.xlane.xlu0 %1002 }
  0xb6   : > { %v1016_v3 = vmul.f32 %v3668_v58, %v1003_v2  ;;  %v997_v7 = vpop.xlane.xlu1 %996 }
  0xb7   : > { %v1014_v9 = vmul.f32 %v3668_v58, %v997_v7 }
  0xb8   : > { %v1022_v10 = vsub.f32 %v3541_v23, %v1016_v3  ;;  %v1023_v4 = vsub.f32 %v3544_v24, %v1016_v3  ;;  %v3681_v11 = vpop.permute.xlu2 %1265  ;;  %v1163_v23 = vld [vmem:[%s4523_s6 + $0x8] sm:$0xff]  ;;  %v1169_v3 = vld [vmem:[%s4523_s6 + $0x38] sm:$0xff] }
  0xb9   : > { %v1018_v13 = vsub.f32 %v3547_v25, %v1014_v9  ;;  %v1019_v14 = vsub.f32 %v3553_v28, %v1014_v9  ;;  %v1164_v25 = vld [vmem:[%s4523_s6 + $0x10] sm:$0xff] }
  0xba   : > { %1109 = vmatpush.msrb.mxu0 %v1022_v10  ;;  %1138 = vmatpush.msrb.mxu1 %v1023_v4 }
  0xbb   : > { %1359 = vmatpush.msrb.mxu2 %v1022_v10  ;;  %1424 = vmatpush.msrb.mxu3 %v1023_v4 }
  0xbc   : > { %1110 = vmatpush.msrb.mxu0 %v1020_v5  ;;  %1139 = vmatpush.msrb.mxu1 %v1021_v12 }
  0xbd   : > { %1360 = vmatpush.msrb.mxu2 %v1020_v5  ;;  %1425 = vmatpush.msrb.mxu3 %v1021_v12 }
  0xbe   : > { %1111 = vmatpush.msrb.mxu0 %v1018_v13  ;;  %1140 = vmatpush.msrb.mxu1 %v1019_v14 }
  0xbf   : > { %1361 = vmatpush.msrb.mxu2 %v1018_v13  ;;  %1426 = vmatpush.msrb.mxu3 %v1019_v14 }
  0xc0   : > { %2880 = vmatmul.msk.f32.vlgmr.msrb.gmra.mxu2 %vm1083_vm1, %v1162_v6  ;;  %2896 = vmatmul.msk.f32.vlgmr.msrb.gmra.mxu3 %vm1083_vm1, %v1162_v6  ;;  %v3691_v8 = vpop.permute.xlu2 %1260 }
  0xc8   : > { %2881 = vmatmul.msk.f32.gmra.mxu2 %vm1083_vm1, %v1163_v23  ;;  %2897 = vmatmul.msk.f32.gmra.mxu3 %vm1083_vm1, %v1163_v23  ;;  %v3698_v24 = vpop.permute.xlu2 %1250  ;;  %v1170_v23 = vld [vmem:[%s4523_s6 + $0x40] sm:$0xff] }
  0xcb   : > { %v3703_v28 = vpop.permute.xlu0 %1285 }
  0xce   : > { %v3705_v15 = vpop.permute.xlu1 %1280 }
  0xd0   : > { %2882 = vmatmul.msk.f32.gmra.mxu2 %vm1083_vm1, %v1164_v25  ;;  %2898 = vmatmul.msk.f32.gmra.mxu3 %vm1083_vm1, %v1164_v25  ;;  %v3709_v16 = vpop.permute.xlu2 %1235  ;;  %v1208_v25 = vld [vmem:[%s4526_s9 + $0x30] sm:$0xff] }
  0xd3   : > { %v3714_v18 = vpop.permute.xlu0 %1240 }
  0xd6   : > { %v3716_v19 = vpop.permute.xlu1 %1255 }
  0xd8   : > { %2883 = vmatmul.msk.f32.gmra.mxu2 %vm1083_vm1, %v1165_v17  ;;  %2899 = vmatmul.msk.f32.gmra.mxu3 %vm1083_vm1, %v1165_v17  ;;  %v3720_v20 = vpop.permute.xlu2 %1220  ;;  %v896_v21 = vpop.f32.mrf.mxu0  ;;  %v1171_v17 = vld [vmem:[%s4523_s6 + $0x48] sm:$0xff] }
  0xd9   : > { %v954_v22 = vpop.f32.mrf.mxu2 }
  0xdb   : > { %v925_v26 = vpop.f32.mrf.mxu1  ;;  %v983_v27 = vpop.f32.mrf.mxu3 }
  0xdc   : > { %v3727_v31 = vpop.permute.xlu0 %1225 }
  0xde   : > { %v3725_v30 = vpop.permute.xlu1 %1245 }
  0xe0   : > { %2884 = vmatmul.msk.f32.gmra.mxu2 %vm1083_vm1, %v1166_v29  ;;  %2900 = vmatmul.msk.f32.gmra.mxu3 %vm1083_vm1, %v1166_v29  ;;  %v867_v32 = vpop.permute.xlu2 %866  ;;  %v899_v33 = vpop.f32.mrf.mxu0  ;;  %v1207_v29 = vld [vmem:[%s4526_s9 + $0x28] sm:$0xff] }
  0xe1   : > { %v900_v34 = vadd.f32 %v899_v33, %v867_v32  ;;  %v957_v35 = vpop.f32.mrf.mxu2  ;;  %v1173_v33 = vld [vmem:[%s4523_s6 + $0x58] sm:$0xff] }
  0xe2   : > { %v958_v36 = vadd.f32 %v957_v35, %v867_v32  ;;  %v1206_v32 = vld [vmem:[%s4526_s9 + $0x20] sm:$0xff]  ;;  %v1203_v35 = vld [vmem:[%s4526_s9 + $0x8] sm:$0xff] }
  0xe3   : > { %v928_v37 = vpop.f32.mrf.mxu1  ;;  %v986_v38 = vpop.f32.mrf.mxu3 }
  0xe4   : > { %v3734_v40 = vadd.f32 %v928_v37, %v900_v34  ;;  %v3736_v41 = vadd.f32 %v986_v38, %v958_v36  ;;  %v872_v44 = vpop.permute.xlu0 %871  ;;  %v1215_v34 = vld [vmem:[%s4528_s11 + $0x8] sm:$0xff]  ;;  %v1204_v36 = vld [vmem:[%s4526_s9 + $0x10] sm:$0xff]  ;;  %v1174_v37 = vld [vmem:[%s4523_s6 + $0x60] sm:$0xff] }
  0xe5   : > { %v1929_v38 = vld [vmem:[%s4530_s13 + $0x70] sm:$0xff] }
  0xe6   : > { %4599 = vst [vmem:[#allocation17_spill] sm:$0xff] %v3734_v40  ;;  %v3738_v42 = vpop.permute.xlu1 %1230  ;;  %v1029_v43 = vadd.f32 %v3736_v41, %v3734_v40 }
  0xe7   : > { %4600 = vst [vmem:[#allocation18_spill] sm:$0xff] %v3736_v41 }
  0xe8   : > { %2885 = vmatmul.msk.f32.gmra.mxu2 %vm1083_vm1, %v1167_v39  ;;  %2901 = vmatmul.msk.f32.gmra.mxu3 %vm1083_vm1, %v1167_v39  ;;  %v902_v45 = vpop.f32.mrf.mxu0  ;;  %v1216_v39 = vld [vmem:[%s4528_s11 + $0x10] sm:$0xff] }
  0xe9   : > { %1030 = vadd.xlane.f32.xlu1 %v1029_v43  ;;  %v960_v46 = vpop.f32.mrf.mxu2  ;;  %v903_v47 = vadd.f32 %v902_v45, %v872_v44  ;;  %v1217_v43 = vld [vmem:[%s4528_s11 + $0x18] sm:$0xff] }
  0xea   : > { %v961_v48 = vadd.f32 %v960_v46, %v872_v44  ;;  %v1175_v44 = vld [vmem:[%s4523_s6 + $0x68] sm:$0xff]  ;;  %v1926_v45 = vld [vmem:[%s4530_s13 + $0x58] sm:$0xff] }
  0xeb   : > { %v931_v49 = vpop.f32.mrf.mxu1  ;;  %v989_v51 = vpop.f32.mrf.mxu3  ;;  %v1930_v46 = vld [vmem:[%s4530_s13 + $0x78] sm:$0xff] }
  0xec   : > { %v3747_v53 = vadd.f32 %v931_v49, %v903_v47  ;;  %v3749_v55 = vadd.f32 %v989_v51, %v961_v48  ;;  %v1214_v47 = vld [vmem:[%s4528_s11] sm:$0xff]  ;;  %v1176_v48 = vld [vmem:[%s4523_s6 + $0x70] sm:$0xff] }
  0xed   : > { %v1055_v49 = vld [vmem:[#allocation4] sm:$0xff] }
  0xee   : > { %4601 = vst [vmem:[#allocation19_spill] sm:$0xff] %v3749_v55  ;;  %v877_v56 = vpop.permute.xlu1 %876  ;;  %v1032_v59 = vadd.f32 %v3749_v55, %v3747_v53  ;;  %2872 = vmatmul.msk.f32.vlgmr.msrb.gmra.mxu0 %vm1083_vm1, %v1055_v49  ;;  %2876 = vmatmul.msk.f32.vlgmr.msrb.gmra.mxu1 %vm1083_vm1, %v1055_v49  ;;  %v1923_v51 = vld [vmem:[%s4530_s13 + $0x40] sm:$0xff] }
  0xf0   : > { %2886 = vmatmul.msk.f32.gmra.mxu2 %vm1083_vm1, %v1168_v52  ;;  %2902 = vmatmul.msk.f32.gmra.mxu3 %vm1083_vm1, %v1168_v52  ;;  %v905_v60 = vpop.f32.mrf.mxu0  ;;  %v1927_v52 = vld [vmem:[%s4530_s13 + $0x60] sm:$0xff] }
  0xf1   : > { %1033 = vadd.xlane.f32.xlu2 %v1032_v59  ;;  %v906_v61 = vadd.f32 %v905_v60, %v877_v56  ;;  %v963_v62 = vpop.f32.mrf.mxu2  ;;  %v1177_v59 = vld [vmem:[%s4523_s6 + $0x78] sm:$0xff]  ;;  %v1056_v60 = vld [vmem:[#allocation4 + $0x8] sm:$0xff] }
  0xf2   : > { %v964_v63 = vadd.f32 %v963_v62, %v877_v56  ;;  %v1928_v56 = vld [vmem:[%s4530_s13 + $0x68] sm:$0xff] }
  0xf3   : > { %v934_v1 = vpop.f32.mrf.mxu1  ;;  %v992_v2 = vpop.f32.mrf.mxu3  ;;  %v1924_v62 = vld [vmem:[%s4530_s13 + $0x48] sm:$0xff] }
  0xf4   : > { %v3758_v7 = vadd.f32 %v934_v1, %v906_v61  ;;  %v3760_v9 = vadd.f32 %v992_v2, %v964_v63  ;;  %v1920_v61 = vld [vmem:[%s4530_s13 + $0x28] sm:$0xff]  ;;  %v1925_v63 = vld [vmem:[%s4530_s13 + $0x50] sm:$0xff] }
  0xf5   : > { %v1057_v1 = vld [vmem:[#allocation4 + $0x10] sm:$0xff] }
  0xf6   : > { %v862_v10 = vpop.permute.xlu1 %861  ;;  %v1035_v12 = vadd.f32 %v3760_v9, %v3758_v7  ;;  %2873 = vmatmul.msk.f32.gmra.mxu0 %vm1083_vm1, %v1056_v60  ;;  %2877 = vmatmul.msk.f32.gmra.mxu1 %vm1083_vm1, %v1056_v60  ;;  %v1917_v2 = vld [vmem:[%s4530_s13 + $0x10] sm:$0xff]  ;;  %v1939_v60 = vld [vmem:[%s4532_s15] sm:$0xff] }
  0xf7   : > { %v897_v4 = vadd.f32 %v896_v21, %v862_v10  ;;  %v955_v5 = vadd.f32 %v954_v22, %v862_v10  ;;  %v1205_v21 = vld [vmem:[%s4526_s9 + $0x18] sm:$0xff] }
  0xf8   : > { %2887 = vmatmul.msk.f32.gmra.mxu2 %vm1083_vm1, %v1169_v3  ;;  %2903 = vmatmul.msk.f32.gmra.mxu3 %vm1083_vm1, %v1169_v3  ;;  %v1209_v22 = vld [vmem:[%s4526_s9 + $0x38] sm:$0xff]  ;;  %v1921_v3 = vld [vmem:[%s4530_s13 + $0x30] sm:$0xff] }
  0xf9   : > { %v3766_v13 = vadd.f32 %v925_v26, %v897_v4  ;;  %v3768_v14 = vadd.f32 %v983_v27, %v955_v5  ;;  %1036 = vadd.xlane.f32.xlu0 %v1035_v12  ;;  %v1172_v26 = vld [vmem:[%s4523_s6 + $0x50] sm:$0xff]  ;;  %v1202_v27 = vld [vmem:[%s4526_s9] sm:$0xff]  ;;  %v1922_v5 = vld [vmem:[%s4530_s13 + $0x38] sm:$0xff] }
  0xfa   : > { %v1058_v12 = vld [vmem:[#allocation4 + $0x18] sm:$0xff] }
  0xfb   : > { %4602 = vst [vmem:[#allocation20_spill] sm:$0xff] %v3766_v13  ;;  %v1026_v6 = vadd.f32 %v3768_v14, %v3766_v13 }
  0xfc   : > { %4603 = vst [vmem:[#allocation21_spill] sm:$0xff] %v3768_v14 }
  0xfd   : > { %1027 = vadd.xlane.f32.xlu2 %v1026_v6  ;;  %v1946_v6 = vld [vmem:[%s4532_s15 + $0x38] sm:$0xff] }
  0xfe   : > { %2874 = vmatmul.msk.f32.gmra.mxu0 %vm1083_vm1, %v1057_v1  ;;  %2878 = vmatmul.msk.f32.gmra.mxu1 %vm1083_vm1, %v1057_v1  ;;  %v1062_v1 = vld [vmem:[%s4522_s5 + $0x18] sm:$0xff] }
 0x100   : > { %2888 = vmatmul.msk.f32.gmra.mxu2 %vm1083_vm1, %v1170_v23  ;;  %2904 = vmatmul.msk.f32.gmra.mxu3 %vm1083_vm1, %v1170_v23  ;;  %v1918_v23 = vld [vmem:[%s4530_s13 + $0x18] sm:$0xff] }
 0x102   : > { %1604 = vperm.xlu1 %3077, %v1208_v25  }
 0x106   : > { %2875 = vmatmul.msk.f32.gmra.mxu0 %vm1083_vm1, %v1058_v12  ;;  %2879 = vmatmul.msk.f32.gmra.mxu1 %vm1083_vm1, %v1058_v12 }
 0x108   : > { %2889 = vmatmul.msk.f32.gmra.mxu2 %vm1083_vm1, %v1171_v17  ;;  %2905 = vmatmul.msk.f32.gmra.mxu3 %vm1083_vm1, %v1171_v17 }
 0x10a   : > { %1589 = vperm.xlu1 %3077, %v1205_v21   ;;  %v1919_v21 = vld [vmem:[%s4530_s13 + $0x20] sm:$0xff] }
 0x10d   : > { %1609 = vperm.xlu0 %3076, %v1209_v22   ;;  %v1943_v22 = vld [vmem:[%s4532_s15 + $0x20] sm:$0xff] }
 0x110   : > { %2890 = vmatmul.msk.f32.gmra.mxu2 %vm1083_vm1, %v1172_v26  ;;  %2906 = vmatmul.msk.f32.gmra.mxu3 %vm1083_vm1, %v1172_v26  ;;  %v1915_v26 = vld [vmem:[%s4530_s13] sm:$0xff] }
 0x112   : > { %1574 = vperm.xlu1 %3077, %v1202_v27  }
 0x115   : > { %1599 = vperm.xlu2 %3075, %v1207_v29   ;;  %1594 = vperm.xlu0 %3076, %v1206_v32   ;;  %v1916_v32 = vld [vmem:[%s4530_s13 + $0x8] sm:$0xff] }
 0x118   : > { %2891 = vmatmul.msk.f32.gmra.mxu2 %vm1083_vm1, %v1173_v33  ;;  %2907 = vmatmul.msk.f32.gmra.mxu3 %vm1083_vm1, %v1173_v33  ;;  %v1940_v33 = vld [vmem:[%s4532_s15 + $0x8] sm:$0xff] }
 0x11a   : > { %1749 = vperm.xlu1 %3077, %v1215_v34   ;;  %v1944_v34 = vld [vmem:[%s4532_s15 + $0x28] sm:$0xff] }
 0x11d   : > { %1579 = vperm.xlu2 %3075, %v1203_v35   ;;  %1584 = vperm.xlu0 %3076, %v1204_v36  }
 0x120   : > { %2892 = vmatmul.msk.f32.gmra.mxu2 %vm1083_vm1, %v1174_v37  ;;  %2908 = vmatmul.msk.f32.gmra.mxu3 %vm1083_vm1, %v1174_v37  ;;  %v1945_v37 = vld [vmem:[%s4532_s15 + $0x30] sm:$0xff] }
 0x122   : > { %2027 = vperm.xlu1 %3077, %v1929_v38  }
 0x125   : > { %1754 = vperm.xlu2 %3075, %v1216_v39   ;;  %1759 = vperm.xlu0 %3076, %v1217_v43   ;;  %v1953_v43 = vld [vmem:[%s4534_s17 + $0x10] sm:$0xff] }
 0x128   : > { %2893 = vmatmul.msk.f32.gmra.mxu2 %vm1083_vm1, %v1175_v44  ;;  %2909 = vmatmul.msk.f32.gmra.mxu3 %vm1083_vm1, %v1175_v44  ;;  %v1941_v44 = vld [vmem:[%s4532_s15 + $0x10] sm:$0xff] }
 0x12a   : > { %2012 = vperm.xlu1 %3077, %v1926_v45  }
 0x12d   : > { %2032 = vperm.xlu2 %3075, %v1930_v46   ;;  %1744 = vperm.xlu0 %3076, %v1214_v47   ;;  %v1942_v47 = vld [vmem:[%s4532_s15 + $0x18] sm:$0xff] }
 0x130   : > { %2894 = vmatmul.msk.f32.gmra.mxu2 %vm1083_vm1, %v1176_v48  ;;  %2910 = vmatmul.msk.f32.gmra.mxu3 %vm1083_vm1, %v1176_v48 }
 0x132   : > { %1997 = vperm.xlu1 %3077, %v1923_v51   ;;  %v1059_v51 = vld [vmem:[%s4522_s5] sm:$0xff] }
 0x135   : > { %2017 = vperm.xlu2 %3075, %v1927_v52   ;;  %2022 = vperm.xlu0 %3076, %v1928_v56   ;;  %v1954_v52 = vld [vmem:[%s4534_s17 + $0x18] sm:$0xff] }
 0x138   : > { %2895 = vmatmul.msk.f32.gmra.mxu2 %vm1083_vm1, %v1177_v59  ;;  %2911 = vmatmul.msk.f32.gmra.mxu3 %vm1083_vm1, %v1177_v59 }
 0x13a   : > { %1982 = vperm.xlu1 %3077, %v1920_v61  }
 0x13d   : > { %2002 = vperm.xlu2 %3075, %v1924_v62   ;;  %2007 = vperm.xlu0 %3076, %v1925_v63  }
 0x142   : > { %1967 = vperm.xlu1 %3077, %v1917_v2  }
 0x143   : > { %v3887_v10 = vpop.f32.mrf.mxu2  ;;  %v3889_v4 = vpop.f32.mrf.mxu3 }
 0x145   : > { %1987 = vperm.xlu2 %3075, %v1921_v3   ;;  %1992 = vperm.xlu0 %3076, %v1922_v5   ;;  %v1951_v3 = vld [vmem:[%s4534_s17] sm:$0xff] }
 0x14a   : > { %2346 = vperm.xlu1 %3077, %v1946_v6   ;;  %v1952_v6 = vld [vmem:[%s4534_s17 + $0x8] sm:$0xff] }
 0x14b   : > { %v3902_v25 = vpop.f32.mrf.mxu2  ;;  %v3904_v17 = vpop.f32.mrf.mxu3 }
 0x14d   : > { %1972 = vperm.xlu2 %3075, %v1918_v23   ;;  %1977 = vperm.xlu0 %3076, %v1919_v21   ;;  %v1061_v21 = vld [vmem:[%s4522_s5 + $0x10] sm:$0xff] }
 0x152   : > { %2331 = vperm.xlu1 %3077, %v1943_v22  }
 0x153   : > { %v3915_v27 = vpop.f32.mrf.mxu2  ;;  %v3917_v29 = vpop.f32.mrf.mxu3 }
 0x155   : > { %1957 = vperm.xlu2 %3075, %v1915_v26   ;;  %1962 = vperm.xlu0 %3076, %v1916_v32   ;;  %v1060_v32 = vld [vmem:[%s4522_s5 + $0x8] sm:$0xff] }
 0x15a   : > { %2316 = vperm.xlu1 %3077, %v1940_v33  }
 0x15b   : > { %v3928_v35 = vpop.f32.mrf.mxu2  ;;  %v3930_v36 = vpop.f32.mrf.mxu3 }
 0x15c   : > { %v1031_v38 = vpop.xlane.xlu1 %1030 }
 0x15d   : > { %2336 = vperm.xlu2 %3075, %v1944_v34   ;;  %v3937_v39 = vmul.f32 %v1031_v38, %v3668_v58  ;;  %2341 = vperm.xlu0 %3076, %v1945_v37  }
 0x15f   : > { %4604 = vst [vmem:[#allocation22_spill] sm:$0xff] %v3937_v39 }
 0x160   : > { %1052 = vst.msk [vmem:[%s769_s12 + $0x8] sm:$0xff] %vm1050_vm2, %v3937_v39 }
 0x162   : > { %2491 = vperm.xlu1 %3077, %v1953_v43  }
 0x163   : > { %v3952_v45 = vpop.f32.mrf.mxu2  ;;  %v3954_v46 = vpop.f32.mrf.mxu3 }
 0x164   : > { %v1034_v48 = vpop.xlane.xlu2 %1033 }
 0x165   : > { %2321 = vperm.xlu2 %3075, %v1941_v44   ;;  %v3960_v49 = vmul.f32 %v1034_v48, %v3668_v58  ;;  %2326 = vperm.xlu0 %3076, %v1942_v47  }
 0x167   : > { %1053 = vst.msk [vmem:[%s769_s12 + $0x10] sm:$0xff] %vm1050_vm2, %v3960_v49 }
 0x16a   : > { %1065 = vperm.xlu1 %3077, %v1059_v51  }
 0x16b   : > { %v3970_v56 = vpop.f32.mrf.mxu2  ;;  %v3972_v59 = vpop.f32.mrf.mxu3 }
 0x16c   : > { %v1037_v61 = vpop.xlane.xlu0 %1036 }
 0x16d   : > { %2496 = vperm.xlu2 %3075, %v1954_v52   ;;  %v3978_v62 = vmul.f32 %v1037_v61, %v3668_v58  ;;  %2311 = vperm.xlu0 %3076, %v1939_v60  }
 0x16f   : > { %1054 = vst.msk [vmem:[%s769_s12 + $0x18] sm:$0xff] %vm1050_vm2, %v3978_v62 }
 0x170   : > { %v1028_v63 = vpop.xlane.xlu2 %1027 }
 0x171   : > { %v3986_v2 = vmul.f32 %v1028_v63, %v3668_v58 }
 0x172   : > { %1080 = vperm.xlu1 %3077, %v1062_v1  }
 0x173   : > { %4605 = vst [vmem:[#allocation23_spill] sm:$0xff] %v3986_v2  ;;  %v3993_v5 = vpop.f32.mrf.mxu2  ;;  %v3995_v12 = vpop.f32.mrf.mxu3 }
 0x174   : > { %1051 = vst.msk [vmem:[%s769_s12] sm:$0xff] %vm1050_vm2, %v3986_v2  ;;  %v4000_v23 = vpop.permute.xlu1 %1604 }
 0x175   : > { %2481 = vperm.xlu2 %3075, %v1951_v3   ;;  %4606 = vst [vmem:[#allocation24_spill] sm:$0xff] %v4000_v23  ;;  %2486 = vperm.xlu0 %3076, %v1952_v6  }
 0x178   : > { %v4002_v58 = vpop.permute.xlu2 %1599 }
 0x179   : > { %4607 = vst [vmem:[#allocation25_spill] sm:$0xff] %v4002_v58 }
 0x17b   : > { %v4007_v22 = vpop.f32.mrf.mxu2  ;;  %v4009_v26 = vpop.f32.mrf.mxu3 }
 0x17c   : > { %v4014_v33 = vpop.permute.xlu1 %1589 }
 0x17d   : > { %1075 = vperm.xlu2 %3075, %v1061_v21   ;;  %4608 = vst [vmem:[#allocation26_spill] sm:$0xff] %v4014_v33  ;;  %1070 = vperm.xlu0 %3076, %v1060_v32  }
 0x17f   : > { %v4016_v34 = vpop.permute.xlu0 %1609 }
 0x180   : > { %4609 = vst [vmem:[#allocation27_spill] sm:$0xff] %v4016_v34  ;;  %v4018_v37 = vpop.permute.xlu2 %1579 }
 0x181   : > { %4610 = vst [vmem:[#allocation28_spill] sm:$0xff] %v4018_v37 }
 0x183   : > { %v4020_v38 = vpop.f32.mrf.mxu2  ;;  %v4022_v43 = vpop.f32.mrf.mxu3 }
 0x184   : > { %v4024_v44 = vpop.permute.xlu1 %1574 }
 0x185   : > { %4611 = vst [vmem:[#allocation29_spill] sm:$0xff] %v4024_v44 }
 0x187   : > { %v4026_v47 = vpop.permute.xlu0 %1594 }
 0x188   : > { %4612 = vst [vmem:[#allocation30_spill] sm:$0xff] %v4026_v47  ;;  %v4028_v48 = vpop.permute.xlu2 %1754 }
 0x189   : > { %4613 = vst [vmem:[#allocation31_spill] sm:$0xff] %v4028_v48 }
 0x18b   : > { %v4030_v51 = vpop.f32.mrf.mxu2  ;;  %v4032_v52 = vpop.f32.mrf.mxu3 }
 0x18c   : > { %v4034_v60 = vpop.permute.xlu1 %1749 }
 0x18d   : > { %4614 = vst [vmem:[#allocation32_spill] sm:$0xff] %v4034_v60 }
 0x18f   : > { %v4036_v61 = vpop.permute.xlu0 %1584 }
 0x190   : > { %4615 = vst [vmem:[#allocation33_spill] sm:$0xff] %v4036_v61  ;;  %v4038_v63 = vpop.permute.xlu2 %2032 }
 0x191   : > { %4616 = vst [vmem:[#allocation34_spill] sm:$0xff] %v4038_v63 }
 0x193   : > { %v1393_v1 = vpop.f32.mrf.mxu2  ;;  %v1458_v3 = vpop.f32.mrf.mxu3 }
 0x194   : > { %v4040_v6 = vpop.permute.xlu1 %2027 }
 0x195   : > { %4617 = vst [vmem:[#allocation35_spill] sm:$0xff] %v4040_v6 }
 0x197   : > { %v4042_v21 = vpop.permute.xlu0 %1759 }
 0x198   : > { %4618 = vst [vmem:[#allocation36_spill] sm:$0xff] %v4042_v21  ;;  %v4044_v32 = vpop.permute.xlu2 %2017 }
 0x199   : > { %4619 = vst [vmem:[#allocation37_spill] sm:$0xff] %v4044_v32 }
 0x19b   : > { %v1396_v44 = vpop.f32.mrf.mxu2  ;;  %v1461_v48 = vpop.f32.mrf.mxu3 }
 0x19c   : > { %v4046_v37 = vpop.permute.xlu1 %2012 }
 0x19d   : > { %4620 = vst [vmem:[#allocation38_spill] sm:$0xff] %v4046_v37 }
 0x19f   : > { %v4048_v58 = vpop.permute.xlu0 %1744 }
 0x1a0   : > { %4621 = vst [vmem:[#allocation39_spill] sm:$0xff] %v4048_v58  ;;  %v4050_v33 = vpop.permute.xlu2 %2002 }
 0x1a1   : > { %4622 = vst [vmem:[#allocation40_spill] sm:$0xff] %v4050_v33 }
 0x1a3   : > { %v1399_v60 = vpop.f32.mrf.mxu2  ;;  %v1464_v61 = vpop.f32.mrf.mxu3 }
 0x1a4   : > { %v4052_v47 = vpop.permute.xlu1 %1997  ;;  %v1400_v40 = vadd.f32 %v1399_v60, %v3705_v15  ;;  %v1462_v60 = vadd.f32 %v1461_v48, %v3666_v57 }
 0x1a5   : > { %4623 = vst [vmem:[#allocation41_spill] sm:$0xff] %v4052_v47 }
 0x1a6   : > { %vm1500_vm9 = vcmp.gt.f32.partialorder %v1400_v40, 0.0  ;;  %vm1499_vm12 = vcmp.gt.f32.partialorder %v1462_v60, 0.0 }
 0x1a7   : > { %v4054_v63 = vpop.permute.xlu0 %2022 }
 0x1a8   : > { %4624 = vst [vmem:[#allocation42_spill] sm:$0xff] %v4054_v63  ;;  %v4056_v34 = vpop.permute.xlu2 %1987 }
 0x1a9   : > { %4625 = vst [vmem:[#allocation43_spill] sm:$0xff] %v4056_v34 }
 0x1ab   : > { %v1402_v6 = vpop.f32.mrf.mxu2  ;;  %v1467_v21 = vpop.f32.mrf.mxu3 }
 0x1ac   : > { %v4058_v23 = vpop.permute.xlu1 %1982 }
 0x1ad   : > { %4626 = vst [vmem:[#allocation44_spill] sm:$0xff] %v4058_v23  ;;  %v1403_v23 = vadd.f32 %v1402_v6, %v3703_v28 }
 0x1af   : > { %v4060_v32 = vpop.permute.xlu0 %2007  ;;  %vm1502_vm7 = vcmp.gt.f32.partialorder %v1403_v23, 0.0 }
 0x1b0   : > { %4627 = vst [vmem:[#allocation45_spill] sm:$0xff] %v4060_v32  ;;  %v4062_v14 = vpop.permute.xlu2 %1972 }
 0x1b1   : > { %4628 = vst [vmem:[#allocation46_spill] sm:$0xff] %v4062_v14 }
 0x1b3   : > { %v1405_v37 = vpop.f32.mrf.mxu2  ;;  %v1470_v58 = vpop.f32.mrf.mxu3 }
 0x1b4   : > { %v4064_v13 = vpop.permute.xlu1 %1967  ;;  %v1406_v47 = vadd.f32 %v1405_v37, %v3664_v54  ;;  %v1471_v34 = vadd.f32 %v1470_v58, %v3664_v54  ;;  %v1397_v54 = vadd.f32 %v1396_v44, %v3666_v57  ;;  %v1465_v58 = vadd.f32 %v1464_v61, %v3705_v15 }
 0x1b5   : > { %4629 = vst [vmem:[#allocation47_spill] sm:$0xff] %v4064_v13  ;;  %v1468_v13 = vadd.f32 %v1467_v21, %v3703_v28  ;;  %v1394_v44 = vadd.f32 %v1393_v1, %v3673_v0  ;;  %v1459_v61 = vadd.f32 %v1458_v3, %v3673_v0  ;;  %v1391_v57 = vadd.f32 %v4030_v51, %v3681_v11  ;;  %v4093_v1 = vpop.f32.mrf.mxu0  ;;  %v4100_v51 = vpop.f32.mrf.mxu1 }
 0x1b6   : > { %v1536_v39 = vmul.f32 0.2, %v1406_v47  ;;  %v1537_v6 = vmul.f32 0.2, %v1471_v34  ;;  %vm1504_vm5 = vcmp.gt.f32.partialorder %v1406_v47, 0.0  ;;  %vm1505_vm6 = vcmp.gt.f32.partialorder %v1471_v34, 0.0 }
 0x1b7   : > { %v4066_v33 = vpop.permute.xlu0 %1992  ;;  %v1535_v21 = vmul.f32 0.2, %v1468_v13  ;;  %vm1503_vm8 = vcmp.gt.f32.partialorder %v1468_v13, 0.0  ;;  %vm1501_vm10 = vcmp.gt.f32.partialorder %v1465_v58, 0.0  ;;  %v1456_v0 = vadd.f32 %v4032_v52, %v3681_v11 }
 0x1b8   : > { %4630 = vst [vmem:[#allocation48_spill] sm:$0xff] %v4066_v33  ;;  %v4068_v2 = vpop.permute.xlu2 %1957  ;;  %v1568_v15 = vsel %vm1504_vm5, %v1406_v47, %v1536_v39  ;;  %v1531_v39 = vmul.f32 0.2, %v1462_v60  ;;  %vm1498_vm11 = vcmp.gt.f32.partialorder %v1397_v54, 0.0  ;;  %v1388_v3 = vadd.f32 %v4020_v38, %v3691_v8 }
 0x1b9   : > { %4631 = vst [vmem:[#allocation49_spill] sm:$0xff] %v4068_v2  ;;  %v1453_v11 = vadd.f32 %v4022_v43, %v3691_v8  ;;  %v1529_v52 = vmul.f32 0.2, %v1459_v61  ;;  %vm1496_vm13 = vcmp.gt.f32.partialorder %v1394_v44, 0.0  ;;  %vm1497_vm14 = vcmp.gt.f32.partialorder %v1459_v61, 0.0 }
 0x1ba   : > { %v1450_v8 = vadd.f32 %v4009_v26, %v3716_v19  ;;  %v1563_v43 = vsel %vm1499_vm12, %v1462_v60, %v1531_v39  ;;  %vm1494_vm15 = vcmp.gt.f32.partialorder %v1391_v57, 0.0  ;;  %vm1495_vm0 = vcmp.gt.f32.partialorder %v1456_v0, 0.0 }
 0x1bb   : > { %v1408_v63 = vpop.f32.mrf.mxu2  ;;  %v1473_v41 = vpop.f32.mrf.mxu3  ;;  %vm1492_vm2 = vcmp.gt.f32.partialorder %v1388_v3, 0.0  ;;  %v1525_v26 = vmul.f32 0.2, %v1453_v11  ;;  %v1444_v60 = vadd.f32 %v3972_v59, %v3725_v30 }
 0x1bc   : > { %v1409_v32 = vadd.f32 %v1408_v63, %v3662_v50  ;;  %v1474_v14 = vadd.f32 %v1473_v41, %v3662_v50  ;;  %v4077_v33 = vpop.permute.xlu1 %2346  ;;  %v1534_v63 = vmul.f32 0.2, %v1403_v23  ;;  %vm1491_vm5 = vcmp.gt.f32.partialorder %v1450_v8, 0.0 }
 0x1bd   : > { %4632 = vst [vmem:[#allocation50_spill] sm:$0xff] %v4077_v33  ;;  %v1532_v33 = vmul.f32 0.2, %v1400_v40 }
 0x1be   : > { %vm1506_vm3 = vcmp.gt.f32.partialorder %v1409_v32, 0.0  ;;  %v1538_v2 = vmul.f32 0.2, %v1409_v32  ;;  %vm1507_vm4 = vcmp.gt.f32.partialorder %v1474_v14, 0.0  ;;  %v1539_v37 = vmul.f32 0.2, %v1474_v14 }
 0x1bf   : > { %v4081_v55 = vpop.permute.xlu0 %1977  ;;  %v1566_v48 = vsel %vm1502_vm7, %v1403_v23, %v1534_v63  ;;  %v1528_v23 = vmul.f32 0.2, %v1394_v44 }
 0x1c0   : > { %v4083_v50 = vpop.permute.xlu2 %2336  ;;  %v1570_v41 = vsel %vm1506_vm3, %v1409_v32, %v1538_v2  ;;  %v1571_v28 = vsel %vm1507_vm4, %v1474_v14, %v1539_v37  ;;  %v1569_v14 = vsel %vm1505_vm6, %v1471_v34, %v1537_v6  ;;  %v1530_v2 = vmul.f32 0.2, %v1397_v54 }
 0x1c1   : > { %4633 = vst [vmem:[#allocation51_spill] sm:$0xff] %v4083_v50  ;;  %1612 = vmatpush.msra.mxu0 %v1570_v41  ;;  %2967 = vmatpush.msra.mxu2 %v1570_v41  ;;  %v1533_v50 = vmul.f32 0.2, %v1465_v58  ;;  %v1567_v34 = vsel %vm1503_vm8, %v1468_v13, %v1535_v21  ;;  %v1564_v32 = vsel %vm1500_vm9, %v1400_v40, %v1532_v33  ;;  %v1526_v33 = vmul.f32 0.2, %v1391_v57 }
 0x1c2   : > { %1653 = vmatpush.msra.mxu1 %v1571_v28  ;;  %2983 = vmatpush.msra.mxu3 %v1571_v28  ;;  %v1385_v37 = vadd.f32 %v4007_v22, %v3716_v19  ;;  %v1562_v40 = vsel %vm1498_vm11, %v1397_v54, %v1530_v2  ;;  %v1382_v22 = vadd.f32 %v3993_v5, %v3698_v24  ;;  %v1524_v54 = vmul.f32 0.2, %v1388_v3 }
 0x1c3   : > { %1613 = vmatpush.msra.mxu0 %v1568_v15  ;;  %2968 = vmatpush.msra.mxu2 %v1568_v15  ;;  %v1565_v13 = vsel %vm1501_vm10, %v1465_v58, %v1533_v50  ;;  %v1527_v58 = vmul.f32 0.2, %v1456_v0  ;;  %v1560_v63 = vsel %vm1496_vm13, %v1394_v44, %v1528_v23  ;;  %v1447_v50 = vadd.f32 %v3995_v12, %v3698_v24 }
 0x1c4   : > { %1654 = vmatpush.msra.mxu1 %v1569_v14  ;;  %2984 = vmatpush.msra.mxu3 %v1569_v14  ;;  %v4098_v47 = vpop.permute.xlu1 %2331  ;;  %v1561_v19 = vsel %vm1497_vm14, %v1459_v61, %v1529_v52  ;;  %v1379_v41 = vadd.f32 %v3970_v56, %v3725_v30  ;;  %v1558_v5 = vsel %vm1494_vm15, %v1391_v57, %v1526_v33  ;;  %vm1493_vm3 = vcmp.gt.f32.partialorder %v1453_v11, 0.0  ;;  %v4138_v14 = vpop.f32.mrf.mxu0 }
 0x1c5   : > { %1614 = vmatpush.msra.mxu0 %v1566_v48  ;;  %2969 = vmatpush.msra.mxu2 %v1566_v48  ;;  %v1522_v28 = vmul.f32 0.2, %v1385_v37  ;;  %v1559_v24 = vsel %vm1495_vm0, %v1456_v0, %v1527_v58  ;;  %vm1490_vm4 = vcmp.gt.f32.partialorder %v1385_v37, 0.0  ;;  %v1523_v21 = vmul.f32 0.2, %v1450_v8  ;;  %v4140_v57 = vpop.f32.mrf.mxu1 }
 0x1c6   : > { %1655 = vmatpush.msra.mxu1 %v1567_v34  ;;  %2985 = vmatpush.msra.mxu3 %v1567_v34  ;;  %v1376_v56 = vadd.f32 %v3952_v45, %v3714_v18  ;;  %v1556_v44 = vsel %vm1492_vm2, %v1388_v3, %v1524_v54  ;;  %v1520_v15 = vmul.f32 0.2, %v1382_v22  ;;  %v1441_v30 = vadd.f32 %v3954_v46, %v3714_v18 }
 0x1c7   : > { %1615 = vmatpush.msra.mxu0 %v1564_v32  ;;  %2970 = vmatpush.msra.mxu2 %v1564_v32  ;;  %v4110_v38 = vpop.permute.xlu0 %1962  ;;  %v1557_v59 = vsel %vm1493_vm3, %v1453_v11, %v1525_v26  ;;  %vm1488_vm6 = vcmp.gt.f32.partialorder %v1382_v22, 0.0  ;;  %v1521_v61 = vmul.f32 0.2, %v1447_v50  ;;  %v1373_v45 = vadd.f32 %v3928_v35, %v3709_v16 }
 0x1c8   : > { %1656 = vmatpush.msra.mxu1 %v1565_v13  ;;  %2986 = vmatpush.msra.mxu3 %v1565_v13  ;;  %v4112_v6 = vpop.permute.xlu2 %2321  ;;  %v1554_v18 = vsel %vm1490_vm4, %v1385_v37, %v1522_v28  ;;  %vm1489_vm7 = vcmp.gt.f32.partialorder %v1447_v50, 0.0  ;;  %v1518_v46 = vmul.f32 0.2, %v1379_v41  ;;  %v1438_v0 = vadd.f32 %v3930_v36, %v3709_v16 }
 0x1c9   : > { %1616 = vmatpush.msra.mxu0 %v1562_v40  ;;  %2971 = vmatpush.msra.mxu2 %v1562_v40  ;;  %v1555_v39 = vsel %vm1491_vm5, %v1450_v8, %v1523_v21  ;;  %vm1486_vm8 = vcmp.gt.f32.partialorder %v1379_v41, 0.0  ;;  %v1519_v34 = vmul.f32 0.2, %v1444_v60  ;;  %v1370_v35 = vadd.f32 %v3915_v27, %v3738_v42 }
 0x1ca   : > { %1657 = vmatpush.msra.mxu1 %v1563_v43  ;;  %2987 = vmatpush.msra.mxu3 %v1563_v43  ;;  %v1552_v3 = vsel %vm1488_vm6, %v1382_v22, %v1520_v15  ;;  %vm1487_vm9 = vcmp.gt.f32.partialorder %v1444_v60, 0.0  ;;  %v1516_v23 = vmul.f32 0.2, %v1376_v56  ;;  %v1435_v32 = vadd.f32 %v3917_v29, %v3738_v42  ;;  %v1200_v15 = vld [vmem:[#allocation6 + $0x30] sm:$0xff] }
 0x1cb   : > { %1617 = vmatpush.msra.mxu0 %v1560_v63  ;;  %2972 = vmatpush.msra.mxu2 %v1560_v63  ;;  %v1553_v16 = vsel %vm1489_vm7, %v1447_v50, %v1521_v61  ;;  %vm1484_vm10 = vcmp.gt.f32.partialorder %v1376_v56, 0.0  ;;  %v1517_v36 = vmul.f32 0.2, %v1441_v30  ;;  %v1367_v11 = vadd.f32 %v3902_v25, %v3727_v31 }
 0x1cc   : > { %1658 = vmatpush.msra.mxu1 %v1561_v19  ;;  %2988 = vmatpush.msra.mxu3 %v1561_v19  ;;  %v4130_v12 = vpop.permute.xlu1 %2316  ;;  %v1550_v27 = vsel %vm1486_vm8, %v1379_v41, %v1518_v46  ;;  %vm1485_vm11 = vcmp.gt.f32.partialorder %v1441_v30, 0.0  ;;  %v1514_v52 = vmul.f32 0.2, %v1373_v45  ;;  %v1432_v13 = vadd.f32 %v3904_v17, %v3727_v31  ;;  %v4637_v46 = vld [vmem:[#allocation19_spill] sm:$0xff] }
 0x1cd   : > { %1618 = vmatpush.msra.mxu0 %v1558_v5  ;;  %2973 = vmatpush.msra.mxu2 %v1558_v5  ;;  %v1551_v42 = vsel %vm1487_vm9, %v1444_v60, %v1519_v34  ;;  %vm1482_vm12 = vcmp.gt.f32.partialorder %v1373_v45, 0.0  ;;  %v1515_v37 = vmul.f32 0.2, %v1438_v0  ;;  %v1364_v25 = vadd.f32 %v3887_v10, %v3720_v20  ;;  %v1148_v63 = vpop.f32.mrf.mxu1 }
 0x1ce   : > { %1659 = vmatpush.msra.mxu1 %v1559_v24  ;;  %2989 = vmatpush.msra.mxu3 %v1559_v24  ;;  %v1548_v40 = vsel %vm1484_vm10, %v1376_v56, %v1516_v23  ;;  %vm1483_vm13 = vcmp.gt.f32.partialorder %v1438_v0, 0.0  ;;  %v1512_v33 = vmul.f32 0.2, %v1370_v35  ;;  %v1429_v31 = vadd.f32 %v3889_v4, %v3720_v20  ;;  %v1119_v4 = vpop.f32.mrf.mxu0 }
 0x1cf   : > { %1619 = vmatpush.msra.mxu0 %v1556_v44  ;;  %2974 = vmatpush.msra.mxu2 %v1556_v44  ;;  %v4144_v2 = vpop.permute.xlu0 %2341  ;;  %v1549_v17 = vsel %vm1485_vm11, %v1441_v30, %v1517_v36  ;;  %vm1480_vm14 = vcmp.gt.f32.partialorder %v1370_v35, 0.0  ;;  %v1513_v8 = vmul.f32 0.2, %v1435_v32  ;;  %v1546_v58 = vsel %vm1482_vm12, %v1373_v45, %v1514_v52  ;;  %v1194_v44 = vld [vmem:[#allocation6] sm:$0xff] }
 0x1d0   : > { %1660 = vmatpush.msra.mxu1 %v1557_v59  ;;  %2990 = vmatpush.msra.mxu3 %v1557_v59  ;;  %v4146_v48 = vpop.permute.xlu2 %2496  ;;  %vm1481_vm15 = vcmp.gt.f32.partialorder %v1435_v32, 0.0  ;;  %v1510_v22 = vmul.f32 0.2, %v1367_v11  ;;  %v1547_v20 = vsel %vm1483_vm13, %v1438_v0, %v1515_v37  ;;  %vm1478_vm0 = vcmp.gt.f32.partialorder %v1367_v11, 0.0 }
 0x1d1   : > { %4634 = vst [vmem:[#allocation52_spill] sm:$0xff] %v4146_v48  ;;  %1620 = vmatpush.msra.mxu0 %v1554_v18  ;;  %2975 = vmatpush.msra.mxu2 %v1554_v18  ;;  %v1511_v54 = vmul.f32 0.2, %v1432_v13  ;;  %v1544_v50 = vsel %vm1480_vm14, %v1370_v35, %v1512_v33  ;;  %vm1479_vm2 = vcmp.gt.f32.partialorder %v1432_v13, 0.0  ;;  %v1508_v19 = vmul.f32 0.2, %v1364_v25 }
 0x1d2   : > { %1661 = vmatpush.msra.mxu1 %v1555_v39  ;;  %2991 = vmatpush.msra.mxu3 %v1555_v39  ;;  %v1545_v26 = vsel %vm1481_vm15, %v1435_v32, %v1513_v8  ;;  %vm1476_vm3 = vcmp.gt.f32.partialorder %v1364_v25, 0.0  ;;  %v1509_v41 = vmul.f32 0.2, %v1429_v31  ;;  %v1542_v5 = vsel %vm1478_vm0, %v1367_v11, %v1510_v22  ;;  %v1197_v8 = vld [vmem:[#allocation6 + $0x18] sm:$0xff]  ;;  %v1199_v22 = vld [vmem:[#allocation6 + $0x28] sm:$0xff] }
 0x1d3   : > { %1621 = vmatpush.msra.mxu0 %v1552_v3  ;;  %2976 = vmatpush.msra.mxu2 %v1552_v3  ;;  %vm1477_vm4 = vcmp.gt.f32.partialorder %v1429_v31, 0.0  ;;  %v1543_v28 = vsel %vm1479_vm2, %v1432_v13, %v1511_v54  ;;  %v1540_v56 = vsel %vm1476_vm3, %v1364_v25, %v1508_v19  ;;  %v1048_v59 = vsub.f32 %v3758_v7, %v3978_v62  ;;  %v4640_v3 = vld [vmem:[#allocation18_spill] sm:$0xff]  ;;  %v1196_v25 = vld [vmem:[#allocation6 + $0x10] sm:$0xff]  ;;  %v1907_v19 = vld [vmem:[%s4645_s22 + $0x40] sm:$0xff] }
 0x1d4   : > { %1662 = vmatpush.msra.mxu1 %v1553_v16  ;;  %2992 = vmatpush.msra.mxu3 %v1553_v16  ;;  %v4164_v29 = vpop.permute.xlu1 %2491  ;;  %v1541_v30 = vsel %vm1477_vm4, %v1429_v31, %v1509_v41  ;;  %v1046_v7 = vsub.f32 %v3747_v53, %v3960_v49  ;;  %v1047_v0 = vsub.f32 %v4637_v46, %v3960_v49  ;;  %v4641_v53 = vld [vmem:[#allocation23_spill] sm:$0xff]  ;;  %v4642_v49 = vld [vmem:[#allocation20_spill] sm:$0xff]  ;;  %v1195_v13 = vld [vmem:[#allocation6 + $0x8] sm:$0xff] }
 0x1d5   : > { %1622 = vmatpush.msra.mxu0 %v1550_v27  ;;  %2977 = vmatpush.msra.mxu2 %v1550_v27  ;;  %4635 = vst [vmem:[#allocation53_spill] sm:$0xff] %v4164_v29  ;;  %v1151_v34 = vpop.f32.mrf.mxu1  ;;  %v1042_v11 = vsub.f32 %v4642_v49, %v4641_v53  ;;  %v4643_v27 = vld [vmem:[#allocation21_spill] sm:$0xff]  ;;  %v1905_v54 = vld [vmem:[%s4645_s22 + $0x30] sm:$0xff] }
 0x1d6   : > { %1663 = vmatpush.msra.mxu1 %v1551_v42  ;;  %2993 = vmatpush.msra.mxu3 %v1551_v42  ;;  %v1122_v39 = vpop.f32.mrf.mxu0  ;;  %v1043_v52 = vsub.f32 %v4643_v27, %v4641_v53  ;;  %v1201_v42 = vld [vmem:[#allocation6 + $0x38] sm:$0xff]  ;;  %v1909_v41 = vld [vmem:[%s4645_s22 + $0x50] sm:$0xff] }
 0x1d7   : > { %1623 = vmatpush.msra.mxu0 %v1548_v40  ;;  %2978 = vmatpush.msra.mxu2 %v1548_v40  ;;  %v4172_v43 = vpop.permute.xlu0 %2326  ;;  %v1899_v40 = vld [vmem:[%s4645_s22] sm:$0xff]  ;;  %v4647_v46 = vld [vmem:[#allocation27_spill] sm:$0xff] }
 0x1d8   : > { %1664 = vmatpush.msra.mxu1 %v1549_v17  ;;  %2994 = vmatpush.msra.mxu3 %v1549_v17  ;;  %v4174_v10 = vpop.permute.xlu2 %2481 }
 0x1d9   : > { %4636 = vst [vmem:[#allocation54_spill] sm:$0xff] %v4174_v10  ;;  %1624 = vmatpush.msra.mxu0 %v1546_v58  ;;  %2979 = vmatpush.msra.mxu2 %v1546_v58  ;;  %v1900_v58 = vld [vmem:[%s4645_s22 + $0x8] sm:$0xff] }
 0x1da   : > { %1665 = vmatpush.msra.mxu1 %v1547_v20  ;;  %2995 = vmatpush.msra.mxu3 %v1547_v20  ;;  %v1902_v20 = vld [vmem:[%s4645_s22 + $0x18] sm:$0xff] }
 0x1db   : > { %1625 = vmatpush.msra.mxu0 %v1544_v50  ;;  %2980 = vmatpush.msra.mxu2 %v1544_v50  ;;  %v1906_v50 = vld [vmem:[%s4645_s22 + $0x38] sm:$0xff] }
 0x1dc   : > { %1666 = vmatpush.msra.mxu1 %v1545_v26  ;;  %2996 = vmatpush.msra.mxu3 %v1545_v26  ;;  %v1066_v60 = vpop.permute.xlu1 %1065  ;;  %v1908_v26 = vld [vmem:[%s4645_s22 + $0x48] sm:$0xff] }
 0x1dd   : > { %1626 = vmatpush.msra.mxu0 %v1542_v5  ;;  %2981 = vmatpush.msra.mxu2 %v1542_v5  ;;  %v1114_v24 = vadd.f32 %v4093_v1, %v1066_v60  ;;  %v1143_v21 = vadd.f32 %v4100_v51, %v1066_v60  ;;  %v1049_v1 = vsub.f32 %v3760_v9, %v3978_v62  ;;  %v4638_v9 = vld [vmem:[#allocation22_spill] sm:$0xff]  ;;  %v4639_v62 = vld [vmem:[#allocation17_spill] sm:$0xff]  ;;  %v1910_v5 = vld [vmem:[%s4645_s22 + $0x58] sm:$0xff] }
 0x1de   : > { %1667 = vmatpush.msra.mxu1 %v1543_v28  ;;  %2997 = vmatpush.msra.mxu3 %v1543_v28  ;;  %v1044_v35 = vsub.f32 %v4639_v62, %v4638_v9  ;;  %v1045_v23 = vsub.f32 %v4640_v3, %v4638_v9  ;;  %v1911_v28 = vld [vmem:[%s4645_s22 + $0x60] sm:$0xff]  ;;  %v1912_v60 = vld [vmem:[%s4645_s22 + $0x68] sm:$0xff] }
 0x1df   : > { %1627 = vmatpush.msra.mxu0 %v1540_v56  ;;  %2982 = vmatpush.msra.mxu2 %v1540_v56  ;;  %1154 = vst [vmem:[%s4185_s4] sm:$0xff] %v1114_v24  ;;  %v4192_v61 = vpop.permute.xlu0 %2311  ;;  %v1913_v56 = vld [vmem:[%s4645_s22 + $0x70] sm:$0xff] }
 0x1e0   : > { %1668 = vmatpush.msra.mxu1 %v1541_v30  ;;  %2998 = vmatpush.msra.mxu3 %v1541_v30  ;;  %v1076_v45 = vpop.permute.xlu2 %1075  ;;  %1155 = vst [vmem:[%s4185_s4 + $0x8] sm:$0xff] %v1143_v21 }
 0x1e1   : > { %1628 = vmatmul.f32.vlgmr.msra.gmra.mxu0 %v1194_v44  ;;  %1646 = vmatmul.f32.vlgmr.msra.gmra.mxu2 %v1200_v15  ;;  %v1120_v51 = vadd.f32 %v1119_v4, %v1076_v45  ;;  %v1149_v18 = vadd.f32 %v1148_v63, %v1076_v45  ;;  %v1903_v4 = vld [vmem:[%s4645_s22 + $0x20] sm:$0xff]  ;;  %v1904_v63 = vld [vmem:[%s4645_s22 + $0x28] sm:$0xff] }
 0x1e2   : > { %1669 = vmatmul.f32.vlgmr.msra.gmra.mxu1 %v1194_v44  ;;  %1687 = vmatmul.f32.vlgmr.msra.gmra.mxu3 %v1200_v15 }
 0x1e3   : > { %2095 = vmatpush.msrb.mxu2 %v1048_v59  ;;  %2160 = vmatpush.msrb.mxu3 %v1049_v1  ;;  %1158 = vst [vmem:[%s4185_s4 + $0x20] sm:$0xff] %v1120_v51  ;;  %v1914_v59 = vld [vmem:[%s4645_s22 + $0x78] sm:$0xff] }
 0x1e4   : > { %1159 = vst [vmem:[%s4185_s4 + $0x28] sm:$0xff] %v1149_v18  ;;  %v1081_v32 = vpop.permute.xlu1 %1080  ;;  %v4646_v1 = vld [vmem:[#allocation24_spill] sm:$0xff] }
 0x1e5   : > { %2096 = vmatpush.msrb.mxu2 %v1046_v7  ;;  %2161 = vmatpush.msrb.mxu3 %v1047_v0  ;;  %v1123_v16 = vadd.f32 %v1122_v39, %v1081_v32  ;;  %v1152_v36 = vadd.f32 %v1151_v34, %v1081_v32 }
 0x1e7   : > { %2097 = vmatpush.msrb.mxu2 %v1044_v35  ;;  %2162 = vmatpush.msrb.mxu3 %v1045_v23  ;;  %1160 = vst [vmem:[%s4185_s4 + $0x30] sm:$0xff] %v1123_v16  ;;  %v4212_v37 = vpop.permute.xlu0 %2486 }
 0x1e8   : > { %4644 = vst [vmem:[#allocation19_spill] sm:$0xff] %v4212_v37 }
 0x1e9   : > { %1161 = vst [vmem:[%s4185_s4 + $0x38] sm:$0xff] %v1152_v36  ;;  %2098 = vmatpush.msrb.mxu2 %v1042_v11  ;;  %2163 = vmatpush.msrb.mxu3 %v1043_v52 }
 0x1ea   : > { %1631 = vmatmul.f32.gmra.mxu0 %v1195_v13  ;;  %1649 = vmatmul.f32.gmra.mxu2 %v1201_v42 }
 0x1eb   : > { %1672 = vmatmul.f32.gmra.mxu1 %v1195_v13  ;;  %1690 = vmatmul.f32.gmra.mxu3 %v1201_v42  ;;  %v4648_v42 = vld [vmem:[#allocation30_spill] sm:$0xff] }
 0x1ef   : > { %v1071_v33 = vpop.permute.xlu0 %1070 }
 0x1f0   : > { %v1117_v31 = vadd.f32 %v4138_v14, %v1071_v33  ;;  %v1146_v17 = vadd.f32 %v4140_v57, %v1071_v33  ;;  %v1198_v14 = vld [vmem:[#allocation6 + $0x20] sm:$0xff]  ;;  %v1901_v57 = vld [vmem:[%s4645_s22 + $0x10] sm:$0xff] }
 0x1f2   : > { %1634 = vmatmul.f32.gmra.mxu0 %v1196_v25  ;;  %2920 = vmatmul.msk.f32.vlgmr.msrb.gmra.mxu2 %vm1083_vm1, %v1899_v40  ;;  %1156 = vst [vmem:[%s4185_s4 + $0x10] sm:$0xff] %v1117_v31  ;;  %v4649_v31 = vld [vmem:[#allocation26_spill] sm:$0xff] }
 0x1f3   : > { %1675 = vmatmul.f32.gmra.mxu1 %v1196_v25  ;;  %2936 = vmatmul.msk.f32.vlgmr.msrb.gmra.mxu3 %vm1083_vm1, %v1899_v40  ;;  %1157 = vst [vmem:[%s4185_s4 + $0x18] sm:$0xff] %v1146_v17 }
 0x1fa   : > { %1637 = vmatmul.f32.gmra.mxu0 %v1197_v8  ;;  %2921 = vmatmul.msk.f32.gmra.mxu2 %vm1083_vm1, %v1900_v58 }
 0x1fb   : > { %1678 = vmatmul.f32.gmra.mxu1 %v1197_v8  ;;  %2937 = vmatmul.msk.f32.gmra.mxu3 %vm1083_vm1, %v1900_v58  ;;  %v4650_v8 = vld [vmem:[#allocation25_spill] sm:$0xff] }
 0x202   : > { %1640 = vmatmul.f32.gmra.mxu0 %v1198_v14  ;;  %2922 = vmatmul.msk.f32.gmra.mxu2 %vm1083_vm1, %v1901_v57 }
 0x203   : > { %1681 = vmatmul.f32.gmra.mxu1 %v1198_v14  ;;  %2938 = vmatmul.msk.f32.gmra.mxu3 %vm1083_vm1, %v1901_v57  ;;  %v4651_v57 = vld [vmem:[#allocation33_spill] sm:$0xff] }
 0x20a   : > { %1643 = vmatmul.f32.gmra.mxu0 %v1199_v22  ;;  %2923 = vmatmul.msk.f32.gmra.mxu2 %vm1083_vm1, %v1902_v20 }
 0x20b   : > { %1684 = vmatmul.f32.gmra.mxu1 %v1199_v22  ;;  %2939 = vmatmul.msk.f32.gmra.mxu3 %vm1083_vm1, %v1902_v20 }
 0x212   : > { %2924 = vmatmul.msk.f32.gmra.mxu2 %vm1083_vm1, %v1903_v4 }
 0x213   : > { %2940 = vmatmul.msk.f32.gmra.mxu3 %vm1083_vm1, %v1903_v4 }
 0x21a   : > { %2925 = vmatmul.msk.f32.gmra.mxu2 %vm1083_vm1, %v1904_v63 }
 0x21b   : > { %2941 = vmatmul.msk.f32.gmra.mxu3 %vm1083_vm1, %v1904_v63 }
 0x222   : > { %2926 = vmatmul.msk.f32.gmra.mxu2 %vm1083_vm1, %v1905_v54 }
 0x223   : > { %2942 = vmatmul.msk.f32.gmra.mxu3 %vm1083_vm1, %v1905_v54 }
 0x22a   : > { %2927 = vmatmul.msk.f32.gmra.mxu2 %vm1083_vm1, %v1906_v50 }
 0x22b   : > { %2943 = vmatmul.msk.f32.gmra.mxu3 %vm1083_vm1, %v1906_v50 }
 0x232   : > { %2928 = vmatmul.msk.f32.gmra.mxu2 %vm1083_vm1, %v1907_v19 }
 0x233   : > { %2944 = vmatmul.msk.f32.gmra.mxu3 %vm1083_vm1, %v1907_v19 }
 0x23a   : > { %2929 = vmatmul.msk.f32.gmra.mxu2 %vm1083_vm1, %v1908_v26 }
 0x23b   : > { %2945 = vmatmul.msk.f32.gmra.mxu3 %vm1083_vm1, %v1908_v26 }
 0x242   : > { %2930 = vmatmul.msk.f32.gmra.mxu2 %vm1083_vm1, %v1909_v41 }
 0x243   : > { %2946 = vmatmul.msk.f32.gmra.mxu3 %vm1083_vm1, %v1909_v41  ;;  %v4652_v41 = vld [vmem:[#allocation28_spill] sm:$0xff] }
 0x24a   : > { %2931 = vmatmul.msk.f32.gmra.mxu2 %vm1083_vm1, %v1910_v5 }
 0x24b   : > { %2947 = vmatmul.msk.f32.gmra.mxu3 %vm1083_vm1, %v1910_v5 }
 0x252   : > { %2932 = vmatmul.msk.f32.gmra.mxu2 %vm1083_vm1, %v1911_v28 }
 0x253   : > { %2948 = vmatmul.msk.f32.gmra.mxu3 %vm1083_vm1, %v1911_v28 }
 0x25a   : > { %2933 = vmatmul.msk.f32.gmra.mxu2 %vm1083_vm1, %v1912_v60 }
 0x25b   : > { %2949 = vmatmul.msk.f32.gmra.mxu3 %vm1083_vm1, %v1912_v60 }
 0x25e   : > { %v4289_v24 = vpop.f32.mrf.mxu0 }
 0x25f   : > { %v4291_v21 = vpop.f32.mrf.mxu1 }
 0x262   : > { %2934 = vmatmul.msk.f32.gmra.mxu2 %vm1083_vm1, %v1913_v56 }
 0x263   : > { %2950 = vmatmul.msk.f32.gmra.mxu3 %vm1083_vm1, %v1913_v56 }
 0x264   : > { %v1647_v44 = vpop.f32.mrf.mxu2 }
 0x265   : > { %v1688_v15 = vpop.f32.mrf.mxu3  ;;  %v1648_v51 = vadd.f32 %v1647_v44, %v4646_v1 }
 0x266   : > { %v1689_v18 = vadd.f32 %v1688_v15, %v4646_v1 }
 0x267   : > { %v1632_v30 = vpop.f32.mrf.mxu0  ;;  %v1722_v62 = vmul.f32 0.2, %v1648_v51  ;;  %vm1706_vm7 = vcmp.gt.f32.partialorder %v1648_v51, 0.0 }
 0x268   : > { %v1673_v45 = vpop.f32.mrf.mxu1  ;;  %v1723_v23 = vmul.f32 0.2, %v1689_v18  ;;  %vm1707_vm8 = vcmp.gt.f32.partialorder %v1689_v18, 0.0  ;;  %v1633_v5 = vadd.f32 %v1632_v30, %v4652_v41 }
 0x269   : > { %v1738_v53 = vsel %vm1706_vm7, %v1648_v51, %v1722_v62  ;;  %v1674_v56 = vadd.f32 %v1673_v45, %v4652_v41 }
 0x26a   : > { %2935 = vmatmul.msk.f32.gmra.mxu2 %vm1083_vm1, %v1914_v59  ;;  %v1739_v49 = vsel %vm1707_vm8, %v1689_v18, %v1723_v23  ;;  %vm1696_vm2 = vcmp.gt.f32.partialorder %v1633_v5, 0.0  ;;  %v1210_v23 = vld [vmem:[#allocation7] sm:$0xff] }
 0x26b   : > { %2951 = vmatmul.msk.f32.gmra.mxu3 %vm1083_vm1, %v1914_v59  ;;  %v4653_v59 = vld [vmem:[#allocation29_spill] sm:$0xff]  ;;  %vm1697_vm3 = vcmp.gt.f32.partialorder %v1674_v56, 0.0 }
 0x26c   : > { %v1630_v1 = vadd.f32 %v4289_v24, %v4653_v59 }
 0x26d   : > { %v1650_v7 = vpop.f32.mrf.mxu2 }
 0x26e   : > { %v1651_v0 = vadd.f32 %v1650_v7, %v4647_v46  ;;  %v1691_v39 = vpop.f32.mrf.mxu3  ;;  %v1671_v7 = vadd.f32 %v4291_v21, %v4653_v59  ;;  %vm1694_vm4 = vcmp.gt.f32.partialorder %v1630_v1, 0.0 }
 0x26f   : > { %v1692_v34 = vadd.f32 %v1691_v39, %v4647_v46  ;;  %v1635_v9 = vpop.f32.mrf.mxu0 }
 0x270   : > { %vm1708_vm5 = vcmp.gt.f32.partialorder %v1651_v0, 0.0  ;;  %v1724_v35 = vmul.f32 0.2, %v1651_v0  ;;  %v1676_v3 = vpop.f32.mrf.mxu1  ;;  %v1636_v22 = vadd.f32 %v1635_v9, %v4651_v57  ;;  %v1710_v9 = vmul.f32 0.2, %v1630_v1 }
 0x271   : > { %vm1709_vm6 = vcmp.gt.f32.partialorder %v1692_v34, 0.0  ;;  %v1725_v32 = vmul.f32 0.2, %v1692_v34  ;;  %v1677_v63 = vadd.f32 %v1676_v3, %v4651_v57  ;;  %v1711_v21 = vmul.f32 0.2, %v1671_v7 }
 0x272   : > { %v1740_v16 = vsel %vm1708_vm5, %v1651_v0, %v1724_v35  ;;  %v1714_v18 = vmul.f32 0.2, %v1636_v22  ;;  %vm1698_vm15 = vcmp.gt.f32.partialorder %v1636_v22, 0.0  ;;  %v1712_v0 = vmul.f32 0.2, %v1633_v5 }
 0x273   : > { %1783 = vmatpush.msrb.mxu0 %v1740_v16  ;;  %v1741_v36 = vsel %vm1709_vm6, %v1692_v34, %v1725_v32  ;;  %v1715_v46 = vmul.f32 0.2, %v1677_v63  ;;  %vm1699_vm0 = vcmp.gt.f32.partialorder %v1677_v63, 0.0  ;;  %v1713_v34 = vmul.f32 0.2, %v1674_v56 }
 0x274   : > { %1812 = vmatpush.msrb.mxu1 %v1741_v36  ;;  %v1730_v24 = vsel %vm1698_vm15, %v1636_v22, %v1714_v18  ;;  %v1728_v35 = vsel %vm1696_vm2, %v1633_v5, %v1712_v0  ;;  %vm1695_vm5 = vcmp.gt.f32.partialorder %v1671_v7, 0.0  ;;  %vm1762_vm6 = vcmask 523264   ;;  %v4654_v0 = vld [vmem:[#allocation36_spill] sm:$0xff] }
 0x275   : > { %1784 = vmatpush.msrb.mxu0 %v1738_v53  ;;  %v1731_v62 = vsel %vm1699_vm0, %v1677_v63, %v1715_v46  ;;  %v1729_v3 = vsel %vm1697_vm3, %v1674_v56, %v1713_v34  ;;  %v1726_v32 = vsel %vm1694_vm4, %v1630_v1, %v1710_v9  ;;  %v1727_v16 = vsel %vm1695_vm5, %v1671_v7, %v1711_v21  ;;  %v4323_v36 = vpop.f32.mrf.mxu2  ;;  %v4655_v21 = vld [vmem:[#allocation31_spill] sm:$0xff] }
 0x276   : > { %1813 = vmatpush.msrb.mxu1 %v1739_v49  ;;  %v4325_v53 = vpop.f32.mrf.mxu3  ;;  %v1211_v49 = vld [vmem:[#allocation7 + $0x8] sm:$0xff] }
 0x277   : > { %v1638_v11 = vpop.f32.mrf.mxu0 }
 0x278   : > { %v1679_v27 = vpop.f32.mrf.mxu1  ;;  %v1639_v17 = vadd.f32 %v1638_v11, %v4649_v31 }
 0x279   : > { %v1680_v20 = vadd.f32 %v1679_v27, %v4649_v31  ;;  %v1212_v27 = vld [vmem:[#allocation7 + $0x10] sm:$0xff] }
 0x27a   : > { %v1716_v60 = vmul.f32 0.2, %v1639_v17  ;;  %vm1700_vm13 = vcmp.gt.f32.partialorder %v1639_v17, 0.0 }
 0x27b   : > { %v1717_v15 = vmul.f32 0.2, %v1680_v20  ;;  %vm1701_vm14 = vcmp.gt.f32.partialorder %v1680_v20, 0.0 }
 0x27c   : > { %v1732_v45 = vsel %vm1700_vm13, %v1639_v17, %v1716_v60 }
 0x27d   : > { %v1733_v39 = vsel %vm1701_vm14, %v1680_v20, %v1717_v15  ;;  %v4329_v11 = vpop.f32.mrf.mxu2 }
 0x27f   : > { %v1641_v52 = vpop.f32.mrf.mxu0 }
 0x280   : > { %v1682_v13 = vpop.f32.mrf.mxu1  ;;  %v1642_v25 = vadd.f32 %v1641_v52, %v4648_v42  ;;  %v4331_v52 = vpop.f32.mrf.mxu3 }
 0x281   : > { %v1683_v40 = vadd.f32 %v1682_v13, %v4648_v42  ;;  %v1213_v13 = vld [vmem:[#allocation7 + $0x18] sm:$0xff] }
 0x282   : > { %v1718_v50 = vmul.f32 0.2, %v1642_v25  ;;  %vm1702_vm11 = vcmp.gt.f32.partialorder %v1642_v25, 0.0 }
 0x283   : > { %v1719_v26 = vmul.f32 0.2, %v1683_v40  ;;  %vm1703_vm12 = vcmp.gt.f32.partialorder %v1683_v40, 0.0 }
 0x284   : > { %v1734_v51 = vsel %vm1702_vm11, %v1642_v25, %v1718_v50 }
 0x285   : > { %v1735_v30 = vsel %vm1703_vm12, %v1683_v40, %v1719_v26  ;;  %v4335_v42 = vpop.f32.mrf.mxu2 }
 0x287   : > { %v1644_v33 = vpop.f32.mrf.mxu0 }
 0x288   : > { %v1645_v58 = vadd.f32 %v1644_v33, %v4650_v8  ;;  %v1685_v14 = vpop.f32.mrf.mxu1  ;;  %v4337_v25 = vpop.f32.mrf.mxu3 }
 0x289   : > { %v1686_v4 = vadd.f32 %v1685_v14, %v4650_v8 }
 0x28a   : > { %vm1704_vm9 = vcmp.gt.f32.partialorder %v1645_v58, 0.0  ;;  %v1720_v54 = vmul.f32 0.2, %v1645_v58 }
 0x28b   : > { %vm1705_vm10 = vcmp.gt.f32.partialorder %v1686_v4, 0.0  ;;  %v1721_v19 = vmul.f32 0.2, %v1686_v4 }
 0x28c   : > { %v1736_v28 = vsel %vm1704_vm9, %v1645_v58, %v1720_v54 }
 0x28d   : > { %1785 = vmatpush.msrb.mxu0 %v1736_v28  ;;  %v1737_v44 = vsel %vm1705_vm10, %v1686_v4, %v1721_v19  ;;  %v4341_v40 = vpop.f32.mrf.mxu2 }
 0x28e   : > { %1814 = vmatpush.msrb.mxu1 %v1737_v44 }
 0x28f   : > { %1786 = vmatpush.msrb.mxu0 %v1734_v51 }
 0x290   : > { %1815 = vmatpush.msrb.mxu1 %v1735_v30  ;;  %v4343_v33 = vpop.f32.mrf.mxu3 }
 0x291   : > { %1787 = vmatpush.msrb.mxu0 %v1732_v45 }
 0x292   : > { %1816 = vmatpush.msrb.mxu1 %v1733_v39 }
 0x293   : > { %1788 = vmatpush.msrb.mxu0 %v1730_v24 }
 0x294   : > { %1817 = vmatpush.msrb.mxu1 %v1731_v62 }
 0x295   : > { %1789 = vmatpush.msrb.mxu0 %v1728_v35  ;;  %v4345_v31 = vpop.f32.mrf.mxu2 }
 0x296   : > { %1818 = vmatpush.msrb.mxu1 %v1729_v3 }
 0x297   : > { %1790 = vmatpush.msrb.mxu0 %v1726_v32 }
 0x298   : > { %1819 = vmatpush.msrb.mxu1 %v1727_v16  ;;  %2912 = vmatmul.msk.f32.vlgmr.msrb.gmra.mxu0 %vm1762_vm6, %v1210_v23  ;;  %v4347_v17 = vpop.f32.mrf.mxu3 }
 0x299   : > { %2916 = vmatmul.msk.f32.vlgmr.msrb.gmra.mxu1 %vm1762_vm6, %v1210_v23  ;;  %v4656_v23 = vld [vmem:[#allocation34_spill] sm:$0xff] }
 0x29d   : > { %v4349_v8 = vpop.f32.mrf.mxu2 }
 0x2a0   : > { %2913 = vmatmul.msk.f32.gmra.mxu0 %vm1762_vm6, %v1211_v49  ;;  %v4351_v58 = vpop.f32.mrf.mxu3 }
 0x2a1   : > { %2917 = vmatmul.msk.f32.gmra.mxu1 %vm1762_vm6, %v1211_v49  ;;  %v4657_v49 = vld [vmem:[#allocation32_spill] sm:$0xff] }
 0x2a5   : > { %v4353_v14 = vpop.f32.mrf.mxu2 }
 0x2a8   : > { %2914 = vmatmul.msk.f32.gmra.mxu0 %vm1762_vm6, %v1212_v27  ;;  %v4355_v57 = vpop.f32.mrf.mxu3 }
 0x2a9   : > { %2918 = vmatmul.msk.f32.gmra.mxu1 %vm1762_vm6, %v1212_v27 }
 0x2ad   : > { %v4357_v22 = vpop.f32.mrf.mxu2 }
 0x2b0   : > { %2915 = vmatmul.msk.f32.gmra.mxu0 %vm1762_vm6, %v1213_v13  ;;  %v4359_v20 = vpop.f32.mrf.mxu3 }
 0x2b1   : > { %2919 = vmatmul.msk.f32.gmra.mxu1 %vm1762_vm6, %v1213_v13  ;;  %v4658_v13 = vld [vmem:[#allocation35_spill] sm:$0xff] }
 0x2b5   : > { %v4361_v4 = vpop.f32.mrf.mxu2 }
 0x2b8   : > { %v4363_v63 = vpop.f32.mrf.mxu3 }
 0x2bd   : > { %v4365_v54 = vpop.f32.mrf.mxu2 }
 0x2c0   : > { %v4367_v50 = vpop.f32.mrf.mxu3 }
 0x2c5   : > { %v2130_v19 = vpop.f32.mrf.mxu2 }
 0x2c8   : > { %v4369_v26 = vpop.f32.mrf.mxu3 }
 0x2cd   : > { %v2133_v41 = vpop.f32.mrf.mxu2 }
 0x2d0   : > { %v2198_v5 = vpop.f32.mrf.mxu3 }
 0x2d5   : > { %v2136_v28 = vpop.f32.mrf.mxu2 }
 0x2d8   : > { %v2201_v60 = vpop.f32.mrf.mxu3 }
 0x2dd   : > { %v2139_v15 = vpop.f32.mrf.mxu2 }
 0x2e0   : > { %v2204_v1 = vpop.f32.mrf.mxu3 }
 0x2e5   : > { %v2142_v30 = vpop.f32.mrf.mxu2 }
 0x2e8   : > { %v2207_v46 = vpop.f32.mrf.mxu3 }
 0x2ed   : > { %v2145_v9 = vpop.f32.mrf.mxu2 }
 0x2ee   : > { %v2146_v32 = vadd.f32 %v2145_v9, %v4656_v23 }
 0x2f0   : > { %v2210_v62 = vpop.f32.mrf.mxu3  ;;  %vm2243_vm7 = vcmp.gt.f32.partialorder %v2146_v32, 0.0 }
 0x2f1   : > { %v2211_v16 = vadd.f32 %v2210_v62, %v4656_v23 }
 0x2f3   : > { %vm2244_vm8 = vcmp.gt.f32.partialorder %v2211_v16, 0.0 }
 0x315   : > { %v1792_v56 = vpop.f32.mrf.mxu0 }
 0x316   : > { %v1821_v44 = vpop.f32.mrf.mxu1 }
 0x31d   : > { %v1795_v59 = vpop.f32.mrf.mxu0 }
 0x31e   : > { %v1824_v51 = vpop.f32.mrf.mxu1  ;;  %v4390_v27 = vadd.f32 %v1795_v59, %v4657_v49  ;;  %v4660_v59 = vld [vmem:[#allocation39_spill] sm:$0xff] }
 0x31f   : > { %v1793_v23 = vadd.f32 %v1792_v56, %v4660_v59 }
 0x325   : > { %v1798_v18 = vpop.f32.mrf.mxu0 }
 0x326   : > { %v1827_v7 = vpop.f32.mrf.mxu1  ;;  %v4380_v35 = vadd.f32 %v1798_v18, %v4655_v21  ;;  %v2208_v18 = vadd.f32 %v2207_v46, %v4658_v13 }
 0x327   : > { %v4383_v3 = vadd.f32 %v1827_v7, %v4655_v21  ;;  %v2275_v7 = vmul.f32 0.2, %v2146_v32  ;;  %v2276_v21 = vmul.f32 0.2, %v2211_v16 }
 0x328   : > { %vm2242_vm10 = vcmp.gt.f32.partialorder %v2208_v18, 0.0 }
 0x329   : > { %v2307_v37 = vsel %vm2243_vm7, %v2146_v32, %v2275_v7 }
 0x32d   : > { %v1801_v45 = vpop.f32.mrf.mxu0 }
 0x32e   : > { %v4372_v39 = vadd.f32 %v1801_v45, %v4654_v0  ;;  %v1830_v34 = vpop.f32.mrf.mxu1  ;;  %v2143_v45 = vadd.f32 %v2142_v30, %v4658_v13  ;;  %v4661_v30 = vld [vmem:[#allocation37_spill] sm:$0xff]  ;;  %v2274_v13 = vmul.f32 0.2, %v2208_v18 }
 0x32f   : > { %v4375_v24 = vadd.f32 %v1830_v34, %v4654_v0  ;;  %v4394_v0 = vadd.f32 %v1824_v51, %v4657_v49  ;;  %v4659_v34 = vld [vmem:[#allocation42_spill] sm:$0xff]  ;;  %v2137_v10 = vadd.f32 %v2136_v28, %v4661_v30  ;;  %v1822_v49 = vadd.f32 %v1821_v44, %v4660_v59  ;;  %v4663_v28 = vld [vmem:[#allocation45_spill] sm:$0xff] }
 0x330   : > { %1845 = vmatpush.xpose.msra.mxu0 %v4372_v39  ;;  %v2140_v9 = vadd.f32 %v2139_v15, %v4659_v34  ;;  %v2205_v62 = vadd.f32 %v2204_v1, %v4659_v34  ;;  %v2273_v51 = vmul.f32 0.2, %v2143_v45  ;;  %v2202_v46 = vadd.f32 %v2201_v60, %v4661_v30  ;;  %v4662_v15 = vld [vmem:[#allocation38_spill] sm:$0xff] }
 0x331   : > { %1874 = vmatpush.xpose.msra.mxu1 %v4375_v24  ;;  %vm2241_vm9 = vcmp.gt.f32.partialorder %v2143_v45, 0.0  ;;  %v2134_v29 = vadd.f32 %v2133_v41, %v4662_v15  ;;  %v2308_v1 = vsel %vm2244_vm8, %v2211_v16, %v2276_v21  ;;  %v2199_v56 = vadd.f32 %v2198_v5, %v4662_v15  ;;  %v4664_v16 = vld [vmem:[#allocation40_spill] sm:$0xff] }
 0x332   : > { %v2271_v48 = vmul.f32 0.2, %v2140_v9  ;;  %v2272_v34 = vmul.f32 0.2, %v2205_v62  ;;  %vm2239_vm11 = vcmp.gt.f32.partialorder %v2140_v9, 0.0  ;;  %v2131_v44 = vadd.f32 %v2130_v19, %v4663_v28 }
 0x333   : > { %v2269_v59 = vmul.f32 0.2, %v2137_v10  ;;  %v2305_v60 = vsel %vm2241_vm9, %v2143_v45, %v2273_v51  ;;  %vm2240_vm12 = vcmp.gt.f32.partialorder %v2205_v62, 0.0  ;;  %v2196_v32 = vadd.f32 %v4369_v26, %v4663_v28  ;;  %v4665_v26 = vld [vmem:[#allocation41_spill] sm:$0xff] }
 0x334   : > { %1846 = vmatpush.xpose.msra.mxu0 %v4380_v35  ;;  %v2270_v41 = vmul.f32 0.2, %v2202_v46  ;;  %vm2237_vm13 = vcmp.gt.f32.partialorder %v2137_v10, 0.0  ;;  %v2128_v5 = vadd.f32 %v4365_v54, %v4664_v16  ;;  %v2267_v7 = vmul.f32 0.2, %v2134_v29 }
 0x335   : > { %1875 = vmatpush.xpose.msra.mxu1 %v4383_v3  ;;  %v2303_v21 = vsel %vm2239_vm11, %v2140_v9, %v2271_v48  ;;  %vm2238_vm14 = vcmp.gt.f32.partialorder %v2202_v46, 0.0  ;;  %v2193_v19 = vadd.f32 %v4367_v50, %v4664_v16  ;;  %v2268_v45 = vmul.f32 0.2, %v2199_v56  ;;  %v4666_v9 = vld [vmem:[#allocation48_spill] sm:$0xff]  ;;  %v4669_v16 = vld [vmem:[#allocation46_spill] sm:$0xff] }
 0x336   : > { %vm2235_vm15 = vcmp.gt.f32.partialorder %v2134_v29, 0.0  ;;  %v2125_v30 = vadd.f32 %v4361_v4, %v4665_v26  ;;  %v2265_v51 = vmul.f32 0.2, %v2131_v44  ;;  %vm2236_vm0 = vcmp.gt.f32.partialorder %v2199_v56, 0.0 }
 0x337   : > { %v2190_v54 = vadd.f32 %v4363_v63, %v4665_v26  ;;  %v2302_v48 = vsel %vm2238_vm14, %v2202_v46, %v2270_v41  ;;  %vm2233_vm2 = vcmp.gt.f32.partialorder %v2131_v44, 0.0  ;;  %v2122_v50 = vadd.f32 %v4357_v22, %v4666_v9 }
 0x338   : > { %1847 = vmatpush.xpose.msra.mxu0 %v4390_v27  ;;  %vm2234_vm3 = vcmp.gt.f32.partialorder %v2196_v32, 0.0  ;;  %v2187_v4 = vadd.f32 %v4359_v20, %v4666_v9  ;;  %v2264_v15 = vmul.f32 0.2, %v2193_v19  ;;  %vm2231_vm4 = vcmp.gt.f32.partialorder %v2128_v5, 0.0 }
 0x339   : > { %1876 = vmatpush.xpose.msra.mxu1 %v4394_v0  ;;  %v2297_v46 = vsel %vm2233_vm2, %v2131_v44, %v2265_v51  ;;  %vm2232_vm5 = vcmp.gt.f32.partialorder %v2193_v19, 0.0  ;;  %v2262_v22 = vmul.f32 0.2, %v2190_v54  ;;  %vm2229_vm7 = vcmp.gt.f32.partialorder %v2125_v30, 0.0 }
 0x33a   : > { %vm2230_vm8 = vcmp.gt.f32.partialorder %v2190_v54, 0.0  ;;  %v2260_v44 = vmul.f32 0.2, %v2187_v4  ;;  %vm2227_vm9 = vcmp.gt.f32.partialorder %v2122_v50, 0.0 }
 0x33c   : > { %1848 = vmatpush.xpose.msra.mxu0 %v1793_v23 }
 0x33d   : > { %1877 = vmatpush.xpose.msra.mxu1 %v1822_v49 }
 0x33f   : > { %1849 = vmatmul.f32.vlgmr.msra.gmra.mxu0 %v1793_v23  ;;  %v2304_v23 = vsel %vm2240_vm12, %v2205_v62, %v2272_v34  ;;  %v2299_v62 = vsel %vm2235_vm15, %v2134_v29, %v2267_v7  ;;  %v2261_v34 = vmul.f32 0.2, %v2125_v30 }
 0x340   : > { %2349 = vmatpush.msrb.mxu0 %v2307_v37  ;;  %1878 = vmatmul.f32.vlgmr.msra.gmra.mxu1 %v1822_v49  ;;  %v2306_v37 = vsel %vm2242_vm10, %v2208_v18, %v2274_v13  ;;  %v2301_v18 = vsel %vm2237_vm13, %v2137_v10, %v2269_v59  ;;  %v2266_v49 = vmul.f32 0.2, %v2196_v32  ;;  %v2263_v13 = vmul.f32 0.2, %v2128_v5 }
 0x341   : > { %2390 = vmatpush.msrb.mxu1 %v2308_v1  ;;  %v2300_v10 = vsel %vm2236_vm0, %v2199_v56, %v2268_v45  ;;  %v4667_v1 = vld [vmem:[#allocation43_spill] sm:$0xff]  ;;  %v4668_v56 = vld [vmem:[#allocation44_spill] sm:$0xff]  ;;  %vm2228_vm10 = vcmp.gt.f32.partialorder %v2187_v4, 0.0 }
 0x342   : > { %2350 = vmatpush.msrb.mxu0 %v2305_v60  ;;  %v2119_v63 = vadd.f32 %v4353_v14, %v4667_v1  ;;  %v2184_v29 = vadd.f32 %v4355_v57, %v4667_v1  ;;  %v2298_v20 = vsel %vm2234_vm3, %v2196_v32, %v2266_v49  ;;  %v2116_v28 = vadd.f32 %v4349_v8, %v4668_v56  ;;  %v4670_v45 = vld [vmem:[#allocation47_spill] sm:$0xff] }
 0x343   : > { %2391 = vmatpush.msrb.mxu1 %v2306_v37  ;;  %v2259_v14 = vmul.f32 0.2, %v2122_v50  ;;  %v2295_v59 = vsel %vm2231_vm4, %v2128_v5, %v2263_v13  ;;  %v2296_v57 = vsel %vm2232_vm5, %v2193_v19, %v2264_v15  ;;  %v2293_v32 = vsel %vm2229_vm7, %v2125_v30, %v2261_v34 }
 0x344   : > { %2351 = vmatpush.msrb.mxu0 %v2303_v21  ;;  %v2257_v60 = vmul.f32 0.2, %v2119_v63  ;;  %v2178_v8 = vadd.f32 %v4347_v17, %v4081_v55  ;;  %v2258_v41 = vmul.f32 0.2, %v2184_v29  ;;  %v2294_v37 = vsel %vm2230_vm8, %v2190_v54, %v2262_v22  ;;  %v1935_v22 = vld [vmem:[#allocation9 + $0x20] sm:$0xff] }
 0x345   : > { %2392 = vmatpush.msrb.mxu1 %v2304_v23  ;;  %vm2225_vm11 = vcmp.gt.f32.partialorder %v2119_v63, 0.0  ;;  %v2255_v5 = vmul.f32 0.2, %v2116_v28  ;;  %v2291_v7 = vsel %vm2227_vm9, %v2122_v50, %v2259_v14  ;;  %vm2226_vm12 = vcmp.gt.f32.partialorder %v2184_v29, 0.0 }
 0x346   : > { %2352 = vmatpush.msrb.mxu0 %v2301_v18  ;;  %v2292_v19 = vsel %vm2228_vm10, %v2187_v4, %v2260_v44  ;;  %vm2223_vm13 = vcmp.gt.f32.partialorder %v2116_v28, 0.0  ;;  %v2289_v23 = vsel %vm2225_vm11, %v2119_v63, %v2257_v60  ;;  %v2254_v26 = vmul.f32 0.2, %v2178_v8 }
 0x347   : > { %2393 = vmatpush.msrb.mxu1 %v2302_v48  ;;  %1852 = vmatmul.f32.gmra.mxu0 %v4390_v27  ;;  %v2181_v27 = vadd.f32 %v4351_v58, %v4668_v56  ;;  %v2110_v58 = vadd.f32 %v4341_v40, %v4669_v16  ;;  %v2172_v40 = vadd.f32 %v4337_v25, %v4670_v45  ;;  %vm2222_vm0 = vcmp.gt.f32.partialorder %v2178_v8, 0.0  ;;  %v1937_v56 = vld [vmem:[#allocation9 + $0x30] sm:$0xff] }
 0x348   : > { %2353 = vmatpush.msrb.mxu0 %v2299_v62  ;;  %1881 = vmatmul.f32.gmra.mxu1 %v4394_v0  ;;  %v2113_v0 = vadd.f32 %v4345_v31, %v4081_v55  ;;  %v2175_v31 = vadd.f32 %v4343_v33, %v4669_v16  ;;  %v2107_v55 = vadd.f32 %v4335_v42, %v4670_v45 }
 0x349   : > { %2394 = vmatpush.msrb.mxu1 %v2300_v10  ;;  %v2256_v21 = vmul.f32 0.2, %v2181_v27  ;;  %vm2224_vm14 = vcmp.gt.f32.partialorder %v2181_v27, 0.0  ;;  %v2290_v33 = vsel %vm2226_vm12, %v2184_v29, %v2258_v41  ;;  %v2104_v30 = vadd.f32 %v4329_v11, %v4110_v38  ;;  %v1934_v29 = vld [vmem:[#allocation9 + $0x18] sm:$0xff] }
 0x34a   : > { %2354 = vmatpush.msrb.mxu0 %v2297_v46  ;;  %v2253_v17 = vmul.f32 0.2, %v2113_v0  ;;  %vm2221_vm15 = vcmp.gt.f32.partialorder %v2113_v0, 0.0  ;;  %v2251_v42 = vmul.f32 0.2, %v2110_v58  ;;  %v2287_v51 = vsel %vm2223_vm13, %v2116_v28, %v2255_v5  ;;  %v1931_v46 = vld [vmem:[#allocation9] sm:$0xff] }
 0x34b   : > { %2395 = vmatpush.msrb.mxu1 %v2298_v20  ;;  %v2252_v18 = vmul.f32 0.2, %v2175_v31  ;;  %v2288_v25 = vsel %vm2224_vm14, %v2181_v27, %v2256_v21  ;;  %vm2219_vm2 = vcmp.gt.f32.partialorder %v2110_v58, 0.0  ;;  %v2249_v49 = vmul.f32 0.2, %v2107_v55  ;;  %v1936_v20 = vld [vmem:[#allocation9 + $0x28] sm:$0xff] }
 0x34c   : > { %2355 = vmatpush.msrb.mxu0 %v2295_v59  ;;  %v2285_v48 = vsel %vm2221_vm15, %v2113_v0, %v2253_v17  ;;  %vm2220_vm3 = vcmp.gt.f32.partialorder %v2175_v31, 0.0  ;;  %v2250_v9 = vmul.f32 0.2, %v2172_v40  ;;  %v2286_v50 = vsel %vm2222_vm0, %v2178_v8, %v2254_v26  ;;  %v1938_v28 = vld [vmem:[#allocation9 + $0x38] sm:$0xff] }
 0x34d   : > { %2396 = vmatpush.msrb.mxu1 %v2296_v57  ;;  %vm2217_vm4 = vcmp.gt.f32.partialorder %v2107_v55, 0.0  ;;  %v2247_v13 = vmul.f32 0.2, %v2104_v30  ;;  %vm2218_vm5 = vcmp.gt.f32.partialorder %v2172_v40, 0.0  ;;  %v2284_v62 = vsel %vm2220_vm3, %v2175_v31, %v2252_v18 }
 0x34e   : > { %2356 = vmatpush.msrb.mxu0 %v2293_v32  ;;  %vm2215_vm7 = vcmp.gt.f32.partialorder %v2104_v30, 0.0  ;;  %v2281_v4 = vsel %vm2217_vm4, %v2107_v55, %v2249_v49  ;;  %v4673_v49 = vld [vmem:[#allocation51_spill] sm:$0xff] }
 0x34f   : > { %2397 = vmatpush.msrb.mxu1 %v2294_v37  ;;  %1855 = vmatmul.f32.gmra.mxu0 %v4380_v35  ;;  %v2169_v35 = vadd.f32 %v4331_v52, %v4110_v38  ;;  %v2283_v38 = vsel %vm2219_vm2, %v2110_v58, %v2251_v42  ;;  %v2279_v10 = vsel %vm2215_vm7, %v2104_v30, %v2247_v13 }
 0x350   : > { %2357 = vmatpush.msrb.mxu0 %v2291_v7  ;;  %1884 = vmatmul.f32.gmra.mxu1 %v4383_v3  ;;  %v4671_v3 = vld [vmem:[#allocation49_spill] sm:$0xff] }
 0x351   : > { %2398 = vmatpush.msrb.mxu1 %v2292_v19  ;;  %v2101_v54 = vadd.f32 %v4323_v36, %v4671_v3  ;;  %v2166_v11 = vadd.f32 %v4325_v53, %v4671_v3  ;;  %v2248_v52 = vmul.f32 0.2, %v2169_v35  ;;  %vm2216_vm8 = vcmp.gt.f32.partialorder %v2169_v35, 0.0 }
 0x352   : > { %2358 = vmatpush.msrb.mxu0 %v2289_v23  ;;  %v2282_v53 = vsel %vm2218_vm5, %v2172_v40, %v2250_v9 }
 0x353   : > { %2399 = vmatpush.msrb.mxu1 %v2290_v33  ;;  %v2245_v36 = vmul.f32 0.2, %v2101_v54  ;;  %v2246_v15 = vmul.f32 0.2, %v2166_v11  ;;  %vm2213_vm9 = vcmp.gt.f32.partialorder %v2101_v54, 0.0  ;;  %vm2214_vm10 = vcmp.gt.f32.partialorder %v2166_v11, 0.0 }
 0x354   : > { %2359 = vmatpush.msrb.mxu0 %v2287_v51  ;;  %v2280_v1 = vsel %vm2216_vm8, %v2169_v35, %v2248_v52 }
 0x355   : > { %2400 = vmatpush.msrb.mxu1 %v2288_v25  ;;  %v2277_v63 = vsel %vm2213_vm9, %v2101_v54, %v2245_v36  ;;  %v2278_v34 = vsel %vm2214_vm10, %v2166_v11, %v2246_v15  ;;  %v4674_v11 = vld [vmem:[#allocation50_spill] sm:$0xff] }
 0x356   : > { %2360 = vmatpush.msrb.mxu0 %v2285_v48 }
 0x357   : > { %2401 = vmatpush.msrb.mxu1 %v2286_v50  ;;  %1858 = vmatmul.f32.gmra.mxu0 %v4372_v39  ;;  %v1932_v39 = vld [vmem:[#allocation9 + $0x8] sm:$0xff] }
 0x358   : > { %2361 = vmatpush.msrb.mxu0 %v2283_v38  ;;  %1887 = vmatmul.f32.gmra.mxu1 %v4375_v24  ;;  %v1933_v24 = vld [vmem:[#allocation9 + $0x10] sm:$0xff] }
 0x359   : > { %2402 = vmatpush.msrb.mxu1 %v2284_v62 }
 0x35a   : > { %2362 = vmatpush.msrb.mxu0 %v2281_v4 }
 0x35b   : > { %2403 = vmatpush.msrb.mxu1 %v2282_v53 }
 0x35c   : > { %2363 = vmatpush.msrb.mxu0 %v2279_v10 }
 0x35d   : > { %2404 = vmatpush.msrb.mxu1 %v2280_v1 }
 0x35e   : > { %2364 = vmatpush.msrb.mxu0 %v2277_v63 }
 0x35f   : > { %2405 = vmatpush.msrb.mxu1 %v2278_v34  ;;  %2365 = vmatmul.f32.vlgmr.msrb.gmra.mxu0 %v1931_v46 }
 0x360   : > { %2406 = vmatmul.f32.vlgmr.msrb.gmra.mxu1 %v1931_v46 }
 0x367   : > { %2368 = vmatmul.f32.gmra.mxu0 %v1932_v39 }
 0x368   : > { %2409 = vmatmul.f32.gmra.mxu1 %v1932_v39 }
 0x36f   : > { %2371 = vmatmul.f32.gmra.mxu0 %v1933_v24 }
 0x370   : > { %2412 = vmatmul.f32.gmra.mxu1 %v1933_v24 }
 0x377   : > { %2374 = vmatmul.f32.gmra.mxu0 %v1934_v29 }
 0x378   : > { %2415 = vmatmul.f32.gmra.mxu1 %v1934_v29 }
 0x37f   : > { %2377 = vmatmul.f32.gmra.mxu0 %v1935_v22 }
 0x380   : > { %2418 = vmatmul.f32.gmra.mxu1 %v1935_v22 }
 0x387   : > { %2380 = vmatmul.f32.gmra.mxu0 %v1936_v20 }
 0x388   : > { %2421 = vmatmul.f32.gmra.mxu1 %v1936_v20 }
 0x38f   : > { %2383 = vmatmul.f32.gmra.mxu0 %v1937_v56 }
 0x390   : > { %2424 = vmatmul.f32.gmra.mxu1 %v1937_v56 }
 0x397   : > { %2386 = vmatmul.f32.gmra.mxu0 %v1938_v28 }
 0x398   : > { %2427 = vmatmul.f32.gmra.mxu1 %v1938_v28 }
 0x3bc   : > { %v1850_v14 = vpop.f32.mrf.mxu0 }
 0x3bd   : > { %v1879_v59 = vpop.f32.mrf.mxu1 }
 0x3be   : > { %v1880_v27 = vadd.f32 %v1879_v59, %v1850_v14 }
 0x3c0   : > { %v1891_v44 = vmul.f32 0.00390625, %v1880_v27 }
 0x3c2   : > { %1895 = vst.msk [vmem:[%s4465_s2] sm:$0xff] %vm1083_vm1, %v1891_v44 }
 0x3c4   : > { %v1853_v57 = vpop.f32.mrf.mxu0 }
 0x3c5   : > { %v1882_v0 = vpop.f32.mrf.mxu1 }
 0x3c6   : > { %v1883_v60 = vadd.f32 %v1882_v0, %v1853_v57 }
 0x3c8   : > { %v1892_v32 = vmul.f32 0.00390625, %v1883_v60 }
 0x3ca   : > { %1896 = vst.msk [vmem:[%s4465_s2 + $0x8] sm:$0xff] %vm1083_vm1, %v1892_v32 }
 0x3cc   : > { %v1856_v8 = vpop.f32.mrf.mxu0 }
 0x3cd   : > { %v1885_v41 = vpop.f32.mrf.mxu1 }
 0x3ce   : > { %v1886_v37 = vadd.f32 %v1885_v41, %v1856_v8 }
 0x3d0   : > { %v1893_v16 = vmul.f32 0.00390625, %v1886_v37 }
 0x3d2   : > { %1897 = vst.msk [vmem:[%s4465_s2 + $0x10] sm:$0xff] %vm1083_vm1, %v1893_v16 }
 0x3d4   : > { %v1859_v58 = vpop.f32.mrf.mxu0 }
 0x3d5   : > { %v1888_v5 = vpop.f32.mrf.mxu1 }
 0x3d6   : > { %v1889_v7 = vadd.f32 %v1888_v5, %v1859_v58 }
 0x3d8   : > { %v1894_v31 = vmul.f32 0.00390625, %v1889_v7 }
 0x3da   : > { %1898 = vst.msk [vmem:[%s4465_s2 + $0x18] sm:$0xff] %vm1083_vm1, %v1894_v31 }
 0x3dc   : > { %v2366_v21 = vpop.f32.mrf.mxu0 }
 0x3dd   : > { %v4475_v19 = vpop.f32.mrf.mxu1  ;;  %v2367_v44 = vadd.f32 %v2366_v21, %v4192_v61  ;;  %v1947_v21 = vld [vmem:[#allocation10] sm:$0xff] }
 0x3de   : > { %v2408_v0 = vadd.f32 %v4475_v19, %v4192_v61 }
 0x3df   : > { %v2447_v16 = vmul.f32 0.2, %v2367_v44  ;;  %vm2431_vm10 = vcmp.gt.f32.partialorder %v2367_v44, 0.0 }
 0x3e0   : > { %v2448_v5 = vmul.f32 0.2, %v2408_v0 }
 0x3e1   : > { %v2463_v19 = vsel %vm2431_vm10, %v2367_v44, %v2447_v16 }
 0x3e4   : > { %v2369_v45 = vpop.f32.mrf.mxu0 }
 0x3e5   : > { %v2410_v55 = vpop.f32.mrf.mxu1  ;;  %v2370_v56 = vadd.f32 %v2369_v45, %v4130_v12 }
 0x3e6   : > { %v2411_v14 = vadd.f32 %v2410_v55, %v4130_v12  ;;  %v1948_v55 = vld [vmem:[#allocation10 + $0x8] sm:$0xff] }
 0x3e7   : > { %v2449_v8 = vmul.f32 0.2, %v2370_v56  ;;  %vm2433_vm8 = vcmp.gt.f32.partialorder %v2370_v56, 0.0 }
 0x3e8   : > { %v2450_v41 = vmul.f32 0.2, %v2411_v14  ;;  %vm2434_vm9 = vcmp.gt.f32.partialorder %v2411_v14, 0.0 }
 0x3e9   : > { %v2465_v61 = vsel %vm2433_vm8, %v2370_v56, %v2449_v8 }
 0x3ea   : > { %v2466_v31 = vsel %vm2434_vm9, %v2411_v14, %v2450_v41 }
 0x3ec   : > { %v2372_v17 = vpop.f32.mrf.mxu0 }
 0x3ed   : > { %v2413_v23 = vpop.f32.mrf.mxu1 }
 0x3ee   : > { %v2414_v29 = vadd.f32 %v2413_v23, %v4112_v6  ;;  %v1950_v23 = vld [vmem:[#allocation10 + $0x18] sm:$0xff] }
 0x3f0   : > { %v2452_v60 = vmul.f32 0.2, %v2414_v29  ;;  %vm2436_vm7 = vcmp.gt.f32.partialorder %v2414_v29, 0.0 }
 0x3f2   : > { %v2468_v7 = vsel %vm2436_vm7, %v2414_v29, %v2452_v60 }
 0x3f4   : > { %v2375_v40 = vpop.f32.mrf.mxu0 }
 0x3f5   : > { %v2416_v26 = vpop.f32.mrf.mxu1  ;;  %v2376_v53 = vadd.f32 %v2375_v40, %v4172_v43 }
 0x3f6   : > { %v2417_v63 = vadd.f32 %v2416_v26, %v4172_v43 }
 0x3f7   : > { %v2453_v28 = vmul.f32 0.2, %v2376_v53  ;;  %vm2437_vm3 = vcmp.gt.f32.partialorder %v2376_v53, 0.0 }
 0x3f8   : > { %v2454_v59 = vmul.f32 0.2, %v2417_v63  ;;  %vm2438_vm4 = vcmp.gt.f32.partialorder %v2417_v63, 0.0 }
 0x3f9   : > { %v2469_v12 = vsel %vm2437_vm3, %v2376_v53, %v2453_v28 }
 0x3fa   : > { %v2470_v37 = vsel %vm2438_vm4, %v2417_v63, %v2454_v59 }
 0x3fc   : > { %v2378_v33 = vpop.f32.mrf.mxu0 }
 0x3fd   : > { %v2419_v30 = vpop.f32.mrf.mxu1  ;;  %v2379_v13 = vadd.f32 %v2378_v33, %v4098_v47 }
 0x3fe   : > { %v2420_v62 = vadd.f32 %v2419_v30, %v4098_v47  ;;  %v2373_v47 = vadd.f32 %v2372_v17, %v4112_v6  ;;  %v1949_v17 = vld [vmem:[#allocation10 + $0x10] sm:$0xff] }
 0x3ff   : > { %v2455_v39 = vmul.f32 0.2, %v2379_v13  ;;  %vm2439_vm0 = vcmp.gt.f32.partialorder %v2379_v13, 0.0 }
 0x400   : > { %v2456_v22 = vmul.f32 0.2, %v2420_v62  ;;  %vm2440_vm2 = vcmp.gt.f32.partialorder %v2420_v62, 0.0  ;;  %v2451_v57 = vmul.f32 0.2, %v2373_v47  ;;  %vm2435_vm5 = vcmp.gt.f32.partialorder %v2373_v47, 0.0 }
 0x401   : > { %v2471_v6 = vsel %vm2439_vm0, %v2379_v13, %v2455_v39 }
 0x402   : > { %v2472_v32 = vsel %vm2440_vm2, %v2420_v62, %v2456_v22  ;;  %v2467_v58 = vsel %vm2435_vm5, %v2373_v47, %v2451_v57 }
 0x404   : > { %v2381_v42 = vpop.f32.mrf.mxu0 }
 0x405   : > { %v2422_v51 = vpop.f32.mrf.mxu1  ;;  %v2382_v48 = vadd.f32 %v2381_v42, %v4673_v49 }
 0x406   : > { %v2423_v38 = vadd.f32 %v2422_v51, %v4673_v49  ;;  %v4676_v49 = vld [vmem:[#allocation53_spill] sm:$0xff] }
 0x407   : > { %v2457_v10 = vmul.f32 0.2, %v2382_v48  ;;  %vm2441_vm14 = vcmp.gt.f32.partialorder %v2382_v48, 0.0 }
 0x408   : > { %v2458_v34 = vmul.f32 0.2, %v2423_v38  ;;  %vm2442_vm15 = vcmp.gt.f32.partialorder %v2423_v38, 0.0 }
 0x409   : > { %v2473_v43 = vsel %vm2441_vm14, %v2382_v48, %v2457_v10 }
 0x40a   : > { %v2474_v27 = vsel %vm2442_vm15, %v2423_v38, %v2458_v34  ;;  %v4678_v38 = vld [vmem:[#allocation54_spill] sm:$0xff] }
 0x40c   : > { %v2384_v35 = vpop.f32.mrf.mxu0 }
 0x40d   : > { %v2425_v18 = vpop.f32.mrf.mxu1  ;;  %v2385_v25 = vadd.f32 %v2384_v35, %v4144_v2 }
 0x40e   : > { %v2426_v3 = vadd.f32 %v2425_v18, %v4144_v2  ;;  %v4675_v18 = vld [vmem:[#allocation52_spill] sm:$0xff] }
 0x40f   : > { %v2459_v36 = vmul.f32 0.2, %v2385_v25  ;;  %vm2443_vm12 = vcmp.gt.f32.partialorder %v2385_v25, 0.0 }
 0x410   : > { %v2460_v15 = vmul.f32 0.2, %v2426_v3  ;;  %vm2444_vm13 = vcmp.gt.f32.partialorder %v2426_v3, 0.0 }
 0x411   : > { %v2475_v24 = vsel %vm2443_vm12, %v2385_v25, %v2459_v36 }
 0x412   : > { %v2476_v20 = vsel %vm2444_vm13, %v2426_v3, %v2460_v15 }
 0x414   : > { %v2387_v54 = vpop.f32.mrf.mxu0 }
 0x415   : > { %v2388_v9 = vadd.f32 %v2387_v54, %v4674_v11  ;;  %v2428_v50 = vpop.f32.mrf.mxu1 }
 0x416   : > { %v2429_v52 = vadd.f32 %v2428_v50, %v4674_v11 }
 0x417   : > { %vm2445_vm1 = vcmp.gt.f32.partialorder %v2388_v9, 0.0  ;;  %v2461_v4 = vmul.f32 0.2, %v2388_v9 }
 0x418   : > { %vm2446_vm11 = vcmp.gt.f32.partialorder %v2429_v52, 0.0  ;;  %v2462_v2 = vmul.f32 0.2, %v2429_v52 }
 0x419   : > { %v2477_v1 = vsel %vm2445_vm1, %v2388_v9, %v2461_v4  ;;  %vm2432_vm1 = vcmp.gt.f32.partialorder %v2408_v0, 0.0  ;;  %v4677_v9 = vld [vmem:[#allocation19_spill] sm:$0xff] }
 0x41a   : > { %2519 = vmatpush.msra.mxu0 %v2477_v1  ;;  %v2478_v46 = vsel %vm2446_vm11, %v2429_v52, %v2462_v2  ;;  %v2464_v45 = vsel %vm2432_vm1, %v2408_v0, %v2448_v5 }
 0x41b   : > { %2548 = vmatpush.msra.mxu1 %v2478_v46 }
 0x41c   : > { %2520 = vmatpush.msra.mxu0 %v2475_v24 }
 0x41d   : > { %2549 = vmatpush.msra.mxu1 %v2476_v20 }
 0x41e   : > { %2521 = vmatpush.msra.mxu0 %v2473_v43 }
 0x41f   : > { %2550 = vmatpush.msra.mxu1 %v2474_v27 }
 0x420   : > { %2522 = vmatpush.msra.mxu0 %v2471_v6 }
 0x421   : > { %2551 = vmatpush.msra.mxu1 %v2472_v32 }
 0x422   : > { %2523 = vmatpush.msra.mxu0 %v2469_v12 }
 0x423   : > { %2552 = vmatpush.msra.mxu1 %v2470_v37 }
 0x424   : > { %2524 = vmatpush.msra.mxu0 %v2467_v58 }
 0x425   : > { %2553 = vmatpush.msra.mxu1 %v2468_v7 }
 0x426   : > { %2525 = vmatpush.msra.mxu0 %v2465_v61 }
 0x427   : > { %2554 = vmatpush.msra.mxu1 %v2466_v31 }
 0x428   : > { %2526 = vmatpush.msra.mxu0 %v2463_v19 }
 0x429   : > { %2555 = vmatpush.msra.mxu1 %v2464_v45  ;;  %2952 = vmatmul.msk.f32.vlgmr.msra.gmra.mxu0 %vm1762_vm6, %v1947_v21 }
 0x42a   : > { %2956 = vmatmul.msk.f32.vlgmr.msra.gmra.mxu1 %vm1762_vm6, %v1947_v21 }
 0x431   : > { %2953 = vmatmul.msk.f32.gmra.mxu0 %vm1762_vm6, %v1948_v55 }
 0x432   : > { %2957 = vmatmul.msk.f32.gmra.mxu1 %vm1762_vm6, %v1948_v55 }
 0x439   : > { %2954 = vmatmul.msk.f32.gmra.mxu0 %vm1762_vm6, %v1949_v17 }
 0x43a   : > { %2958 = vmatmul.msk.f32.gmra.mxu1 %vm1762_vm6, %v1949_v17 }
 0x441   : > { %2955 = vmatmul.msk.f32.gmra.mxu0 %vm1762_vm6, %v1950_v23 }
 0x442   : > { %2959 = vmatmul.msk.f32.gmra.mxu1 %vm1762_vm6, %v1950_v23  ;;  %vm2647_vm6 = vcmask 523520  }
 0x4a6   : > { %v2528_v40 = vpop.f32.mrf.mxu0 }
 0x4a7   : > { %v2557_v26 = vpop.f32.mrf.mxu1  ;;  %v2529_v52 = vadd.f32 %v2528_v40, %v4678_v38 }
 0x4a8   : > { %v2558_v62 = vadd.f32 %v2557_v26, %v4678_v38 }
 0x4ae   : > { %v2531_v33 = vpop.f32.mrf.mxu0 }
 0x4af   : > { %v2560_v30 = vpop.f32.mrf.mxu1  ;;  %v2532_v50 = vadd.f32 %v2531_v33, %v4677_v9 }
 0x4b0   : > { %v2561_v13 = vadd.f32 %v2560_v30, %v4677_v9 }
 0x4b6   : > { %v2534_v42 = vpop.f32.mrf.mxu0 }
 0x4b7   : > { %v2563_v51 = vpop.f32.mrf.mxu1  ;;  %v2535_v48 = vadd.f32 %v2534_v42, %v4676_v49 }
 0x4b8   : > { %v2564_v11 = vadd.f32 %v2563_v51, %v4676_v49 }
 0x4be   : > { %v2537_v35 = vpop.f32.mrf.mxu0 }
 0x4bf   : > { %v2538_v25 = vadd.f32 %v2537_v35, %v4675_v18  ;;  %v2566_v3 = vpop.f32.mrf.mxu1 }
 0x4c0   : > { %v2567_v54 = vadd.f32 %v2566_v3, %v4675_v18 }
 0x4c1   : > { %2581 = vmatpush.xpose.msrb.mxu0 %v2538_v25 }
 0x4c2   : > { %2610 = vmatpush.xpose.msrb.mxu1 %v2567_v54 }
 0x4c5   : > { %2582 = vmatpush.xpose.msrb.mxu0 %v2535_v48 }
 0x4c6   : > { %2611 = vmatpush.xpose.msrb.mxu1 %v2564_v11 }
 0x4c9   : > { %2583 = vmatpush.xpose.msrb.mxu0 %v2532_v50 }
 0x4ca   : > { %2612 = vmatpush.xpose.msrb.mxu1 %v2561_v13 }
 0x4cd   : > { %2584 = vmatpush.xpose.msrb.mxu0 %v2529_v52 }
 0x4ce   : > { %2613 = vmatpush.xpose.msrb.mxu1 %v2558_v62 }
 0x4d0   : > { %2585 = vmatmul.f32.vlgmr.msrb.gmra.mxu0 %v2529_v52 }
 0x4d1   : > { %2614 = vmatmul.f32.vlgmr.msrb.gmra.mxu1 %v2558_v62 }
 0x4d8   : > { %2588 = vmatmul.f32.gmra.mxu0 %v2532_v50 }
 0x4d9   : > { %2617 = vmatmul.f32.gmra.mxu1 %v2561_v13 }
 0x4e0   : > { %2591 = vmatmul.f32.gmra.mxu0 %v2535_v48 }
 0x4e1   : > { %2620 = vmatmul.f32.gmra.mxu1 %v2564_v11 }
 0x4e8   : > { %2594 = vmatmul.f32.gmra.mxu0 %v2538_v25 }
 0x4e9   : > { %2623 = vmatmul.f32.gmra.mxu1 %v2567_v54 }
 0x54d   : > { %v2586_v36 = vpop.f32.mrf.mxu0 }
 0x54e   : > { %v2615_v4 = vpop.f32.mrf.mxu1 }
 0x54f   : > { %v2616_v15 = vadd.f32 %v2615_v4, %v2586_v36 }
 0x551   : > { %v2627_v2 = vmul.f32 0.00390625, %v2616_v15 }
 0x553   : > { %2635 = vrot.lane.b32.xlu0 %v2627_v2, %s3296_s25 }
 0x555   : > { %v2589_v53 = vpop.f32.mrf.mxu0 }
 0x556   : > { %v2618_v10 = vpop.f32.mrf.mxu1 }
 0x557   : > { %v2619_v1 = vadd.f32 %v2618_v10, %v2589_v53 }
 0x559   : > { %v2628_v63 = vmul.f32 0.00390625, %v2619_v1 }
 0x55b   : > { %2637 = vrot.lane.b32.xlu2 %v2628_v63, %s3296_s25 }
 0x55d   : > { %v2592_v34 = vpop.f32.mrf.mxu0 }
 0x55e   : > { %v2621_v46 = vpop.f32.mrf.mxu1 }
 0x55f   : > { %v2622_v47 = vadd.f32 %v2621_v46, %v2592_v34 }
 0x561   : > { %v2629_v39 = vmul.f32 0.00390625, %v2622_v47 }
 0x563   : > { %2639 = vrot.lane.b32.xlu1 %v2629_v39, %s3296_s25 }
 0x565   : > { %v2595_v24 = vpop.f32.mrf.mxu0 }
 0x566   : > { %v2624_v29 = vpop.f32.mrf.mxu1 }
 0x567   : > { %v2625_v22 = vadd.f32 %v2624_v29, %v2595_v24 }
 0x569   : > { %v2630_v20 = vmul.f32 0.00390625, %v2625_v22 }
 0x56b   : > { %2641 = vrot.lane.b32.xlu0 %v2630_v20, %s3296_s25 }
 0x5b5   : > { %v2638_v56 = vpop.permute.xlu2 %2637 }
 0x5b6   : > { %2649 = vst.msk [vmem:[%s4465_s2 + $0x8] sm:$0xff] %vm2647_vm6, %v2638_v56 }
 0x5c5   : > { %v2636_v28 = vpop.permute.xlu0 %2635 }
 0x5c6   : > { %2648 = vst.msk [vmem:[%s4465_s2] sm:$0xff] %vm2647_vm6, %v2636_v28 }
 0x5d5   : > { %v2640_v43 = vpop.permute.xlu1 %2639 }
 0x5d6   : > { %2650 = vst.msk [vmem:[%s4465_s2 + $0x10] sm:$0xff] %vm2647_vm6, %v2640_v43 }
 0x5dd   : > { %v2642_v14 = vpop.permute.xlu0 %2641 }
 0x5de   : > { %2651 = vst.msk [vmem:[%s4465_s2 + $0x18] sm:$0xff] %vm2647_vm6, %v2642_v14 }
 0x5df PF: > { %s4679_s24 = sld [smem:[#allocation16_spill]] }
 0x5e5   : > { %s35_s1 = sadd.s32 1, %s4679_s24  }
 0x5e6   : > { %p32_p7 = scmp.ge.s32.totalorder %s35_s1, 4  }
 0x5e8   :  { %34 = sbr.rel (!%p32_p7) target bundleno = 13 (0xd), region = 174 }
 0x5ed   :  { %2705 = vsyncpa [#allocation3], 1 }
 0x5ee   :  { %2707 = vsyncpa [#allocation3 + $0x1], 1 }
 0x5ef   :  { %2708 = vsyncpa [#allocation5], 1 }
 0x5f0   :  { %2709 = vsyncpa [#allocation8], 1 }
 0x5f1   :  { %2710 = vsyncpa [#allocation11], 1 }

// kernel: mullayer_forward.4
= control target key start
LH: loop header
LB: loop body
LE: loop exit
PB: predicated region body
PF: predicated region fallthrough
CT: control target
= control target key end

     0   :  { %8 = vsyncpa [#allocation3], 0  ;;  %s4533_s0 = inlined_call_operand.vmem [shape: f32[4,1024], index: 0, kind: input, shape index: {}]   ;;  %s4534_s1 = inlined_call_operand.hbm [shape: bf16[1024,2048], index: 1, kind: input, shape index: {}]   ;;  %s4535_s2 = inlined_call_operand.hbm [shape: f32[1,2048], index: 2, kind: input, shape index: {}]   ;;  %s4536_s3 = inlined_call_operand.vmem [shape: f32[4,2048], index: 3, kind: output, shape index: {}]  }
   0x1   :  { %10 = vsyncpa [#allocation3 + $0x1], 0 }
   0x2   :  { %11 = vsyncpa [#allocation5], 0 }
   0x3   :  { %13 = vsyncpa [#allocation5 + $0x1], 0  ;;  %s3806_s12 = smov 0   ;;  %s3808_s13 = smov 0  }
   0x4   :  { %s3810_s14 = smov 0   ;;  %s3812_s15 = smov 0  }
   0x5 LB: > { %s2339_s16 = sadd.s32 4294967295, %s3781_s15   ;;  %s3826_s17 = sadd.s32 1, %s3781_s15   ;;  %s3781_s15 = sphi %s3812_s15, %s4544_s15   ;;  %s3777_s14 = sphi %s3810_s14, %s4543_s14   ;;  %s3773_s13 = sphi %s3808_s13, %s4542_s13   ;;  %s3769_s12 = sphi %s3806_s12, %s4541_s12  }
   0x6   : > { %s44_s18 = ssub.s32 %s3781_s15, %s3826_s17  ;;  %s47_s19 = sadd.s32 1, %s3777_s14 }
   0x7   : > { %p45_p0 = scmp.eq.s32.totalorder %s44_s18, 0  ;;  %p54_p1 = scmp.ne.s32.totalorder %s3777_s14, %s3773_s13 }
   0x8   : > { %p55_p2 = scmp.eq.s32.totalorder %s3781_s15, 0  ;;  %p60_p3 = scmp.ne.s32.totalorder %s3773_s13, %s3769_s12 }
   0x9   : > { %s3836_s20 = scalar_select %p45_p0, %s3777_s14, %s47_s19  }
   0xa   : > { %p3838_p4 = por %p55_p2, %p54_p1  ;;  %p61_p5 = scmp.eq.s32.totalorder %s2339_s16, 0 }
   0xb   : > { %p3647_p6 = scmp.lt.s32.totalorder %s3781_s15, 4  ;;  %s3850_s23 = sand.u32 1, %s3777_s14  }
   0xc   : > { %p3845_p7 = por %p61_p5, %p60_p3  ;;  %s2343_s24 = sshll.u32 %s3850_s23, 11 }
   0xd   : > { %s3379_s25 = sshll.u32 %s3781_s15, 4  ;;  %s143_s29 = scalar_lea.vmem [#allocation2], %s2343_s24 }
   0xe   : > { %s148_s28 = scalar_lea.hbm %s4534_s1, %s3379_s25  ;;  %s151_s30 = sshll.u32 %s143_s29, 4  ;;  %s152_s30 = int_to_ptr.vmem [resolvable:$true] %s151_s30 }
   0xf   : > { %s149_s4 = sshll.u32 %s148_s28, 4  ;;  %p3859_p8 = pnand %p3647_p6, %p3838_p4  ;;  %s150_s4 = int_to_ptr.hbm [resolvable:$true] %s149_s4 }
  0x10   : > { %s140_s6 = scalar_lea.sflag [#allocation3], %s3850_s23  ;;  %s3683_s7 = sshra.s32 %s150_s4, 4  ;;  %s3684_s7 = int_to_ptr.hbm [resolvable:$true] %s3683_s7 }
  0x11   : > { %s3685_s8 = scalar_lea.hbm %s3684_s7, 2048  ;;  %p3687_p10 = pneg %p3859_p8 }
  0x12   : > { %p3686_p9 = scmp.ne.s32.totalorder %s3684_s7, %s3685_s8  ;;  %s3690_s11 = scalar_lea.hbm %s4534_s1, 8192 }
  0x13   : > { %p3691_p13 = scmp.lt.s32.totalorder %s3684_s7, %s4534_s1  ;;  %p3692_p0 = scmp.lt.s32.totalorder %s3690_s11, %s3685_s8 }
  0x14   : > { %p3688_p11 = pnand %p3687_p10, %p3686_p9 }
  0x15   : > { %p3693_p1 = por %p3692_p0, %p3691_p13 }
  0x16   : > { %p3689_p12 = pneg %p3688_p11 }
  0x18   : > { %p3694_p2 = pnand %p3693_p1, %p3689_p12 }
  0x1a   : > { %3697 = shalt.err (!%p3694_p2)
}
  0x1b   : > { %s3783_s19 = smov 1024   ;;  %s3784_s21 = smov 256  }
  0x1c   : > { %s3785_s24 = smov 16   ;;  %p2348_p3 = scmp.ge.s32.totalorder %s3781_s15, 1 }
  0x1d   : > { %3643 = dma.hbm_to_vmem [thread:$0]  (!%p3859_p8), %s150_s4, 32768, %s152_s30, %s140_s6, %s3783_s19, %s3784_s21, %s3785_s24  }
  0x1e   : > { %p178_p4 = scmp.lt.s32.totalorder %s3781_s15, 5  ;;  %s2346_s25 = sshll.u32 %s3850_s23, 2 }
  0x1f   : > { %s2347_s27 = sshll.u32 %s3781_s15, 2  ;;  %s165_s28 = scalar_lea.vmem [#allocation4], %s2346_s25 }
  0x20   : > { %p3880_p5 = pnand %p2348_p3, %p178_p4  ;;  %s173_s29 = sshll.u32 %s165_s28, 4  ;;  %s174_s29 = int_to_ptr.vmem [resolvable:$true] %s173_s29 }
  0x21   : > { %s169_s9 = scalar_lea.hbm %s4535_s2, %s2347_s27  ;;  %s162_s11 = scalar_lea.sflag [#allocation5], %s3850_s23 }
  0x22   : > { %s171_s10 = sshll.u32 %s169_s9, 4  ;;  %s3720_s18 = scalar_lea.hbm %s4535_s2, 16  ;;  %s172_s10 = int_to_ptr.hbm [resolvable:$true] %s171_s10 }
  0x23   : > { %s3713_s30 = sshra.s32 %s172_s10, 4  ;;  %s3714_s30 = int_to_ptr.hbm [resolvable:$true] %s3713_s30 }
  0x24   : > { %s3715_s4 = scalar_lea.hbm %s3714_s30, 4  ;;  %p3721_p12 = scmp.lt.s32.totalorder %s3714_s30, %s4535_s2 }
  0x25   : > { %p3716_p6 = scmp.ne.s32.totalorder %s3714_s30, %s3715_s4  ;;  %p3722_p13 = scmp.lt.s32.totalorder %s3720_s18, %s3715_s4 }
  0x27   : > { %p3718_p9 = pnand %p3716_p6, %p3687_p10  ;;  %p3723_p0 = por %p3722_p13, %p3721_p12 }
  0x29   : > { %p3719_p11 = pneg %p3718_p9 }
  0x2b   : > { %p3724_p1 = pnand %p3723_p0, %p3719_p11 }
  0x2d   : > { %3727 = shalt.err (!%p3724_p1)
}
  0x2e   : > { %3646 = dma.hbm_to_vmem [thread:$0]  (!%p3859_p8), %s172_s10, 64, %s174_s29, %s162_s11  }
  0x2f   : > { %182 = sbr.rel (%p3880_p5) target bundleno = 459 (0x1cb), region = 32  ;;  %s184_s23 = sand.u32 (!%p3880_p5), 1, %s3773_s13  }
  0x30   : > { %s2349_s24 = sshll.u32 (!%p3880_p5), %s184_s23, 11  ;;  %s185_s25 = scalar_lea.sflag (!%p3880_p5), [#allocation3], %s184_s23 }
  0x31   : > { %s3903_s27 = scalar_lea.vmem (!%p3880_p5), [#allocation2], %s2349_s24 }
  0x34   : > { %3760 = dma.done.wait (%p3845_p7), %s185_s25, 32768  }
  0x35   : > { %3762 = vsyncadd (%p3845_p7), %s185_s25, 4294934528  ;;  %s2350_s28 = sshll.u32 %s184_s23, 2  ;;  %s195_s7 = scalar_lea.sflag [#allocation5], %s184_s23 }
  0x36   : > { %s3909_s5 = scalar_lea.vmem [#allocation4], %s2350_s28 }
  0x37   : > { %3764 = dma.done.wait (%p3845_p7), %s195_s7, 64  }
  0x38   : > { %3766 = vsyncadd (%p3845_p7), %s195_s7, 4294967232  ;;  %v2467_v0 = vld [vmem:[%s3903_s27 + $0xe0] sm:$0xf]  ;;  %v3410_v1 = vld [vmem:[%s3903_s27 + $0xec] sm:$0xf0]  ;;  %s2351_s4 = sshll.u32 %s2339_s16, 2 }
  0x39   : > { %v2595_v2 = vld [vmem:[%s3903_s27 + $0x1e0] sm:$0xf]  ;;  %v2468_v3 = vor.u32 %v3410_v1, %v2467_v0  ;;  %v3442_v4 = vld [vmem:[%s3903_s27 + $0x1ec] sm:$0xf0]  ;;  %p230_p7 = scmp.lt.s32.totalorder %s2351_s4, 15  ;;  %vm2242_vm0 = vcmask 1043456  }
  0x3a   : > { %v2723_v5 = vld [vmem:[%s3903_s27 + $0x2e0] sm:$0xf]  ;;  %v3474_v6 = vld [vmem:[%s3903_s27 + $0x2ec] sm:$0xf0]  ;;  %v2596_v7 = vor.u32 %v3442_v4, %v2595_v2 }
  0x3b   : > { %v2724_v8 = vor.u32 %v3474_v6, %v2723_v5  ;;  %v2851_v9 = vld [vmem:[%s3903_s27 + $0x3e0] sm:$0xf]  ;;  %v3506_v10 = vld [vmem:[%s3903_s27 + $0x3ec] sm:$0xf0]  ;;  %1820 = vmatpush.bf16.msra.mxu0 %v2468_v3  ;;  %s4546_s4 = smov (!%p230_p7, %s2351_s4), 15 }
  0x3c   : > { %v2451_v11 = vld [vmem:[%s3903_s27 + $0xc0] sm:$0xf]  ;;  %v2852_v12 = vor.u32 %v3506_v10, %v2851_v9  ;;  %v3406_v13 = vld [vmem:[%s3903_s27 + $0xcc] sm:$0xf0]  ;;  %1833 = vmatpush.bf16.msra.mxu1 %v2596_v7  ;;  %s2352_s6 = sshll.u32 %s4546_s4, 2 }
  0x3d   : > { %v2579_v14 = vld [vmem:[%s3903_s27 + $0x1c0] sm:$0xf]  ;;  %v3438_v15 = vld [vmem:[%s3903_s27 + $0x1cc] sm:$0xf0]  ;;  %1846 = vmatpush.bf16.msra.mxu2 %v2724_v8  ;;  %v2452_v16 = vor.u32 %v3406_v13, %v2451_v11  ;;  %s4512_s12 = scalar_lea.vmem %s4536_s3, %s2352_s6 }
  0x3e   : > { %v2580_v17 = vor.u32 %v3438_v15, %v2579_v14  ;;  %v2707_v18 = vld [vmem:[%s3903_s27 + $0x2c0] sm:$0xf]  ;;  %v3470_v19 = vld [vmem:[%s3903_s27 + $0x2cc] sm:$0xf0]  ;;  %1859 = vmatpush.bf16.msra.mxu3 %v2852_v12 }
  0x3f   : > { %v2835_v20 = vld [vmem:[%s3903_s27 + $0x3c0] sm:$0xf]  ;;  %v2708_v21 = vor.u32 %v3470_v19, %v2707_v18  ;;  %v3502_v22 = vld [vmem:[%s3903_s27 + $0x3cc] sm:$0xf0]  ;;  %1821 = vmatpush.bf16.msra.mxu0 %v2452_v16 }
  0x40   : > { %v2435_v23 = vld [vmem:[%s3903_s27 + $0xa0] sm:$0xf]  ;;  %v3402_v24 = vld [vmem:[%s3903_s27 + $0xac] sm:$0xf0]  ;;  %v2836_v25 = vor.u32 %v3502_v22, %v2835_v20  ;;  %1834 = vmatpush.bf16.msra.mxu1 %v2580_v17 }
  0x41   : > { %v2563_v26 = vld [vmem:[%s3903_s27 + $0x1a0] sm:$0xf]  ;;  %v3434_v27 = vld [vmem:[%s3903_s27 + $0x1ac] sm:$0xf0]  ;;  %v2436_v29 = vor.u32 %v3402_v24, %v2435_v23  ;;  %1847 = vmatpush.bf16.msra.mxu2 %v2708_v21 }
  0x42   : > { %v2691_v28 = vld [vmem:[%s3903_s27 + $0x2a0] sm:$0xf]  ;;  %v3466_v30 = vld [vmem:[%s3903_s27 + $0x2ac] sm:$0xf0]  ;;  %v2564_v33 = vor.u32 %v3434_v27, %v2563_v26  ;;  %1860 = vmatpush.bf16.msra.mxu3 %v2836_v25 }
  0x43   : > { %v2819_v31 = vld [vmem:[%s3903_s27 + $0x3a0] sm:$0xf]  ;;  %v3498_v32 = vld [vmem:[%s3903_s27 + $0x3ac] sm:$0xf0]  ;;  %v2692_v34 = vor.u32 %v3466_v30, %v2691_v28  ;;  %1822 = vmatpush.bf16.msra.mxu0 %v2436_v29 }
  0x44   : > { %v2419_v35 = vld [vmem:[%s3903_s27 + $0x80] sm:$0xf]  ;;  %v3398_v36 = vld [vmem:[%s3903_s27 + $0x8c] sm:$0xf0]  ;;  %v2820_v38 = vor.u32 %v3498_v32, %v2819_v31  ;;  %1835 = vmatpush.bf16.msra.mxu1 %v2564_v33 }
  0x45   : > { %v2547_v37 = vld [vmem:[%s3903_s27 + $0x180] sm:$0xf]  ;;  %v3430_v39 = vld [vmem:[%s3903_s27 + $0x18c] sm:$0xf0]  ;;  %v2420_v44 = vor.u32 %v3398_v36, %v2419_v35  ;;  %1848 = vmatpush.bf16.msra.mxu2 %v2692_v34 }
  0x46   : > { %v2675_v40 = vld [vmem:[%s3903_s27 + $0x280] sm:$0xf]  ;;  %v3462_v41 = vld [vmem:[%s3903_s27 + $0x28c] sm:$0xf0]  ;;  %v2548_v45 = vor.u32 %v3430_v39, %v2547_v37  ;;  %1861 = vmatpush.bf16.msra.mxu3 %v2820_v38 }
  0x47   : > { %v2803_v42 = vld [vmem:[%s3903_s27 + $0x380] sm:$0xf]  ;;  %v3494_v43 = vld [vmem:[%s3903_s27 + $0x38c] sm:$0xf0]  ;;  %v2676_v46 = vor.u32 %v3462_v41, %v2675_v40  ;;  %1823 = vmatpush.bf16.msra.mxu0 %v2420_v44 }
  0x48   : > { %v2403_v47 = vld [vmem:[%s3903_s27 + $0x60] sm:$0xf]  ;;  %v3394_v48 = vld [vmem:[%s3903_s27 + $0x6c] sm:$0xf0]  ;;  %v2804_v50 = vor.u32 %v3494_v43, %v2803_v42  ;;  %1836 = vmatpush.bf16.msra.mxu1 %v2548_v45 }
  0x49   : > { %v2531_v49 = vld [vmem:[%s3903_s27 + $0x160] sm:$0xf]  ;;  %v3426_v51 = vld [vmem:[%s3903_s27 + $0x16c] sm:$0xf0]  ;;  %v2404_v56 = vor.u32 %v3394_v48, %v2403_v47  ;;  %1849 = vmatpush.bf16.msra.mxu2 %v2676_v46 }
  0x4a   : > { %v2659_v52 = vld [vmem:[%s3903_s27 + $0x260] sm:$0xf]  ;;  %v3458_v53 = vld [vmem:[%s3903_s27 + $0x26c] sm:$0xf0]  ;;  %v2532_v57 = vor.u32 %v3426_v51, %v2531_v49  ;;  %1862 = vmatpush.bf16.msra.mxu3 %v2804_v50 }
  0x4b   : > { %v2787_v54 = vld [vmem:[%s3903_s27 + $0x360] sm:$0xf]  ;;  %v3490_v55 = vld [vmem:[%s3903_s27 + $0x36c] sm:$0xf0]  ;;  %v2660_v58 = vor.u32 %v3458_v53, %v2659_v52  ;;  %1824 = vmatpush.bf16.msra.mxu0 %v2404_v56 }
  0x4c   : > { %v2387_v59 = vld [vmem:[%s3903_s27 + $0x40] sm:$0xf]  ;;  %v3390_v60 = vld [vmem:[%s3903_s27 + $0x4c] sm:$0xf0]  ;;  %v2788_v62 = vor.u32 %v3490_v55, %v2787_v54  ;;  %1837 = vmatpush.bf16.msra.mxu1 %v2532_v57 }
  0x4d   : > { %v2515_v61 = vld [vmem:[%s3903_s27 + $0x140] sm:$0xf]  ;;  %v3422_v63 = vld [vmem:[%s3903_s27 + $0x14c] sm:$0xf0]  ;;  %v2388_v4 = vor.u32 %v3390_v60, %v2387_v59  ;;  %1850 = vmatpush.bf16.msra.mxu2 %v2660_v58 }
  0x4e   : > { %v2643_v0 = vld [vmem:[%s3903_s27 + $0x240] sm:$0xf]  ;;  %v3454_v1 = vld [vmem:[%s3903_s27 + $0x24c] sm:$0xf0]  ;;  %v2516_v5 = vor.u32 %v3422_v63, %v2515_v61  ;;  %1863 = vmatpush.bf16.msra.mxu3 %v2788_v62 }
  0x4f   : > { %v2771_v2 = vld [vmem:[%s3903_s27 + $0x340] sm:$0xf]  ;;  %v3486_v3 = vld [vmem:[%s3903_s27 + $0x34c] sm:$0xf0]  ;;  %v2644_v6 = vor.u32 %v3454_v1, %v2643_v0  ;;  %1825 = vmatpush.bf16.msra.mxu0 %v2388_v4 }
  0x50   : > { %v2371_v7 = vld [vmem:[%s3903_s27 + $0x20] sm:$0xf]  ;;  %v3386_v8 = vld [vmem:[%s3903_s27 + $0x2c] sm:$0xf0]  ;;  %v2772_v10 = vor.u32 %v3486_v3, %v2771_v2  ;;  %1838 = vmatpush.bf16.msra.mxu1 %v2516_v5 }
  0x51   : > { %v2499_v9 = vld [vmem:[%s3903_s27 + $0x120] sm:$0xf]  ;;  %v3418_v11 = vld [vmem:[%s3903_s27 + $0x12c] sm:$0xf0]  ;;  %v2372_v16 = vor.u32 %v3386_v8, %v2371_v7  ;;  %1851 = vmatpush.bf16.msra.mxu2 %v2644_v6  ;;  %v235_v8 = vld [vmem:[%s4533_s0] sm:$0xff] }
  0x52   : > { %v2627_v12 = vld [vmem:[%s3903_s27 + $0x220] sm:$0xf]  ;;  %v3450_v13 = vld [vmem:[%s3903_s27 + $0x22c] sm:$0xf0]  ;;  %v2500_v19 = vor.u32 %v3418_v11, %v2499_v9  ;;  %1864 = vmatpush.bf16.msra.mxu3 %v2772_v10  ;;  %243 = vst [vmem:[#allocation1] ss:$2 sm:$0xff] %v235_v8 }
  0x53   : > { %v2755_v14 = vld [vmem:[%s3903_s27 + $0x320] sm:$0xf]  ;;  %v3482_v15 = vld [vmem:[%s3903_s27 + $0x32c] sm:$0xf0]  ;;  %v2628_v20 = vor.u32 %v3450_v13, %v2627_v12  ;;  %1826 = vmatpush.bf16.msra.mxu0 %v2372_v16  ;;  %v3408_v8 = vld [vmem:[%s3903_s27 + $0xe4] sm:$0xf] }
  0x54   : > { %v2355_v17 = vld [vmem:[%s3903_s27] sm:$0xf]  ;;  %v3382_v18 = vld [vmem:[%s3903_s27 + $0xc] sm:$0xf0]  ;;  %v2756_v24 = vor.u32 %v3482_v15, %v2755_v14  ;;  %1839 = vmatpush.bf16.msra.mxu1 %v2500_v19 }
  0x55   : > { %v2483_v21 = vld [vmem:[%s3903_s27 + $0x100] sm:$0xf]  ;;  %v3414_v22 = vld [vmem:[%s3903_s27 + $0x10c] sm:$0xf0]  ;;  %v2356_v31 = vor.u32 %v3382_v18, %v2355_v17  ;;  %1852 = vmatpush.bf16.msra.mxu2 %v2628_v20 }
  0x56   : > { %v2611_v23 = vld [vmem:[%s3903_s27 + $0x200] sm:$0xf]  ;;  %v3446_v25 = vld [vmem:[%s3903_s27 + $0x20c] sm:$0xf0]  ;;  %v2484_v35 = vor.u32 %v3414_v22, %v2483_v21  ;;  %1865 = vmatpush.bf16.msra.mxu3 %v2756_v24 }
  0x57   : > { %v2739_v26 = vld [vmem:[%s3903_s27 + $0x300] sm:$0xf]  ;;  %v3478_v27 = vld [vmem:[%s3903_s27 + $0x30c] sm:$0xf0]  ;;  %v2612_v36 = vor.u32 %v3446_v25, %v2611_v23  ;;  %1827 = vmatpush.bf16.msra.mxu0 %v2356_v31 }
  0x58   : > { %v2979_v28 = vld [vmem:[%s3903_s27 + $0x4e0] sm:$0xf]  ;;  %v3538_v29 = vld [vmem:[%s3903_s27 + $0x4ec] sm:$0xf0]  ;;  %v2740_v39 = vor.u32 %v3478_v27, %v2739_v26  ;;  %1840 = vmatpush.bf16.msra.mxu1 %v2484_v35 }
  0x59   : > { %v3107_v30 = vld [vmem:[%s3903_s27 + $0x5e0] sm:$0xf]  ;;  %v3570_v32 = vld [vmem:[%s3903_s27 + $0x5ec] sm:$0xf0]  ;;  %v2980_v40 = vor.u32 %v3538_v29, %v2979_v28  ;;  %1853 = vmatpush.bf16.msra.mxu2 %v2612_v36 }
  0x5a   : > { %v3235_v33 = vld [vmem:[%s3903_s27 + $0x6e0] sm:$0xf]  ;;  %v3602_v34 = vld [vmem:[%s3903_s27 + $0x6ec] sm:$0xf0]  ;;  %v3108_v41 = vor.u32 %v3570_v32, %v3107_v30  ;;  %1866 = vmatpush.bf16.msra.mxu3 %v2740_v39 }
  0x5b   : > { %v3363_v37 = vld [vmem:[%s3903_s27 + $0x7e0] sm:$0xf]  ;;  %v3634_v38 = vld [vmem:[%s3903_s27 + $0x7ec] sm:$0xf0]  ;;  %v3236_v42 = vor.u32 %v3602_v34, %v3235_v33  ;;  %1872 = vmatpush.bf16.msrb.mxu0 %v2980_v40 }
  0x5c   : > { %v2963_v43 = vld [vmem:[%s3903_s27 + $0x4c0] sm:$0xf]  ;;  %v3534_v44 = vld [vmem:[%s3903_s27 + $0x4cc] sm:$0xf0]  ;;  %v3364_v46 = vor.u32 %v3634_v38, %v3363_v37  ;;  %1885 = vmatpush.bf16.msrb.mxu1 %v3108_v41 }
  0x5d   : > { %v3091_v45 = vld [vmem:[%s3903_s27 + $0x5c0] sm:$0xf]  ;;  %v3566_v47 = vld [vmem:[%s3903_s27 + $0x5cc] sm:$0xf0]  ;;  %v2964_v52 = vor.u32 %v3534_v44, %v2963_v43  ;;  %1898 = vmatpush.bf16.msrb.mxu2 %v3236_v42 }
  0x5e   : > { %v3219_v48 = vld [vmem:[%s3903_s27 + $0x6c0] sm:$0xf]  ;;  %v3598_v49 = vld [vmem:[%s3903_s27 + $0x6cc] sm:$0xf0]  ;;  %v3092_v55 = vor.u32 %v3566_v47, %v3091_v45  ;;  %1911 = vmatpush.bf16.msrb.mxu3 %v3364_v46 }
  0x5f   : > { %v3347_v50 = vld [vmem:[%s3903_s27 + $0x7c0] sm:$0xf]  ;;  %v3630_v51 = vld [vmem:[%s3903_s27 + $0x7cc] sm:$0xf0]  ;;  %v3220_v56 = vor.u32 %v3598_v49, %v3219_v48  ;;  %1873 = vmatpush.bf16.msrb.mxu0 %v2964_v52 }
  0x60   : > { %v2947_v53 = vld [vmem:[%s3903_s27 + $0x4a0] sm:$0xf]  ;;  %v3530_v54 = vld [vmem:[%s3903_s27 + $0x4ac] sm:$0xf0]  ;;  %v3348_v60 = vor.u32 %v3630_v51, %v3347_v50  ;;  %1886 = vmatpush.bf16.msrb.mxu1 %v3092_v55 }
  0x61   : > { %v3075_v57 = vld [vmem:[%s3903_s27 + $0x5a0] sm:$0xf]  ;;  %v3562_v58 = vld [vmem:[%s3903_s27 + $0x5ac] sm:$0xf0]  ;;  %v2948_v1 = vor.u32 %v3530_v54, %v2947_v53  ;;  %1899 = vmatpush.bf16.msrb.mxu2 %v3220_v56 }
  0x62   : > { %v236_v59 = vld [vmem:[%s4533_s0 + $0x8] sm:$0xff]  ;;  %v3594_v62 = vld [vmem:[%s3903_s27 + $0x6ac] sm:$0xf0]  ;;  %v3076_v4 = vor.u32 %v3562_v58, %v3075_v57  ;;  %1912 = vmatpush.bf16.msrb.mxu3 %v3348_v60  ;;  %v250_v36 = vld.sshfl [vmem:[#allocation1] sm:$0xff pattern:$0x75316420] }
  0x63   : > { %v3203_v61 = vld [vmem:[%s3903_s27 + $0x6a0] sm:$0xf]  ;;  %245 = vst [vmem:[#allocation1 + $0x10] ss:$2 sm:$0xff] %v236_v59  ;;  %v3626_v0 = vld [vmem:[%s3903_s27 + $0x7ac] sm:$0xf0]  ;;  %1874 = vmatpush.bf16.msrb.mxu0 %v2948_v1  ;;  %v4036_v42 = vpack.c.bf16 %v250_v36, %v250_v36 }
  0x64   : > { %v3331_v63 = vld [vmem:[%s3903_s27 + $0x7a0] sm:$0xf]  ;;  %v3526_v3 = vld [vmem:[%s3903_s27 + $0x48c] sm:$0xf0]  ;;  %v3204_v5 = vor.u32 %v3594_v62, %v3203_v61  ;;  %1887 = vmatpush.bf16.msrb.mxu1 %v3076_v4  ;;  %v237_v58 = vld [vmem:[%s4533_s0 + $0x10] sm:$0xff] }
  0x65   : > { %v2931_v2 = vld [vmem:[%s3903_s27 + $0x480] sm:$0xf]  ;;  %v3558_v7 = vld [vmem:[%s3903_s27 + $0x58c] sm:$0xf0]  ;;  %v3332_v9 = vor.u32 %v3626_v0, %v3331_v63  ;;  %1828 = vmatmul.bf16.vlgmr.msra.gmra.mxu0 %v4036_v42  ;;  %247 = vst [vmem:[#allocation1 + $0x20] ss:$2 sm:$0xff] %v237_v58 }
  0x66   : > { %v3059_v6 = vld [vmem:[%s3903_s27 + $0x580] sm:$0xf]  ;;  %v3590_v11 = vld [vmem:[%s3903_s27 + $0x68c] sm:$0xf0]  ;;  %v2932_v14 = vor.u32 %v3526_v3, %v2931_v2  ;;  %1900 = vmatpush.bf16.msrb.mxu2 %v3204_v5 }
  0x67   : > { %v3187_v10 = vld [vmem:[%s3903_s27 + $0x680] sm:$0xf]  ;;  %v3622_v13 = vld [vmem:[%s3903_s27 + $0x78c] sm:$0xf0]  ;;  %v3060_v18 = vor.u32 %v3558_v7, %v3059_v6  ;;  %1913 = vmatpush.bf16.msrb.mxu3 %v3332_v9  ;;  %v2469_v9 = vld [vmem:[%s3903_s27 + $0xf0] sm:$0xf0] }
  0x68   : > { %v3315_v12 = vld [vmem:[%s3903_s27 + $0x780] sm:$0xf]  ;;  %v3522_v16 = vld [vmem:[%s3903_s27 + $0x46c] sm:$0xf0]  ;;  %v3188_v19 = vor.u32 %v3590_v11, %v3187_v10  ;;  %1875 = vmatpush.bf16.msrb.mxu0 %v2932_v14  ;;  %v3440_v10 = vld [vmem:[%s3903_s27 + $0x1e4] sm:$0xf] }
  0x69   : > { %v2915_v15 = vld [vmem:[%s3903_s27 + $0x460] sm:$0xf]  ;;  %v3316_v22 = vor.u32 %v3622_v13, %v3315_v12  ;;  %v3554_v23 = vld [vmem:[%s3903_s27 + $0x56c] sm:$0xf0]  ;;  %1888 = vmatpush.bf16.msrb.mxu1 %v3060_v18  ;;  %v2597_v11 = vld [vmem:[%s3903_s27 + $0x1f0] sm:$0xf0] }
  0x6a   : > { %v3043_v17 = vld [vmem:[%s3903_s27 + $0x560] sm:$0xf]  ;;  %v252_v20 = vld.sshfl [vmem:[#allocation1 + $0x10] sm:$0xff pattern:$0x75316420]  ;;  %v2916_v30 = vor.u32 %v3522_v16, %v2915_v15  ;;  %1901 = vmatpush.bf16.msrb.mxu2 %v3188_v19  ;;  %v238_v57 = vld [vmem:[%s4533_s0 + $0x18] sm:$0xff] }
  0x6b   : > { %v253_v21 = vld.sshfl [vmem:[#allocation1 + $0x18] sm:$0xff pattern:$0x75316420]  ;;  %v3171_v24 = vld [vmem:[%s3903_s27 + $0x660] sm:$0xf]  ;;  %v4023_v26 = vpack.c.bf16 %v252_v20, %v252_v20  ;;  %v3044_v34 = vor.u32 %v3554_v23, %v3043_v17  ;;  %1914 = vmatpush.bf16.msrb.mxu3 %v3316_v22  ;;  %v2472_v22 = vor.u32 %v3408_v8, %v2469_v9 }
  0x6c   : > { %v3586_v25 = vld [vmem:[%s3903_s27 + $0x66c] sm:$0xf0]  ;;  %v3299_v27 = vld [vmem:[%s3903_s27 + $0x760] sm:$0xf]  ;;  %v4027_v29 = vpack.c.bf16 %v253_v21, %v253_v21  ;;  %1876 = vmatpush.bf16.msrb.mxu0 %v2916_v30  ;;  %249 = vst [vmem:[#allocation1 + $0x30] ss:$2 sm:$0xff] %v238_v57 }
  0x6d   : > { %v3618_v28 = vld [vmem:[%s3903_s27 + $0x76c] sm:$0xf0]  ;;  %1854 = vmatmul.bf16.vlgmr.msra.gmra.mxu2 %v4023_v26  ;;  %v2899_v31 = vld [vmem:[%s3903_s27 + $0x440] sm:$0xf]  ;;  %v3172_v35 = vor.u32 %v3586_v25, %v3171_v24  ;;  %1889 = vmatpush.bf16.msrb.mxu1 %v3044_v34  ;;  %v3472_v13 = vld [vmem:[%s3903_s27 + $0x2e4] sm:$0xf] }
  0x6e   : > { %v3518_v32 = vld [vmem:[%s3903_s27 + $0x44c] sm:$0xf0]  ;;  %v3027_v33 = vld [vmem:[%s3903_s27 + $0x540] sm:$0xf]  ;;  %v3300_v38 = vor.u32 %v3618_v28, %v3299_v27  ;;  %1867 = vmatmul.bf16.vlgmr.msra.gmra.mxu3 %v4027_v29  ;;  %v2725_v14 = vld [vmem:[%s3903_s27 + $0x2f0] sm:$0xf0]  ;;  %v2600_v27 = vor.u32 %v3440_v10, %v2597_v11 }
  0x6f   : > { %v251_v37 = vld.sshfl [vmem:[#allocation1 + $0x8] sm:$0xff pattern:$0x75316420]  ;;  %v3550_v39 = vld [vmem:[%s3903_s27 + $0x54c] sm:$0xf0]  ;;  %v2900_v46 = vor.u32 %v3518_v32, %v2899_v31  ;;  %1902 = vmatpush.bf16.msrb.mxu2 %v3172_v35  ;;  %v2728_v28 = vor.u32 %v3472_v13, %v2725_v14 }
  0x70   : > { %v3155_v40 = vld [vmem:[%s3903_s27 + $0x640] sm:$0xf]  ;;  %v3582_v41 = vld [vmem:[%s3903_s27 + $0x64c] sm:$0xf0]  ;;  %v4038_v43 = vpack.c.bf16 %v251_v37, %v251_v37  ;;  %v3028_v50 = vor.u32 %v3550_v39, %v3027_v33  ;;  %1915 = vmatpush.bf16.msrb.mxu3 %v3300_v38  ;;  %v3504_v15 = vld [vmem:[%s3903_s27 + $0x3e4] sm:$0xf] }
  0x71   : > { %v3283_v44 = vld [vmem:[%s3903_s27 + $0x740] sm:$0xf]  ;;  %v3614_v45 = vld [vmem:[%s3903_s27 + $0x74c] sm:$0xf0]  ;;  %v3156_v51 = vor.u32 %v3582_v41, %v3155_v40  ;;  %1877 = vmatpush.bf16.msrb.mxu0 %v2900_v46  ;;  %v2853_v18 = vld [vmem:[%s3903_s27 + $0x3f0] sm:$0xf0] }
  0x72   : > { %1841 = vmatmul.bf16.vlgmr.msra.gmra.mxu1 %v4038_v43  ;;  %v2883_v47 = vld [vmem:[%s3903_s27 + $0x420] sm:$0xf]  ;;  %v3514_v48 = vld [vmem:[%s3903_s27 + $0x42c] sm:$0xf0]  ;;  %v3284_v55 = vor.u32 %v3614_v45, %v3283_v44  ;;  %v3404_v19 = vld [vmem:[%s3903_s27 + $0xc4] sm:$0xf]  ;;  %v2856_v32 = vor.u32 %v3504_v15, %v2853_v18 }
  0x73   : > { %v3011_v49 = vld [vmem:[%s3903_s27 + $0x520] sm:$0xf]  ;;  %v3546_v52 = vld [vmem:[%s3903_s27 + $0x52c] sm:$0xf0]  ;;  %v2884_v61 = vor.u32 %v3514_v48, %v2883_v47  ;;  %1890 = vmatpush.bf16.msrb.mxu1 %v3028_v50  ;;  %1903 = vmatpush.bf16.msrb.mxu2 %v3156_v51  ;;  %v2453_v20 = vld [vmem:[%s3903_s27 + $0xd0] sm:$0xf0] }
  0x74   : > { %v3139_v53 = vld [vmem:[%s3903_s27 + $0x620] sm:$0xf]  ;;  %v3578_v54 = vld [vmem:[%s3903_s27 + $0x62c] sm:$0xf0]  ;;  %v3012_v0 = vor.u32 %v3546_v52, %v3011_v49  ;;  %1916 = vmatpush.bf16.msrb.mxu3 %v3284_v55  ;;  %v3436_v23 = vld [vmem:[%s3903_s27 + $0x1c4] sm:$0xf]  ;;  %v2456_v41 = vor.u32 %v3404_v19, %v2453_v20 }
  0x75   : > { %v3267_v56 = vld [vmem:[%s3903_s27 + $0x720] sm:$0xf]  ;;  %v3610_v59 = vld [vmem:[%s3903_s27 + $0x72c] sm:$0xf0]  ;;  %v3140_v1 = vor.u32 %v3578_v54, %v3139_v53  ;;  %1878 = vmatpush.bf16.msrb.mxu0 %v2884_v61  ;;  %v2581_v30 = vld [vmem:[%s3903_s27 + $0x1d0] sm:$0xf0] }
  0x76   : > { %v2867_v60 = vld [vmem:[%s3903_s27 + $0x400] sm:$0xf]  ;;  %v3510_v62 = vld [vmem:[%s3903_s27 + $0x40c] sm:$0xf0]  ;;  %v3268_v5 = vor.u32 %v3610_v59, %v3267_v56  ;;  %v3468_v33 = vld [vmem:[%s3903_s27 + $0x2c4] sm:$0xf]  ;;  %v2584_v44 = vor.u32 %v3436_v23, %v2581_v30 }
  0x77   : > { %v2995_v63 = vld [vmem:[%s3903_s27 + $0x500] sm:$0xf]  ;;  %v3542_v2 = vld [vmem:[%s3903_s27 + $0x50c] sm:$0xf0]  ;;  %v2868_v12 = vor.u32 %v3510_v62, %v2867_v60  ;;  %1891 = vmatpush.bf16.msrb.mxu1 %v3012_v0  ;;  %1904 = vmatpush.bf16.msrb.mxu2 %v3140_v1  ;;  %v2709_v34 = vld [vmem:[%s3903_s27 + $0x2d0] sm:$0xf0] }
  0x78   : > { %v3123_v3 = vld [vmem:[%s3903_s27 + $0x600] sm:$0xf]  ;;  %v3574_v4 = vld [vmem:[%s3903_s27 + $0x60c] sm:$0xf0]  ;;  %v2996_v16 = vor.u32 %v3542_v2, %v2995_v63  ;;  %1917 = vmatpush.bf16.msrb.mxu3 %v3268_v5  ;;  %v3500_v35 = vld [vmem:[%s3903_s27 + $0x3c4] sm:$0xf]  ;;  %v2712_v45 = vor.u32 %v3468_v33, %v2709_v34 }
  0x79   : > { %v3251_v6 = vld [vmem:[%s3903_s27 + $0x700] sm:$0xf]  ;;  %v3606_v7 = vld [vmem:[%s3903_s27 + $0x70c] sm:$0xf0]  ;;  %v3124_v17 = vor.u32 %v3574_v4, %v3123_v3  ;;  %1879 = vmatpush.bf16.msrb.mxu0 %v2868_v12  ;;  %v2837_v37 = vld [vmem:[%s3903_s27 + $0x3d0] sm:$0xf0] }
  0x7a   : > { %v3252_v21 = vor.u32 %v3606_v7, %v3251_v6  ;;  %v256_v24 = vld.sshfl [vmem:[#allocation1 + $0x30] sm:$0xff pattern:$0x75316420]  ;;  %v257_v25 = vld.sshfl [vmem:[#allocation1 + $0x38] sm:$0xff pattern:$0x75316420]  ;;  %v2840_v49 = vor.u32 %v3500_v35, %v2837_v37 }
  0x7b   : > { %v255_v31 = vld.sshfl [vmem:[#allocation1 + $0x28] sm:$0xff pattern:$0x75316420]  ;;  %v4082_v36 = vpack.c.bf16 %v256_v24, %v256_v24  ;;  %1892 = vmatpush.bf16.msrb.mxu1 %v2996_v16  ;;  %1905 = vmatpush.bf16.msrb.mxu2 %v3124_v17  ;;  %v254_v38 = vld.sshfl [vmem:[#allocation1 + $0x20] sm:$0xff pattern:$0x75316420]  ;;  %v4085_v39 = vpack.c.bf16 %v257_v25, %v257_v25 }
  0x7c   : > { %v4087_v40 = vpack.c.bf16 %v255_v31, %v255_v31  ;;  %1918 = vmatpush.bf16.msrb.mxu3 %v3252_v21  ;;  %v3400_v46 = vld [vmem:[%s3903_s27 + $0xa4] sm:$0xf]  ;;  %v2437_v47 = vld [vmem:[%s3903_s27 + $0xb0] sm:$0xf0]  ;;  %v4093_v50 = vpack.c.bf16 %v254_v38, %v254_v38 }
  0x7d   : > { %1924 = vmatpush.bf16.msra.mxu0 %v2472_v22  ;;  %v3432_v48 = vld [vmem:[%s3903_s27 + $0x1a4] sm:$0xf]  ;;  %v2565_v51 = vld [vmem:[%s3903_s27 + $0x1b0] sm:$0xf0]  ;;  %v2440_v56 = vor.u32 %v3400_v46, %v2437_v47 }
  0x7e   : > { %1906 = vmatmul.bf16.vlgmr.msrb.gmra.mxu2 %v4082_v36  ;;  %v3464_v52 = vld [vmem:[%s3903_s27 + $0x2a4] sm:$0xf]  ;;  %v2693_v53 = vld [vmem:[%s3903_s27 + $0x2b0] sm:$0xf0]  ;;  %v2568_v57 = vor.u32 %v3432_v48, %v2565_v51  ;;  %1880 = vmatmul.bf16.vlgmr.msrb.gmra.mxu0 %v4093_v50 }
  0x7f   : > { %1937 = vmatpush.bf16.msra.mxu1 %v2600_v27  ;;  %1950 = vmatpush.bf16.msra.mxu2 %v2728_v28  ;;  %v3496_v54 = vld [vmem:[%s3903_s27 + $0x3a4] sm:$0xf]  ;;  %v2821_v55 = vld [vmem:[%s3903_s27 + $0x3b0] sm:$0xf0]  ;;  %v2696_v58 = vor.u32 %v3464_v52, %v2693_v53 }
  0x80   : > { %1963 = vmatpush.bf16.msra.mxu3 %v2856_v32  ;;  %v3396_v59 = vld [vmem:[%s3903_s27 + $0x84] sm:$0xf]  ;;  %v2421_v60 = vld [vmem:[%s3903_s27 + $0x90] sm:$0xf0]  ;;  %v2824_v62 = vor.u32 %v3496_v54, %v2821_v55 }
  0x81   : > { %1919 = vmatmul.bf16.vlgmr.msrb.gmra.mxu3 %v4085_v39  ;;  %1925 = vmatpush.bf16.msra.mxu0 %v2456_v41  ;;  %v3428_v61 = vld [vmem:[%s3903_s27 + $0x184] sm:$0xf]  ;;  %v2549_v63 = vld [vmem:[%s3903_s27 + $0x190] sm:$0xf0]  ;;  %v2424_v4 = vor.u32 %v3396_v59, %v2421_v60 }
  0x82   : > { %1893 = vmatmul.bf16.vlgmr.msrb.gmra.mxu1 %v4087_v40  ;;  %v3460_v0 = vld [vmem:[%s3903_s27 + $0x284] sm:$0xf]  ;;  %v2677_v1 = vld [vmem:[%s3903_s27 + $0x290] sm:$0xf0]  ;;  %v2552_v5 = vor.u32 %v3428_v61, %v2549_v63 }
  0x83   : > { %1938 = vmatpush.bf16.msra.mxu1 %v2584_v44  ;;  %1951 = vmatpush.bf16.msra.mxu2 %v2712_v45  ;;  %v3492_v2 = vld [vmem:[%s3903_s27 + $0x384] sm:$0xf]  ;;  %v2805_v3 = vld [vmem:[%s3903_s27 + $0x390] sm:$0xf0]  ;;  %v2680_v6 = vor.u32 %v3460_v0, %v2677_v1 }
  0x84   : > { %1964 = vmatpush.bf16.msra.mxu3 %v2840_v49  ;;  %v3392_v7 = vld [vmem:[%s3903_s27 + $0x64] sm:$0xf]  ;;  %v2405_v8 = vld [vmem:[%s3903_s27 + $0x70] sm:$0xf0]  ;;  %v2808_v10 = vor.u32 %v3492_v2, %v2805_v3 }
  0x85   : > { %1926 = vmatpush.bf16.msra.mxu0 %v2440_v56  ;;  %v3424_v9 = vld [vmem:[%s3903_s27 + $0x164] sm:$0xf]  ;;  %v2533_v11 = vld [vmem:[%s3903_s27 + $0x170] sm:$0xf0]  ;;  %v2408_v16 = vor.u32 %v3392_v7, %v2405_v8 }
  0x86   : > { %v3456_v12 = vld [vmem:[%s3903_s27 + $0x264] sm:$0xf]  ;;  %v2661_v13 = vld [vmem:[%s3903_s27 + $0x270] sm:$0xf0]  ;;  %v2536_v17 = vor.u32 %v3424_v9, %v2533_v11 }
  0x87   : > { %1939 = vmatpush.bf16.msra.mxu1 %v2568_v57  ;;  %1952 = vmatpush.bf16.msra.mxu2 %v2696_v58  ;;  %v3488_v14 = vld [vmem:[%s3903_s27 + $0x364] sm:$0xf]  ;;  %v2789_v15 = vld [vmem:[%s3903_s27 + $0x370] sm:$0xf0]  ;;  %v2664_v18 = vor.u32 %v3456_v12, %v2661_v13 }
  0x88   : > { %1965 = vmatpush.bf16.msra.mxu3 %v2824_v62  ;;  %v3388_v19 = vld [vmem:[%s3903_s27 + $0x44] sm:$0xf]  ;;  %v2389_v20 = vld [vmem:[%s3903_s27 + $0x50] sm:$0xf0]  ;;  %v2792_v22 = vor.u32 %v3488_v14, %v2789_v15 }
  0x89   : > { %1927 = vmatpush.bf16.msra.mxu0 %v2424_v4  ;;  %v3420_v21 = vld [vmem:[%s3903_s27 + $0x144] sm:$0xf]  ;;  %v2517_v23 = vld [vmem:[%s3903_s27 + $0x150] sm:$0xf0]  ;;  %v2392_v30 = vor.u32 %v3388_v19, %v2389_v20 }
  0x8a   : > { %v3452_v24 = vld [vmem:[%s3903_s27 + $0x244] sm:$0xf]  ;;  %v2645_v25 = vld [vmem:[%s3903_s27 + $0x250] sm:$0xf0]  ;;  %v2520_v31 = vor.u32 %v3420_v21, %v2517_v23 }
  0x8b   : > { %1940 = vmatpush.bf16.msra.mxu1 %v2552_v5  ;;  %1953 = vmatpush.bf16.msra.mxu2 %v2680_v6  ;;  %v3484_v27 = vld [vmem:[%s3903_s27 + $0x344] sm:$0xf]  ;;  %v2773_v28 = vld [vmem:[%s3903_s27 + $0x350] sm:$0xf0]  ;;  %v2648_v32 = vor.u32 %v3452_v24, %v2645_v25 }
  0x8c   : > { %1966 = vmatpush.bf16.msra.mxu3 %v2808_v10  ;;  %v3384_v33 = vld [vmem:[%s3903_s27 + $0x24] sm:$0xf]  ;;  %v2373_v34 = vld [vmem:[%s3903_s27 + $0x30] sm:$0xf0]  ;;  %v2776_v37 = vor.u32 %v3484_v27, %v2773_v28 }
  0x8d   : > { %1928 = vmatpush.bf16.msra.mxu0 %v2408_v16  ;;  %v3416_v35 = vld [vmem:[%s3903_s27 + $0x124] sm:$0xf]  ;;  %v2501_v38 = vld [vmem:[%s3903_s27 + $0x130] sm:$0xf0]  ;;  %v2376_v47 = vor.u32 %v3384_v33, %v2373_v34 }
  0x8e   : > { %v3448_v41 = vld [vmem:[%s3903_s27 + $0x224] sm:$0xf]  ;;  %v2629_v44 = vld [vmem:[%s3903_s27 + $0x230] sm:$0xf0]  ;;  %v2504_v51 = vor.u32 %v3416_v35, %v2501_v38 }
  0x8f   : > { %1941 = vmatpush.bf16.msra.mxu1 %v2536_v17  ;;  %1954 = vmatpush.bf16.msra.mxu2 %v2664_v18  ;;  %v3480_v45 = vld [vmem:[%s3903_s27 + $0x324] sm:$0xf]  ;;  %v2757_v46 = vld [vmem:[%s3903_s27 + $0x330] sm:$0xf0]  ;;  %v2632_v52 = vor.u32 %v3448_v41, %v2629_v44 }
  0x90   : > { %1967 = vmatpush.bf16.msra.mxu3 %v2792_v22  ;;  %v3380_v48 = vld [vmem:[%s3903_s27 + $0x4] sm:$0xf]  ;;  %v2357_v49 = vld [vmem:[%s3903_s27 + $0x10] sm:$0xf0]  ;;  %v2760_v56 = vor.u32 %v3480_v45, %v2757_v46 }
  0x91   : > { %1929 = vmatpush.bf16.msra.mxu0 %v2392_v30  ;;  %v3412_v53 = vld [vmem:[%s3903_s27 + $0x104] sm:$0xf]  ;;  %v2485_v54 = vld [vmem:[%s3903_s27 + $0x110] sm:$0xf0]  ;;  %v2360_v63 = vor.u32 %v3380_v48, %v2357_v49 }
  0x92   : > { %v3444_v55 = vld [vmem:[%s3903_s27 + $0x204] sm:$0xf]  ;;  %v2613_v57 = vld [vmem:[%s3903_s27 + $0x210] sm:$0xf0]  ;;  %v2488_v3 = vor.u32 %v3412_v53, %v2485_v54 }
  0x93   : > { %1942 = vmatpush.bf16.msra.mxu1 %v2520_v31  ;;  %1955 = vmatpush.bf16.msra.mxu2 %v2648_v32  ;;  %v3476_v58 = vld [vmem:[%s3903_s27 + $0x304] sm:$0xf]  ;;  %v2741_v59 = vld [vmem:[%s3903_s27 + $0x310] sm:$0xf0]  ;;  %v2616_v4 = vor.u32 %v3444_v55, %v2613_v57 }
  0x94   : > { %1968 = vmatpush.bf16.msra.mxu3 %v2776_v37  ;;  %v3536_v60 = vld [vmem:[%s3903_s27 + $0x4e4] sm:$0xf]  ;;  %v2981_v61 = vld [vmem:[%s3903_s27 + $0x4f0] sm:$0xf0]  ;;  %v2744_v7 = vor.u32 %v3476_v58, %v2741_v59 }
  0x95   : > { %v3568_v62 = vld [vmem:[%s3903_s27 + $0x5e4] sm:$0xf]  ;;  %1930 = vmatpush.bf16.msra.mxu0 %v2376_v47  ;;  %v3109_v0 = vld [vmem:[%s3903_s27 + $0x5f0] sm:$0xf0]  ;;  %v2984_v8 = vor.u32 %v3536_v60, %v2981_v61 }
  0x96   : > { %v3600_v1 = vld [vmem:[%s3903_s27 + $0x6e4] sm:$0xf]  ;;  %v3237_v2 = vld [vmem:[%s3903_s27 + $0x6f0] sm:$0xf0]  ;;  %v3112_v9 = vor.u32 %v3568_v62, %v3109_v0 }
  0x97   : > { %1943 = vmatpush.bf16.msra.mxu1 %v2504_v51  ;;  %1956 = vmatpush.bf16.msra.mxu2 %v2632_v52  ;;  %v3632_v5 = vld [vmem:[%s3903_s27 + $0x7e4] sm:$0xf]  ;;  %v3365_v6 = vld [vmem:[%s3903_s27 + $0x7f0] sm:$0xf0]  ;;  %v3240_v10 = vor.u32 %v3600_v1, %v3237_v2 }
  0x98   : > { %1969 = vmatpush.bf16.msra.mxu3 %v2760_v56  ;;  %v3532_v11 = vld [vmem:[%s3903_s27 + $0x4c4] sm:$0xf]  ;;  %v2965_v12 = vld [vmem:[%s3903_s27 + $0x4d0] sm:$0xf0]  ;;  %v3368_v14 = vor.u32 %v3632_v5, %v3365_v6 }
  0x99   : > { %v3564_v13 = vld [vmem:[%s3903_s27 + $0x5c4] sm:$0xf]  ;;  %1931 = vmatpush.bf16.msra.mxu0 %v2360_v63  ;;  %v3093_v15 = vld [vmem:[%s3903_s27 + $0x5d0] sm:$0xf0]  ;;  %v2968_v20 = vor.u32 %v3532_v11, %v2965_v12 }
  0x9a   : > { %v3596_v16 = vld [vmem:[%s3903_s27 + $0x6c4] sm:$0xf]  ;;  %v3221_v17 = vld [vmem:[%s3903_s27 + $0x6d0] sm:$0xf0]  ;;  %v3096_v21 = vor.u32 %v3564_v13, %v3093_v15 }
  0x9b   : > { %1944 = vmatpush.bf16.msra.mxu1 %v2488_v3  ;;  %1957 = vmatpush.bf16.msra.mxu2 %v2616_v4  ;;  %v3628_v18 = vld [vmem:[%s3903_s27 + $0x7c4] sm:$0xf]  ;;  %v3349_v19 = vld [vmem:[%s3903_s27 + $0x7d0] sm:$0xf0]  ;;  %v3224_v22 = vor.u32 %v3596_v16, %v3221_v17 }
  0x9c   : > { %1970 = vmatpush.bf16.msra.mxu3 %v2744_v7  ;;  %v3528_v23 = vld [vmem:[%s3903_s27 + $0x4a4] sm:$0xf]  ;;  %v2949_v24 = vld [vmem:[%s3903_s27 + $0x4b0] sm:$0xf0]  ;;  %v3352_v27 = vor.u32 %v3628_v18, %v3349_v19  ;;  %1932 = vmatmul.bf16.vlgmr.msra.gmra.mxu0 %v4036_v42 }
  0x9d   : > { %1976 = vmatpush.bf16.msrb.mxu0 %v2984_v8  ;;  %v3560_v25 = vld [vmem:[%s3903_s27 + $0x5a4] sm:$0xf]  ;;  %v3077_v28 = vld [vmem:[%s3903_s27 + $0x5b0] sm:$0xf0]  ;;  %v2952_v34 = vor.u32 %v3528_v23, %v2949_v24 }
  0x9e   : > { %v3592_v30 = vld [vmem:[%s3903_s27 + $0x6a4] sm:$0xf]  ;;  %v3205_v31 = vld [vmem:[%s3903_s27 + $0x6b0] sm:$0xf0]  ;;  %1958 = vmatmul.bf16.vlgmr.msra.gmra.mxu2 %v4023_v26  ;;  %1945 = vmatmul.bf16.vlgmr.msra.gmra.mxu1 %v4038_v43  ;;  %v3080_v35 = vor.u32 %v3560_v25, %v3077_v28 }
  0x9f   : > { %1989 = vmatpush.bf16.msrb.mxu1 %v3112_v9  ;;  %2002 = vmatpush.bf16.msrb.mxu2 %v3240_v10  ;;  %v3624_v32 = vld [vmem:[%s3903_s27 + $0x7a4] sm:$0xf]  ;;  %v3333_v33 = vld [vmem:[%s3903_s27 + $0x7b0] sm:$0xf0]  ;;  %v3208_v37 = vor.u32 %v3592_v30, %v3205_v31 }
  0xa0   : > { %2015 = vmatpush.bf16.msrb.mxu3 %v3368_v14  ;;  %v3524_v38 = vld [vmem:[%s3903_s27 + $0x484] sm:$0xf]  ;;  %v2933_v41 = vld [vmem:[%s3903_s27 + $0x490] sm:$0xf0]  ;;  %v3336_v45 = vor.u32 %v3624_v32, %v3333_v33 }
  0xa1   : > { %1971 = vmatmul.bf16.vlgmr.msra.gmra.mxu3 %v4027_v29  ;;  %1977 = vmatpush.bf16.msrb.mxu0 %v2968_v20  ;;  %v3556_v44 = vld [vmem:[%s3903_s27 + $0x584] sm:$0xf]  ;;  %v3061_v46 = vld [vmem:[%s3903_s27 + $0x590] sm:$0xf0]  ;;  %v2936_v52 = vor.u32 %v3524_v38, %v2933_v41  ;;  %v2475_v41 = vld [vmem:[%s3903_s27 + $0xe8] sm:$0xf] }
  0xa2   : > { %v3588_v47 = vld [vmem:[%s3903_s27 + $0x684] sm:$0xf]  ;;  %v3189_v48 = vld [vmem:[%s3903_s27 + $0x690] sm:$0xf0]  ;;  %v3064_v53 = vor.u32 %v3556_v44, %v3061_v46  ;;  %v3411_v44 = vld [vmem:[%s3903_s27 + $0xf4] sm:$0xf0] }
  0xa3   : > { %1990 = vmatpush.bf16.msrb.mxu1 %v3096_v21  ;;  %2003 = vmatpush.bf16.msrb.mxu2 %v3224_v22  ;;  %v3620_v49 = vld [vmem:[%s3903_s27 + $0x784] sm:$0xf]  ;;  %v3317_v51 = vld [vmem:[%s3903_s27 + $0x790] sm:$0xf0]  ;;  %v3192_v54 = vor.u32 %v3588_v47, %v3189_v48  ;;  %v3443_v47 = vld [vmem:[%s3903_s27 + $0x1f4] sm:$0xf0] }
  0xa4   : > { %2016 = vmatpush.bf16.msrb.mxu3 %v3352_v27  ;;  %v3520_v55 = vld [vmem:[%s3903_s27 + $0x464] sm:$0xf]  ;;  %v2917_v56 = vld [vmem:[%s3903_s27 + $0x470] sm:$0xf0]  ;;  %v3320_v58 = vor.u32 %v3620_v49, %v3317_v51  ;;  %v2731_v48 = vld [vmem:[%s3903_s27 + $0x2e8] sm:$0xf] }
  0xa5   : > { %1978 = vmatpush.bf16.msrb.mxu0 %v2952_v34  ;;  %v3552_v57 = vld [vmem:[%s3903_s27 + $0x564] sm:$0xf]  ;;  %v3045_v59 = vld [vmem:[%s3903_s27 + $0x570] sm:$0xf0]  ;;  %v2920_v0 = vor.u32 %v3520_v55, %v2917_v56  ;;  %v3475_v49 = vld [vmem:[%s3903_s27 + $0x2f4] sm:$0xf0]  ;;  %v2476_v56 = vor.u32 %v3411_v44, %v2475_v41 }
  0xa6   : > { %v3584_v60 = vld [vmem:[%s3903_s27 + $0x664] sm:$0xf]  ;;  %v3173_v61 = vld [vmem:[%s3903_s27 + $0x670] sm:$0xf0]  ;;  %v3048_v1 = vor.u32 %v3552_v57, %v3045_v59  ;;  %v2459_v59 = vld [vmem:[%s3903_s27 + $0xc8] sm:$0xf] }
  0xa7   : > { %1991 = vmatpush.bf16.msrb.mxu1 %v3080_v35  ;;  %2004 = vmatpush.bf16.msrb.mxu2 %v3208_v37  ;;  %v3616_v62 = vld [vmem:[%s3903_s27 + $0x764] sm:$0xf]  ;;  %v3301_v63 = vld [vmem:[%s3903_s27 + $0x770] sm:$0xf0]  ;;  %v3176_v2 = vor.u32 %v3584_v60, %v3173_v61  ;;  %v3407_v60 = vld [vmem:[%s3903_s27 + $0xd4] sm:$0xf0] }
  0xa8   : > { %2017 = vmatpush.bf16.msrb.mxu3 %v3336_v45  ;;  %v3516_v3 = vld [vmem:[%s3903_s27 + $0x444] sm:$0xf]  ;;  %v2901_v4 = vld [vmem:[%s3903_s27 + $0x450] sm:$0xf0]  ;;  %v3304_v6 = vor.u32 %v3616_v62, %v3301_v63  ;;  %v2603_v45 = vld [vmem:[%s3903_s27 + $0x1e8] sm:$0xf] }
  0xa9   : > { %1979 = vmatpush.bf16.msrb.mxu0 %v2936_v52  ;;  %v3548_v5 = vld [vmem:[%s3903_s27 + $0x544] sm:$0xf]  ;;  %v3029_v7 = vld [vmem:[%s3903_s27 + $0x550] sm:$0xf0]  ;;  %v2904_v12 = vor.u32 %v3516_v3, %v2901_v4  ;;  %v2604_v57 = vor.u32 %v3443_v47, %v2603_v45  ;;  %v2587_v61 = vld [vmem:[%s3903_s27 + $0x1c8] sm:$0xf]  ;;  %v2460_v4 = vor.u32 %v3407_v60, %v2459_v59 }
  0xaa   : > { %v3580_v8 = vld [vmem:[%s3903_s27 + $0x644] sm:$0xf]  ;;  %v3157_v9 = vld [vmem:[%s3903_s27 + $0x650] sm:$0xf0]  ;;  %v3032_v13 = vor.u32 %v3548_v5, %v3029_v7  ;;  %v3439_v63 = vld [vmem:[%s3903_s27 + $0x1d4] sm:$0xf0] }
  0xab   : > { %1992 = vmatpush.bf16.msrb.mxu1 %v3064_v53  ;;  %2005 = vmatpush.bf16.msrb.mxu2 %v3192_v54  ;;  %v3612_v10 = vld [vmem:[%s3903_s27 + $0x744] sm:$0xf]  ;;  %v3285_v11 = vld [vmem:[%s3903_s27 + $0x750] sm:$0xf0]  ;;  %v3160_v14 = vor.u32 %v3580_v8, %v3157_v9  ;;  %v2859_v53 = vld [vmem:[%s3903_s27 + $0x3e8] sm:$0xf]  ;;  %v2588_v5 = vor.u32 %v3439_v63, %v2587_v61 }
  0xac   : > { %2018 = vmatpush.bf16.msrb.mxu3 %v3320_v58  ;;  %v3512_v15 = vld [vmem:[%s3903_s27 + $0x424] sm:$0xf]  ;;  %v2885_v16 = vld [vmem:[%s3903_s27 + $0x430] sm:$0xf0]  ;;  %v3288_v18 = vor.u32 %v3612_v10, %v3285_v11  ;;  %v3507_v54 = vld [vmem:[%s3903_s27 + $0x3f4] sm:$0xf0]  ;;  %v2732_v58 = vor.u32 %v3475_v49, %v2731_v48 }
  0xad   : > { %1980 = vmatpush.bf16.msrb.mxu0 %v2920_v0  ;;  %v3544_v17 = vld [vmem:[%s3903_s27 + $0x524] sm:$0xf]  ;;  %v3013_v19 = vld [vmem:[%s3903_s27 + $0x530] sm:$0xf0]  ;;  %v2888_v24 = vor.u32 %v3512_v15, %v2885_v16  ;;  %v2860_v62 = vor.u32 %v3507_v54, %v2859_v53  ;;  %v2715_v0 = vld [vmem:[%s3903_s27 + $0x2c8] sm:$0xf] }
  0xae   : > { %v3576_v20 = vld [vmem:[%s3903_s27 + $0x624] sm:$0xf]  ;;  %v3141_v21 = vld [vmem:[%s3903_s27 + $0x630] sm:$0xf0]  ;;  %v3016_v28 = vor.u32 %v3544_v17, %v3013_v19  ;;  %v3503_v3 = vld [vmem:[%s3903_s27 + $0x3d4] sm:$0xf0] }
  0xaf   : > { %1993 = vmatpush.bf16.msrb.mxu1 %v3048_v1  ;;  %2006 = vmatpush.bf16.msrb.mxu2 %v3176_v2  ;;  %v3608_v22 = vld [vmem:[%s3903_s27 + $0x724] sm:$0xf]  ;;  %v3269_v23 = vld [vmem:[%s3903_s27 + $0x730] sm:$0xf0]  ;;  %v3144_v30 = vor.u32 %v3576_v20, %v3141_v21  ;;  %v3471_v1 = vld [vmem:[%s3903_s27 + $0x2d4] sm:$0xf0] }
  0xb0   : > { %2019 = vmatpush.bf16.msrb.mxu3 %v3304_v6  ;;  %v3508_v25 = vld [vmem:[%s3903_s27 + $0x404] sm:$0xf]  ;;  %v2869_v27 = vld [vmem:[%s3903_s27 + $0x410] sm:$0xf0]  ;;  %v3272_v34 = vor.u32 %v3608_v22, %v3269_v23  ;;  %v2843_v2 = vld [vmem:[%s3903_s27 + $0x3c8] sm:$0xf]  ;;  %v2716_v6 = vor.u32 %v3471_v1, %v2715_v0 }
  0xb1   : > { %1981 = vmatpush.bf16.msrb.mxu0 %v2904_v12  ;;  %v3540_v31 = vld [vmem:[%s3903_s27 + $0x504] sm:$0xf]  ;;  %v2997_v32 = vld [vmem:[%s3903_s27 + $0x510] sm:$0xf0]  ;;  %v2872_v46 = vor.u32 %v3508_v25, %v2869_v27  ;;  %v2443_v7 = vld [vmem:[%s3903_s27 + $0xa8] sm:$0xf]  ;;  %v2844_v10 = vor.u32 %v3503_v3, %v2843_v2 }
  0xb2   : > { %v3572_v33 = vld [vmem:[%s3903_s27 + $0x604] sm:$0xf]  ;;  %v3125_v35 = vld [vmem:[%s3903_s27 + $0x610] sm:$0xf0]  ;;  %v3000_v51 = vor.u32 %v3540_v31, %v2997_v32  ;;  %v3403_v8 = vld [vmem:[%s3903_s27 + $0xb4] sm:$0xf0] }
  0xb3   : > { %1994 = vmatpush.bf16.msrb.mxu1 %v3032_v13  ;;  %2007 = vmatpush.bf16.msrb.mxu2 %v3160_v14  ;;  %v3604_v37 = vld [vmem:[%s3903_s27 + $0x704] sm:$0xf]  ;;  %v3253_v38 = vld [vmem:[%s3903_s27 + $0x710] sm:$0xf0]  ;;  %v3128_v52 = vor.u32 %v3572_v33, %v3125_v35  ;;  %v2571_v9 = vld [vmem:[%s3903_s27 + $0x1a8] sm:$0xf]  ;;  %v2444_v16 = vor.u32 %v3403_v8, %v2443_v7 }
  0xb4   : > { %2020 = vmatpush.bf16.msrb.mxu3 %v3288_v18  ;;  %v3256_v55 = vor.u32 %v3604_v37, %v3253_v38  ;;  %v3435_v11 = vld [vmem:[%s3903_s27 + $0x1b4] sm:$0xf0]  ;;  %v2699_v12 = vld [vmem:[%s3903_s27 + $0x2a8] sm:$0xf] }
  0xb5   : > { %1982 = vmatpush.bf16.msrb.mxu0 %v2888_v24  ;;  %v3467_v13 = vld [vmem:[%s3903_s27 + $0x2b4] sm:$0xf0]  ;;  %v2827_v14 = vld [vmem:[%s3903_s27 + $0x3a8] sm:$0xf]  ;;  %v2572_v17 = vor.u32 %v3435_v11, %v2571_v9 }
  0xb6   : > { %v3499_v15 = vld [vmem:[%s3903_s27 + $0x3b4] sm:$0xf0]  ;;  %v2700_v18 = vor.u32 %v3467_v13, %v2699_v12  ;;  %v2427_v19 = vld [vmem:[%s3903_s27 + $0x88] sm:$0xf] }
  0xb7   : > { %1995 = vmatpush.bf16.msrb.mxu1 %v3016_v28  ;;  %2008 = vmatpush.bf16.msrb.mxu2 %v3144_v30  ;;  %v3399_v20 = vld [vmem:[%s3903_s27 + $0x94] sm:$0xf0]  ;;  %v2555_v21 = vld [vmem:[%s3903_s27 + $0x188] sm:$0xf]  ;;  %v2828_v22 = vor.u32 %v3499_v15, %v2827_v14 }
  0xb8   : > { %2021 = vmatpush.bf16.msrb.mxu3 %v3272_v34  ;;  %v3431_v23 = vld [vmem:[%s3903_s27 + $0x194] sm:$0xf0]  ;;  %v2683_v24 = vld [vmem:[%s3903_s27 + $0x288] sm:$0xf]  ;;  %v2428_v30 = vor.u32 %v3399_v20, %v2427_v19 }
  0xb9   : > { %1983 = vmatpush.bf16.msrb.mxu0 %v2872_v46  ;;  %v3463_v25 = vld [vmem:[%s3903_s27 + $0x294] sm:$0xf0]  ;;  %v2811_v27 = vld [vmem:[%s3903_s27 + $0x388] sm:$0xf]  ;;  %v2556_v31 = vor.u32 %v3431_v23, %v2555_v21 }
  0xba   : > { %v3495_v28 = vld [vmem:[%s3903_s27 + $0x394] sm:$0xf0]  ;;  %v2684_v32 = vor.u32 %v3463_v25, %v2683_v24  ;;  %v2411_v33 = vld [vmem:[%s3903_s27 + $0x68] sm:$0xf] }
  0xbb   : > { %1996 = vmatpush.bf16.msrb.mxu1 %v3000_v51  ;;  %2009 = vmatpush.bf16.msrb.mxu2 %v3128_v52  ;;  %v3395_v34 = vld [vmem:[%s3903_s27 + $0x74] sm:$0xf0]  ;;  %v2539_v35 = vld [vmem:[%s3903_s27 + $0x168] sm:$0xf]  ;;  %v2812_v37 = vor.u32 %v3495_v28, %v2811_v27 }
  0xbc   : > { %2022 = vmatpush.bf16.msrb.mxu3 %v3256_v55  ;;  %1984 = vmatmul.bf16.vlgmr.msrb.gmra.mxu0 %v4093_v50  ;;  %v3427_v38 = vld [vmem:[%s3903_s27 + $0x174] sm:$0xf0]  ;;  %v2667_v41 = vld [vmem:[%s3903_s27 + $0x268] sm:$0xf]  ;;  %v2412_v47 = vor.u32 %v3395_v34, %v2411_v33 }
  0xbd   : > { %2028 = vmatpush.bf16.msra.mxu0 %v2476_v56  ;;  %v3459_v44 = vld [vmem:[%s3903_s27 + $0x274] sm:$0xf0]  ;;  %v2795_v45 = vld [vmem:[%s3903_s27 + $0x368] sm:$0xf]  ;;  %v2540_v48 = vor.u32 %v3427_v38, %v2539_v35 }
  0xbe   : > { %2010 = vmatmul.bf16.vlgmr.msrb.gmra.mxu2 %v4082_v36  ;;  %1997 = vmatmul.bf16.vlgmr.msrb.gmra.mxu1 %v4087_v40  ;;  %v3491_v46 = vld [vmem:[%s3903_s27 + $0x374] sm:$0xf0]  ;;  %v2668_v49 = vor.u32 %v3459_v44, %v2667_v41  ;;  %v2395_v51 = vld [vmem:[%s3903_s27 + $0x48] sm:$0xf] }
  0xbf   : > { %2041 = vmatpush.bf16.msra.mxu1 %v2604_v57  ;;  %2054 = vmatpush.bf16.msra.mxu2 %v2732_v58  ;;  %v3391_v52 = vld [vmem:[%s3903_s27 + $0x54] sm:$0xf0]  ;;  %v2523_v53 = vld [vmem:[%s3903_s27 + $0x148] sm:$0xf]  ;;  %v2796_v54 = vor.u32 %v3491_v46, %v2795_v45 }
  0xc0   : > { %2067 = vmatpush.bf16.msra.mxu3 %v2860_v62  ;;  %v3423_v55 = vld [vmem:[%s3903_s27 + $0x154] sm:$0xf0]  ;;  %v2651_v56 = vld [vmem:[%s3903_s27 + $0x248] sm:$0xf]  ;;  %v2396_v60 = vor.u32 %v3391_v52, %v2395_v51 }
  0xc1   : > { %2023 = vmatmul.bf16.vlgmr.msrb.gmra.mxu3 %v4085_v39  ;;  %2029 = vmatpush.bf16.msra.mxu0 %v2460_v4  ;;  %v3455_v57 = vld [vmem:[%s3903_s27 + $0x254] sm:$0xf0]  ;;  %v2779_v58 = vld [vmem:[%s3903_s27 + $0x348] sm:$0xf]  ;;  %v2524_v61 = vor.u32 %v3423_v55, %v2523_v53 }
  0xc2   : > { %v3487_v59 = vld [vmem:[%s3903_s27 + $0x354] sm:$0xf0]  ;;  %v2652_v62 = vor.u32 %v3455_v57, %v2651_v56  ;;  %v2379_v63 = vld [vmem:[%s3903_s27 + $0x28] sm:$0xf] }
  0xc3   : > { %2042 = vmatpush.bf16.msra.mxu1 %v2588_v5  ;;  %2055 = vmatpush.bf16.msra.mxu2 %v2716_v6  ;;  %v3387_v0 = vld [vmem:[%s3903_s27 + $0x34] sm:$0xf0]  ;;  %v2507_v1 = vld [vmem:[%s3903_s27 + $0x128] sm:$0xf]  ;;  %v2780_v2 = vor.u32 %v3487_v59, %v2779_v58 }
  0xc4   : > { %2068 = vmatpush.bf16.msra.mxu3 %v2844_v10  ;;  %v3419_v3 = vld [vmem:[%s3903_s27 + $0x134] sm:$0xf0]  ;;  %v2635_v4 = vld [vmem:[%s3903_s27 + $0x228] sm:$0xf]  ;;  %v2380_v8 = vor.u32 %v3387_v0, %v2379_v63 }
  0xc5   : > { %2030 = vmatpush.bf16.msra.mxu0 %v2444_v16  ;;  %v3451_v5 = vld [vmem:[%s3903_s27 + $0x234] sm:$0xf0]  ;;  %v2763_v6 = vld [vmem:[%s3903_s27 + $0x328] sm:$0xf]  ;;  %v2508_v11 = vor.u32 %v3419_v3, %v2507_v1 }
  0xc6   : > { %v3483_v7 = vld [vmem:[%s3903_s27 + $0x334] sm:$0xf0]  ;;  %v2363_v9 = vld [vmem:[%s3903_s27 + $0x8] sm:$0xf]  ;;  %v2636_v12 = vor.u32 %v3451_v5, %v2635_v4 }
  0xc7   : > { %2043 = vmatpush.bf16.msra.mxu1 %v2572_v17  ;;  %2056 = vmatpush.bf16.msra.mxu2 %v2700_v18  ;;  %v3383_v10 = vld [vmem:[%s3903_s27 + $0x14] sm:$0xf0]  ;;  %v2491_v13 = vld [vmem:[%s3903_s27 + $0x108] sm:$0xf]  ;;  %v2764_v16 = vor.u32 %v3483_v7, %v2763_v6 }
  0xc8   : > { %2069 = vmatpush.bf16.msra.mxu3 %v2828_v22  ;;  %v3415_v14 = vld [vmem:[%s3903_s27 + $0x114] sm:$0xf0]  ;;  %v2619_v15 = vld [vmem:[%s3903_s27 + $0x208] sm:$0xf]  ;;  %v2364_v23 = vor.u32 %v3383_v10, %v2363_v9 }
  0xc9   : > { %2031 = vmatpush.bf16.msra.mxu0 %v2428_v30  ;;  %v3447_v17 = vld [vmem:[%s3903_s27 + $0x214] sm:$0xf0]  ;;  %v2747_v18 = vld [vmem:[%s3903_s27 + $0x308] sm:$0xf]  ;;  %v2492_v28 = vor.u32 %v3415_v14, %v2491_v13 }
  0xca   : > { %v3479_v19 = vld [vmem:[%s3903_s27 + $0x314] sm:$0xf0]  ;;  %v2987_v20 = vld [vmem:[%s3903_s27 + $0x4e8] sm:$0xf]  ;;  %v2620_v30 = vor.u32 %v3447_v17, %v2619_v15 }
  0xcb   : > { %2044 = vmatpush.bf16.msra.mxu1 %v2556_v31  ;;  %2057 = vmatpush.bf16.msra.mxu2 %v2684_v32  ;;  %v3539_v21 = vld [vmem:[%s3903_s27 + $0x4f4] sm:$0xf0]  ;;  %v3115_v22 = vld [vmem:[%s3903_s27 + $0x5e8] sm:$0xf]  ;;  %v2748_v33 = vor.u32 %v3479_v19, %v2747_v18 }
  0xcc   : > { %2070 = vmatpush.bf16.msra.mxu3 %v2812_v37  ;;  %v3571_v24 = vld [vmem:[%s3903_s27 + $0x5f4] sm:$0xf0]  ;;  %v3243_v25 = vld [vmem:[%s3903_s27 + $0x6e8] sm:$0xf]  ;;  %v2988_v34 = vor.u32 %v3539_v21, %v2987_v20 }
  0xcd   : > { %2032 = vmatpush.bf16.msra.mxu0 %v2412_v47  ;;  %v3603_v27 = vld [vmem:[%s3903_s27 + $0x6f4] sm:$0xf0]  ;;  %v3371_v31 = vld [vmem:[%s3903_s27 + $0x7e8] sm:$0xf]  ;;  %v3116_v35 = vor.u32 %v3571_v24, %v3115_v22 }
  0xce   : > { %v3635_v32 = vld [vmem:[%s3903_s27 + $0x7f4] sm:$0xf0]  ;;  %v3244_v37 = vor.u32 %v3603_v27, %v3243_v25  ;;  %v2971_v38 = vld [vmem:[%s3903_s27 + $0x4c8] sm:$0xf] }
  0xcf   : > { %2045 = vmatpush.bf16.msra.mxu1 %v2540_v48  ;;  %2058 = vmatpush.bf16.msra.mxu2 %v2668_v49  ;;  %v3535_v41 = vld [vmem:[%s3903_s27 + $0x4d4] sm:$0xf0]  ;;  %v3099_v44 = vld [vmem:[%s3903_s27 + $0x5c8] sm:$0xf]  ;;  %v3372_v45 = vor.u32 %v3635_v32, %v3371_v31 }
  0xd0   : > { %2071 = vmatpush.bf16.msra.mxu3 %v2796_v54  ;;  %v3567_v46 = vld [vmem:[%s3903_s27 + $0x5d4] sm:$0xf0]  ;;  %v3227_v47 = vld [vmem:[%s3903_s27 + $0x6c8] sm:$0xf]  ;;  %v2972_v52 = vor.u32 %v3535_v41, %v2971_v38 }
  0xd1   : > { %2033 = vmatpush.bf16.msra.mxu0 %v2396_v60  ;;  %v3599_v48 = vld [vmem:[%s3903_s27 + $0x6d4] sm:$0xf0]  ;;  %v3355_v49 = vld [vmem:[%s3903_s27 + $0x7c8] sm:$0xf]  ;;  %v3100_v53 = vor.u32 %v3567_v46, %v3099_v44 }
  0xd2   : > { %v3631_v51 = vld [vmem:[%s3903_s27 + $0x7d4] sm:$0xf0]  ;;  %v3228_v54 = vor.u32 %v3599_v48, %v3227_v47  ;;  %v2955_v55 = vld [vmem:[%s3903_s27 + $0x4a8] sm:$0xf] }
  0xd3   : > { %2046 = vmatpush.bf16.msra.mxu1 %v2524_v61  ;;  %2059 = vmatpush.bf16.msra.mxu2 %v2652_v62  ;;  %v3531_v56 = vld [vmem:[%s3903_s27 + $0x4b4] sm:$0xf0]  ;;  %v3083_v57 = vld [vmem:[%s3903_s27 + $0x5a8] sm:$0xf]  ;;  %v3356_v58 = vor.u32 %v3631_v51, %v3355_v49  ;;  %v4335_v49 = vld [vmem:[%s3909_s5] sm:$0xf] }
  0xd4   : > { %2072 = vmatpush.bf16.msra.mxu3 %v2780_v2  ;;  %v3563_v59 = vld [vmem:[%s3903_s27 + $0x5b4] sm:$0xf0]  ;;  %v3211_v60 = vld [vmem:[%s3903_s27 + $0x6a8] sm:$0xf]  ;;  %v2956_v0 = vor.u32 %v3531_v56, %v2955_v55 }
  0xd5   : > { %2034 = vmatpush.bf16.msra.mxu0 %v2380_v8  ;;  %v3595_v61 = vld [vmem:[%s3903_s27 + $0x6b4] sm:$0xf0]  ;;  %v3339_v62 = vld [vmem:[%s3903_s27 + $0x7a8] sm:$0xf]  ;;  %v3084_v1 = vor.u32 %v3563_v59, %v3083_v57 }
  0xd6   : > { %v3627_v63 = vld [vmem:[%s3903_s27 + $0x7b4] sm:$0xf0]  ;;  %v3212_v2 = vor.u32 %v3595_v61, %v3211_v60  ;;  %v2939_v3 = vld [vmem:[%s3903_s27 + $0x488] sm:$0xf]  ;;  %v532_v60 = vperm.slane %v4335_v49, 0 }
  0xd7   : > { %2047 = vmatpush.bf16.msra.mxu1 %v2508_v11  ;;  %2060 = vmatpush.bf16.msra.mxu2 %v2636_v12  ;;  %v3527_v4 = vld [vmem:[%s3903_s27 + $0x494] sm:$0xf0]  ;;  %v3067_v5 = vld [vmem:[%s3903_s27 + $0x588] sm:$0xf]  ;;  %v3340_v6 = vor.u32 %v3627_v63, %v3339_v62 }
  0xd8   : > { %2073 = vmatpush.bf16.msra.mxu3 %v2764_v16  ;;  %v3559_v7 = vld [vmem:[%s3903_s27 + $0x594] sm:$0xf0]  ;;  %v3195_v8 = vld [vmem:[%s3903_s27 + $0x688] sm:$0xf]  ;;  %v2940_v12 = vor.u32 %v3527_v4, %v2939_v3 }
  0xd9   : > { %2035 = vmatpush.bf16.msra.mxu0 %v2364_v23  ;;  %v3591_v9 = vld [vmem:[%s3903_s27 + $0x694] sm:$0xf0]  ;;  %v3323_v10 = vld [vmem:[%s3903_s27 + $0x788] sm:$0xf]  ;;  %v3068_v13 = vor.u32 %v3559_v7, %v3067_v5  ;;  %v3409_v7 = vld [vmem:[%s3903_s27 + $0xec] sm:$0xf] }
  0xda   : > { %v3623_v11 = vld [vmem:[%s3903_s27 + $0x794] sm:$0xf0]  ;;  %v3196_v14 = vor.u32 %v3591_v9, %v3195_v8  ;;  %v2923_v15 = vld [vmem:[%s3903_s27 + $0x468] sm:$0xf]  ;;  %v2477_v8 = vld [vmem:[%s3903_s27 + $0xf8] sm:$0xf0] }
  0xdb   : > { %2048 = vmatpush.bf16.msra.mxu1 %v2492_v28  ;;  %2061 = vmatpush.bf16.msra.mxu2 %v2620_v30  ;;  %v3523_v16 = vld [vmem:[%s3903_s27 + $0x474] sm:$0xf0]  ;;  %v3051_v17 = vld [vmem:[%s3903_s27 + $0x568] sm:$0xf]  ;;  %v3324_v18 = vor.u32 %v3623_v11, %v3323_v10  ;;  %v3441_v9 = vld [vmem:[%s3903_s27 + $0x1ec] sm:$0xf] }
  0xdc   : > { %2074 = vmatpush.bf16.msra.mxu3 %v2748_v33  ;;  %2036 = vmatmul.bf16.vlgmr.msra.gmra.mxu0 %v4036_v42  ;;  %v3555_v19 = vld [vmem:[%s3903_s27 + $0x574] sm:$0xf0]  ;;  %v3179_v20 = vld [vmem:[%s3903_s27 + $0x668] sm:$0xf]  ;;  %v2924_v24 = vor.u32 %v3523_v16, %v2923_v15  ;;  %v2733_v15 = vld [vmem:[%s3903_s27 + $0x2f8] sm:$0xf0] }
  0xdd   : > { %2080 = vmatpush.bf16.msrb.mxu0 %v2988_v34  ;;  %v3587_v21 = vld [vmem:[%s3903_s27 + $0x674] sm:$0xf0]  ;;  %v3307_v22 = vld [vmem:[%s3903_s27 + $0x768] sm:$0xf]  ;;  %v3052_v25 = vor.u32 %v3555_v19, %v3051_v17  ;;  %v3505_v19 = vld [vmem:[%s3903_s27 + $0x3ec] sm:$0xf] }
  0xde   : > { %2062 = vmatmul.bf16.vlgmr.msra.gmra.mxu2 %v4023_v26  ;;  %2049 = vmatmul.bf16.vlgmr.msra.gmra.mxu1 %v4038_v43  ;;  %v3619_v23 = vld [vmem:[%s3903_s27 + $0x774] sm:$0xf0]  ;;  %v3180_v27 = vor.u32 %v3587_v21, %v3179_v20  ;;  %v2907_v28 = vld [vmem:[%s3903_s27 + $0x448] sm:$0xf]  ;;  %v2861_v20 = vld [vmem:[%s3903_s27 + $0x3f8] sm:$0xf0] }
  0xdf   : > { %2093 = vmatpush.bf16.msrb.mxu1 %v3116_v35  ;;  %2106 = vmatpush.bf16.msrb.mxu2 %v3244_v37  ;;  %v3519_v30 = vld [vmem:[%s3903_s27 + $0x454] sm:$0xf0]  ;;  %v3035_v31 = vld [vmem:[%s3903_s27 + $0x548] sm:$0xf]  ;;  %v3308_v32 = vor.u32 %v3619_v23, %v3307_v22  ;;  %v2480_v22 = vor.u32 %v3409_v7, %v2477_v8  ;;  %v3461_v7 = vld [vmem:[%s3903_s27 + $0x28c] sm:$0xf] }
  0xe0   : > { %2119 = vmatpush.bf16.msrb.mxu3 %v3372_v45  ;;  %v3551_v33 = vld [vmem:[%s3903_s27 + $0x554] sm:$0xf0]  ;;  %v3163_v34 = vld [vmem:[%s3903_s27 + $0x648] sm:$0xf]  ;;  %v2908_v41 = vor.u32 %v3519_v30, %v2907_v28  ;;  %v3405_v28 = vld [vmem:[%s3903_s27 + $0xcc] sm:$0xf] }
  0xe1   : > { %2075 = vmatmul.bf16.vlgmr.msra.gmra.mxu3 %v4027_v29  ;;  %2081 = vmatpush.bf16.msrb.mxu0 %v2972_v52  ;;  %v3583_v35 = vld [vmem:[%s3903_s27 + $0x654] sm:$0xf0]  ;;  %v3291_v37 = vld [vmem:[%s3903_s27 + $0x748] sm:$0xf]  ;;  %v3036_v45 = vor.u32 %v3551_v33, %v3035_v31  ;;  %v2461_v30 = vld [vmem:[%s3903_s27 + $0xd8] sm:$0xf0] }
  0xe2   : > { %v3615_v38 = vld [vmem:[%s3903_s27 + $0x754] sm:$0xf0]  ;;  %v2891_v44 = vld [vmem:[%s3903_s27 + $0x428] sm:$0xf]  ;;  %v3164_v46 = vor.u32 %v3583_v35, %v3163_v34  ;;  %v1829_v10 = vpop.f32.mrf.mxu0  ;;  %v3437_v31 = vld [vmem:[%s3903_s27 + $0x1cc] sm:$0xf] }
  0xe3   : > { %2094 = vmatpush.bf16.msrb.mxu1 %v3100_v53  ;;  %2107 = vmatpush.bf16.msrb.mxu2 %v3228_v54  ;;  %v3515_v47 = vld [vmem:[%s3903_s27 + $0x434] sm:$0xf0]  ;;  %v3019_v48 = vld [vmem:[%s3903_s27 + $0x528] sm:$0xf]  ;;  %v3292_v51 = vor.u32 %v3615_v38, %v3291_v37  ;;  %v1830_v16 = vadd.f32 %v1829_v10, %v532_v60  ;;  %v2589_v33 = vld [vmem:[%s3903_s27 + $0x1d8] sm:$0xf0] }
  0xe4   : > { %2120 = vmatpush.bf16.msrb.mxu3 %v3356_v58  ;;  %v3547_v52 = vld [vmem:[%s3903_s27 + $0x534] sm:$0xf0]  ;;  %v3147_v53 = vld [vmem:[%s3903_s27 + $0x628] sm:$0xf]  ;;  %v2892_v57 = vor.u32 %v3515_v47, %v2891_v44  ;;  %v3469_v34 = vld [vmem:[%s3903_s27 + $0x2cc] sm:$0xf]  ;;  %v2592_v47 = vor.u32 %v3437_v31, %v2589_v33 }
  0xe5   : > { %2082 = vmatpush.bf16.msrb.mxu0 %v2956_v0  ;;  %v3579_v54 = vld [vmem:[%s3903_s27 + $0x634] sm:$0xf0]  ;;  %v3275_v55 = vld [vmem:[%s3903_s27 + $0x728] sm:$0xf]  ;;  %v3020_v61 = vor.u32 %v3547_v52, %v3019_v48  ;;  %v2717_v35 = vld [vmem:[%s3903_s27 + $0x2d8] sm:$0xf0] }
  0xe6   : > { %v3611_v56 = vld [vmem:[%s3903_s27 + $0x734] sm:$0xf0]  ;;  %v2875_v58 = vld [vmem:[%s3903_s27 + $0x408] sm:$0xf]  ;;  %v3148_v62 = vor.u32 %v3579_v54, %v3147_v53  ;;  %v3501_v38 = vld [vmem:[%s3903_s27 + $0x3cc] sm:$0xf]  ;;  %v2720_v48 = vor.u32 %v3469_v34, %v2717_v35 }
  0xe7   : > { %2095 = vmatpush.bf16.msrb.mxu1 %v3084_v1  ;;  %2108 = vmatpush.bf16.msrb.mxu2 %v3212_v2  ;;  %v3511_v59 = vld [vmem:[%s3903_s27 + $0x414] sm:$0xf0]  ;;  %v3003_v63 = vld [vmem:[%s3903_s27 + $0x508] sm:$0xf]  ;;  %v3276_v3 = vor.u32 %v3611_v56, %v3275_v55  ;;  %v2445_v52 = vld [vmem:[%s3903_s27 + $0xb8] sm:$0xf0] }
  0xe8   : > { %2121 = vmatpush.bf16.msrb.mxu3 %v3340_v6  ;;  %v3543_v0 = vld [vmem:[%s3903_s27 + $0x514] sm:$0xf0]  ;;  %v3131_v1 = vld [vmem:[%s3903_s27 + $0x608] sm:$0xf]  ;;  %v3433_v53 = vld [vmem:[%s3903_s27 + $0x1ac] sm:$0xf] }
  0xe9   : > { %2083 = vmatpush.bf16.msrb.mxu0 %v2940_v12  ;;  %v3575_v4 = vld [vmem:[%s3903_s27 + $0x614] sm:$0xf0]  ;;  %v3259_v5 = vld [vmem:[%s3903_s27 + $0x708] sm:$0xf]  ;;  %v2876_v12 = vor.u32 %v3511_v59, %v2875_v58  ;;  %v3004_v17 = vor.u32 %v3543_v0, %v3003_v63  ;;  %v3465_v58 = vld [vmem:[%s3903_s27 + $0x2ac] sm:$0xf] }
  0xea   : > { %v3607_v6 = vld [vmem:[%s3903_s27 + $0x714] sm:$0xf0]  ;;  %v1831_v54 = vpop.f32.mrf.mxu0  ;;  %v2701_v59 = vld [vmem:[%s3903_s27 + $0x2b8] sm:$0xf0]  ;;  %v3497_v60 = vld [vmem:[%s3903_s27 + $0x3ac] sm:$0xf] }
  0xeb   : > { %2096 = vmatpush.bf16.msrb.mxu1 %v3068_v13  ;;  %2109 = vmatpush.bf16.msrb.mxu2 %v3196_v14  ;;  %v2605_v13 = vld [vmem:[%s3903_s27 + $0x1f8] sm:$0xf0]  ;;  %v3473_v14 = vld [vmem:[%s3903_s27 + $0x2ec] sm:$0xf]  ;;  %v3260_v21 = vor.u32 %v3607_v6, %v3259_v5 }
  0xec   : > { %2122 = vmatpush.bf16.msrb.mxu3 %v3324_v18  ;;  %v3132_v18 = vor.u32 %v3575_v4, %v3131_v1  ;;  %v2704_v1 = vor.u32 %v3465_v58, %v2701_v59  ;;  %v3429_v4 = vld [vmem:[%s3903_s27 + $0x18c] sm:$0xf]  ;;  %v2557_v6 = vld [vmem:[%s3903_s27 + $0x198] sm:$0xf0] }
  0xed   : > { %2084 = vmatpush.bf16.msrb.mxu0 %v2924_v24  ;;  %v2685_v8 = vld [vmem:[%s3903_s27 + $0x298] sm:$0xf0]  ;;  %v3389_v31 = vld [vmem:[%s3903_s27 + $0x4c] sm:$0xf] }
  0xee   : > { %v2813_v10 = vld [vmem:[%s3903_s27 + $0x398] sm:$0xf0]  ;;  %v3421_v33 = vld [vmem:[%s3903_s27 + $0x14c] sm:$0xf] }
  0xef   : > { %2097 = vmatpush.bf16.msrb.mxu1 %v3052_v25  ;;  %2110 = vmatpush.bf16.msrb.mxu2 %v3180_v27  ;;  %v1842_v2 = vpop.f32.mrf.mxu1  ;;  %v2608_v25 = vor.u32 %v3441_v9, %v2605_v13  ;;  %v2736_v27 = vor.u32 %v3473_v14, %v2733_v15  ;;  %v3493_v9 = vld [vmem:[%s3903_s27 + $0x38c] sm:$0xf]  ;;  %v2560_v13 = vor.u32 %v3429_v4, %v2557_v6  ;;  %v2509_v58 = vld [vmem:[%s3903_s27 + $0x138] sm:$0xf0] }
  0xf0   : > { %2123 = vmatpush.bf16.msrb.mxu3 %v3308_v32  ;;  %v1855_v11 = vpop.f32.mrf.mxu2  ;;  %v1843_v23 = vadd.f32 %v1842_v2, %v1830_v16  ;;  %v2864_v32 = vor.u32 %v3505_v19, %v2861_v20  ;;  %v3397_v2 = vld [vmem:[%s3903_s27 + $0x8c] sm:$0xf]  ;;  %v2688_v14 = vor.u32 %v3461_v7, %v2685_v8  ;;  %v2413_v16 = vld [vmem:[%s3903_s27 + $0x78] sm:$0xf0] }
  0xf1   : > { %2085 = vmatpush.bf16.msrb.mxu0 %v2908_v41  ;;  %v1868_v24 = vpop.f32.mrf.mxu3  ;;  %v2845_v41 = vld [vmem:[%s3903_s27 + $0x3d8] sm:$0xf0]  ;;  %v3393_v15 = vld [vmem:[%s3903_s27 + $0x6c] sm:$0xf] }
  0xf2   : > { %v1856_v37 = vadd.f32 %v1855_v11, %v1843_v23  ;;  %v2848_v56 = vor.u32 %v3501_v38, %v2845_v41  ;;  %v2541_v19 = vld [vmem:[%s3903_s27 + $0x178] sm:$0xf0]  ;;  %v3457_v20 = vld [vmem:[%s3903_s27 + $0x26c] sm:$0xf] }
  0xf3   : > { %2098 = vmatpush.bf16.msrb.mxu1 %v3036_v45  ;;  %2111 = vmatpush.bf16.msrb.mxu2 %v3164_v46  ;;  %v2464_v45 = vor.u32 %v3405_v28, %v2461_v30  ;;  %v2797_v23 = vld [vmem:[%s3903_s27 + $0x378] sm:$0xf0]  ;;  %v3453_v41 = vld [vmem:[%s3903_s27 + $0x24c] sm:$0xf] }
  0xf4   : > { %2124 = vmatpush.bf16.msrb.mxu3 %v3292_v51  ;;  %v1869_v46 = vadd.f32 %v1868_v24, %v1856_v37  ;;  %v3401_v51 = vld [vmem:[%s3903_s27 + $0xac] sm:$0xf]  ;;  %v2525_v38 = vld [vmem:[%s3903_s27 + $0x158] sm:$0xf0] }
  0xf5   : > { %2086 = vmatpush.bf16.msrb.mxu0 %v2892_v57  ;;  %v2573_v57 = vld [vmem:[%s3903_s27 + $0x1b8] sm:$0xf0]  ;;  %v3385_v54 = vld [vmem:[%s3903_s27 + $0x2c] sm:$0xf] }
  0xf6   : > { %v2576_v0 = vor.u32 %v3433_v53, %v2573_v57  ;;  %v3449_v59 = vld [vmem:[%s3903_s27 + $0x22c] sm:$0xf]  ;;  %v2493_v6 = vld [vmem:[%s3903_s27 + $0x118] sm:$0xf0] }
  0xf7   : > { %2099 = vmatpush.bf16.msrb.mxu1 %v3020_v61  ;;  %2112 = vmatpush.bf16.msrb.mxu2 %v3148_v62  ;;  %v1844_v44 = vpop.f32.mrf.mxu1  ;;  %v2829_v61 = vld [vmem:[%s3903_s27 + $0x3b8] sm:$0xf0]  ;;  %v2448_v62 = vor.u32 %v3401_v51, %v2445_v52  ;;  %v2528_v52 = vor.u32 %v3421_v33, %v2525_v38  ;;  %v3445_v7 = vld [vmem:[%s3903_s27 + $0x20c] sm:$0xf] }
  0xf8   : > { %2125 = vmatpush.bf16.msrb.mxu3 %v3276_v3  ;;  %v1857_v55 = vpop.f32.mrf.mxu2  ;;  %v2429_v3 = vld [vmem:[%s3903_s27 + $0x98] sm:$0xf0]  ;;  %v2832_v5 = vor.u32 %v3497_v60, %v2829_v61  ;;  %v3481_v61 = vld [vmem:[%s3903_s27 + $0x32c] sm:$0xf] }
  0xf9   : > { %2087 = vmatpush.bf16.msrb.mxu0 %v2876_v12  ;;  %v1870_v63 = vpop.f32.mrf.mxu3  ;;  %v2432_v11 = vor.u32 %v3397_v2, %v2429_v3  ;;  %v2653_v44 = vld [vmem:[%s3903_s27 + $0x258] sm:$0xf0]  ;;  %v3565_v33 = vld [vmem:[%s3903_s27 + $0x5cc] sm:$0xf] }
  0xfa   : > { %v2656_v53 = vor.u32 %v3453_v41, %v2653_v44  ;;  %v2381_v55 = vld [vmem:[%s3903_s27 + $0x38] sm:$0xf0]  ;;  %v3597_v41 = vld [vmem:[%s3903_s27 + $0x6cc] sm:$0xf] }
  0xfb   : > { %2100 = vmatpush.bf16.msrb.mxu1 %v3004_v17  ;;  %2113 = vmatpush.bf16.msrb.mxu2 %v3132_v18  ;;  %v3425_v17 = vld [vmem:[%s3903_s27 + $0x16c] sm:$0xf]  ;;  %v2816_v18 = vor.u32 %v3493_v9, %v2813_v10  ;;  %v1881_v24 = vpop.f32.mrf.mxu0  ;;  %v2637_v60 = vld [vmem:[%s3903_s27 + $0x238] sm:$0xf0] }
  0xfc   : > { %2126 = vmatpush.bf16.msrb.mxu3 %v3260_v21  ;;  %2088 = vmatmul.bf16.vlgmr.msrb.gmra.mxu0 %v4093_v50  ;;  %v2669_v21 = vld [vmem:[%s3903_s27 + $0x278] sm:$0xf0]  ;;  %v2544_v28 = vor.u32 %v3425_v17, %v2541_v19  ;;  %v2640_v4 = vor.u32 %v3449_v59, %v2637_v60  ;;  %v3601_v19 = vld [vmem:[%s3903_s27 + $0x6ec] sm:$0xf] }
  0xfd   : > { %2132 = vmatpush.bf16.msra.mxu0 %v2480_v22  ;;  %v3489_v22 = vld [vmem:[%s3903_s27 + $0x36c] sm:$0xf]  ;;  %v2672_v30 = vor.u32 %v3457_v20, %v2669_v21  ;;  %v2365_v2 = vld [vmem:[%s3903_s27 + $0x18] sm:$0xf0] }
  0xfe   : > { %2114 = vmatmul.bf16.vlgmr.msrb.gmra.mxu2 %v4082_v36  ;;  %2101 = vmatmul.bf16.vlgmr.msrb.gmra.mxu1 %v4087_v40  ;;  %v2800_v35 = vor.u32 %v3489_v22, %v2797_v23  ;;  %v2621_v10 = vld [vmem:[%s3903_s27 + $0x218] sm:$0xf0]  ;;  %v3633_v23 = vld [vmem:[%s3903_s27 + $0x7ec] sm:$0xf] }
  0xff   : > { %2145 = vmatpush.bf16.msra.mxu1 %v2608_v25  ;;  %2158 = vmatpush.bf16.msra.mxu2 %v2736_v27  ;;  %v1894_v12 = vpop.f32.mrf.mxu1  ;;  %v2416_v25 = vor.u32 %v3393_v15, %v2413_v16  ;;  %v1882_v27 = vadd.f32 %v1881_v24, %v1869_v46  ;;  %v3485_v46 = vld [vmem:[%s3903_s27 + $0x34c] sm:$0xf]  ;;  %v2989_v15 = vld [vmem:[%s3903_s27 + $0x4f8] sm:$0xf0]  ;;  %v2624_v22 = vor.u32 %v3445_v7, %v2621_v10 }
 0x100   : > { %2171 = vmatpush.bf16.msra.mxu3 %v2864_v32  ;;  %v2397_v32 = vld [vmem:[%s3903_s27 + $0x58] sm:$0xf0]  ;;  %v3569_v16 = vld [vmem:[%s3903_s27 + $0x5ec] sm:$0xf] }
 0x101   : > { %2127 = vmatmul.bf16.vlgmr.msrb.gmra.mxu3 %v4085_v39  ;;  %2133 = vmatpush.bf16.msra.mxu0 %v2464_v45  ;;  %v4398_v34 = vpop.f32.mrf.mxu2  ;;  %v4400_v37 = vadd.f32 %v1894_v12, %v1882_v27  ;;  %v2749_v12 = vld [vmem:[%s3903_s27 + $0x318] sm:$0xf0]  ;;  %v3625_v60 = vld [vmem:[%s3903_s27 + $0x7ac] sm:$0xf] }
 0x102   : > { %v3245_v20 = vld [vmem:[%s3903_s27 + $0x6f8] sm:$0xf0]  ;;  %v3521_v10 = vld [vmem:[%s3903_s27 + $0x46c] sm:$0xf] }
 0x103   : > { %2146 = vmatpush.bf16.msra.mxu1 %v2592_v47  ;;  %2159 = vmatpush.bf16.msra.mxu2 %v2720_v48  ;;  %v2781_v47 = vld [vmem:[%s3903_s27 + $0x358] sm:$0xf0]  ;;  %v2400_v48 = vor.u32 %v3389_v31, %v2397_v32  ;;  %v1883_v63 = vpop.f32.mrf.mxu0  ;;  %v3533_v31 = vld [vmem:[%s3903_s27 + $0x4cc] sm:$0xf] }
 0x104   : > { %2172 = vmatpush.bf16.msra.mxu3 %v2848_v56  ;;  %v4405_v45 = vpop.f32.mrf.mxu3  ;;  %v3417_v56 = vld [vmem:[%s3903_s27 + $0x12c] sm:$0xf]  ;;  %v2784_v57 = vor.u32 %v3485_v46, %v2781_v47  ;;  %v3373_v24 = vld [vmem:[%s3903_s27 + $0x7f8] sm:$0xf0] }
 0x105   : > { %2134 = vmatpush.bf16.msra.mxu0 %v2448_v62  ;;  %v2765_v62 = vld [vmem:[%s3903_s27 + $0x338] sm:$0xf0]  ;;  %v2512_v3 = vor.u32 %v3417_v56, %v2509_v58  ;;  %v3629_v46 = vld [vmem:[%s3903_s27 + $0x7cc] sm:$0xf] }
 0x106   : > { %v2768_v9 = vor.u32 %v3481_v61, %v2765_v62  ;;  %v2973_v32 = vld [vmem:[%s3903_s27 + $0x4d8] sm:$0xf0]  ;;  %v3593_v58 = vld [vmem:[%s3903_s27 + $0x6ac] sm:$0xf] }
 0x107   : > { %2147 = vmatpush.bf16.msra.mxu1 %v2576_v0  ;;  %2160 = vmatpush.bf16.msra.mxu2 %v2704_v1  ;;  %v1896_v51 = vpop.f32.mrf.mxu1  ;;  %v2384_v0 = vor.u32 %v3385_v54, %v2381_v55  ;;  %v3381_v1 = vld [vmem:[%s3903_s27 + $0xc] sm:$0xf]  ;;  %v3101_v38 = vld [vmem:[%s3903_s27 + $0x5d8] sm:$0xf0] }
 0x108   : > { %2173 = vmatpush.bf16.msra.mxu3 %v2832_v5  ;;  %v3413_v5 = vld [vmem:[%s3903_s27 + $0x10c] sm:$0xf]  ;;  %v2368_v17 = vor.u32 %v3381_v1, %v2365_v2  ;;  %v3229_v44 = vld [vmem:[%s3903_s27 + $0x6d8] sm:$0xf0]  ;;  %v3104_v51 = vor.u32 %v3565_v33, %v3101_v38 }
 0x109   : > { %2135 = vmatpush.bf16.msra.mxu0 %v2432_v11  ;;  %v1909_v8 = vpop.f32.mrf.mxu2  ;;  %v3477_v11 = vld [vmem:[%s3903_s27 + $0x30c] sm:$0xf]  ;;  %v2496_v21 = vor.u32 %v3413_v5, %v2493_v6  ;;  %v3357_v47 = vld [vmem:[%s3903_s27 + $0x7d8] sm:$0xf0] }
 0x10a   : > { %v2957_v54 = vld [vmem:[%s3903_s27 + $0x4b8] sm:$0xf0]  ;;  %v3561_v55 = vld [vmem:[%s3903_s27 + $0x5ac] sm:$0xf]  ;;  %v3360_v56 = vor.u32 %v3629_v46, %v3357_v47 }
 0x10b   : > { %2148 = vmatpush.bf16.msra.mxu1 %v2560_v13  ;;  %2161 = vmatpush.bf16.msra.mxu2 %v2688_v14  ;;  %v3537_v14 = vld [vmem:[%s3903_s27 + $0x4ec] sm:$0xf]  ;;  %v3213_v59 = vld [vmem:[%s3903_s27 + $0x6b8] sm:$0xf0] }
 0x10c   : > { %2174 = vmatpush.bf16.msra.mxu3 %v2816_v18  ;;  %v1922_v13 = vpop.f32.mrf.mxu3  ;;  %v3117_v18 = vld [vmem:[%s3903_s27 + $0x5f8] sm:$0xf0]  ;;  %v2992_v27 = vor.u32 %v3537_v14, %v2989_v15  ;;  %v3216_v63 = vor.u32 %v3593_v58, %v3213_v59  ;;  %v3621_v5 = vld [vmem:[%s3903_s27 + $0x78c] sm:$0xf] }
 0x10d   : > { %2136 = vmatpush.bf16.msra.mxu0 %v2416_v25  ;;  %v2752_v25 = vor.u32 %v3477_v11, %v2749_v12  ;;  %v3341_v61 = vld [vmem:[%s3903_s27 + $0x7b8] sm:$0xf0]  ;;  %v3553_v12 = vld [vmem:[%s3903_s27 + $0x56c] sm:$0xf] }
 0x10e   : > { %v2941_v1 = vld [vmem:[%s3903_s27 + $0x498] sm:$0xf0]  ;;  %v3344_v2 = vor.u32 %v3625_v60, %v3341_v61  ;;  %v3609_v58 = vld [vmem:[%s3903_s27 + $0x72c] sm:$0xf]  ;;  %v533_v60 = vperm.slane %v4335_v49, 1 }
 0x10f   : > { %2149 = vmatpush.bf16.msra.mxu1 %v2544_v28  ;;  %2162 = vmatpush.bf16.msra.mxu2 %v2672_v30  ;;  %v3120_v28 = vor.u32 %v3569_v16, %v3117_v18  ;;  %v3248_v30 = vor.u32 %v3601_v19, %v3245_v20  ;;  %v3325_v6 = vld [vmem:[%s3903_s27 + $0x798] sm:$0xf0]  ;;  %v3585_v16 = vld [vmem:[%s3903_s27 + $0x66c] sm:$0xf] }
 0x110   : > { %2175 = vmatpush.bf16.msra.mxu3 %v2800_v35  ;;  %v3376_v35 = vor.u32 %v3633_v23, %v3373_v24  ;;  %v2925_v11 = vld [vmem:[%s3903_s27 + $0x478] sm:$0xf0]  ;;  %v3328_v14 = vor.u32 %v3621_v5, %v3325_v6  ;;  %v3617_v18 = vld [vmem:[%s3903_s27 + $0x76c] sm:$0xf] }
 0x111   : > { %2137 = vmatpush.bf16.msra.mxu0 %v2400_v48  ;;  %v2976_v48 = vor.u32 %v3533_v31, %v2973_v32  ;;  %v3053_v15 = vld [vmem:[%s3903_s27 + $0x578] sm:$0xf0]  ;;  %v2928_v20 = vor.u32 %v3521_v10, %v2925_v11  ;;  %v3517_v23 = vld [vmem:[%s3903_s27 + $0x44c] sm:$0xf] }
 0x112   : > { %v3309_v19 = vld [vmem:[%s3903_s27 + $0x778] sm:$0xf0]  ;;  %v3581_v31 = vld [vmem:[%s3903_s27 + $0x64c] sm:$0xf] }
 0x113   : > { %2150 = vmatpush.bf16.msra.mxu1 %v2528_v52  ;;  %2163 = vmatpush.bf16.msra.mxu2 %v2656_v53  ;;  %v3232_v52 = vor.u32 %v3597_v41, %v3229_v44  ;;  %v3529_v53 = vld [vmem:[%s3903_s27 + $0x4ac] sm:$0xf]  ;;  %v2909_v24 = vld [vmem:[%s3903_s27 + $0x458] sm:$0xf0] }
 0x114   : > { %2176 = vmatpush.bf16.msra.mxu3 %v2784_v57  ;;  %v3085_v57 = vld [vmem:[%s3903_s27 + $0x5b8] sm:$0xf0]  ;;  %v2960_v62 = vor.u32 %v3529_v53, %v2957_v54  ;;  %v2912_v41 = vor.u32 %v3517_v23, %v2909_v24 }
 0x115   : > { %2138 = vmatpush.bf16.msra.mxu0 %v2384_v0  ;;  %v3525_v0 = vld [vmem:[%s3903_s27 + $0x48c] sm:$0xf]  ;;  %v3165_v32 = vld [vmem:[%s3903_s27 + $0x658] sm:$0xf0] }
 0x116   : > { %v3293_v38 = vld [vmem:[%s3903_s27 + $0x758] sm:$0xf0]  ;;  %v3168_v47 = vor.u32 %v3581_v31, %v3165_v32 }
 0x117   : > { %2151 = vmatpush.bf16.msra.mxu1 %v2512_v3  ;;  %2164 = vmatpush.bf16.msra.mxu2 %v2640_v4  ;;  %v3069_v3 = vld [vmem:[%s3903_s27 + $0x598] sm:$0xf0] }
 0x118   : > { %2177 = vmatpush.bf16.msra.mxu3 %v2768_v9  ;;  %v3197_v4 = vld [vmem:[%s3903_s27 + $0x698] sm:$0xf0] }
 0x119   : > { %2139 = vmatpush.bf16.msra.mxu0 %v2368_v17  ;;  %v4461_v7 = vpop.f32.mrf.mxu0  ;;  %v3181_v17 = vld [vmem:[%s3903_s27 + $0x678] sm:$0xf0] }
 0x11a   : > { %v3277_v59 = vld [vmem:[%s3903_s27 + $0x738] sm:$0xf0]  ;;  %v1934_v6 = vadd.f32 %v4461_v7, %v533_v60 }
 0x11b   : > { %2152 = vmatpush.bf16.msra.mxu1 %v2496_v21  ;;  %2165 = vmatpush.bf16.msra.mxu2 %v2624_v22  ;;  %v4466_v13 = vpop.f32.mrf.mxu1  ;;  %v3056_v21 = vor.u32 %v3553_v12, %v3053_v15  ;;  %v3184_v22 = vor.u32 %v3585_v16, %v3181_v17 }
 0x11c   : > { %2178 = vmatpush.bf16.msra.mxu3 %v2752_v25  ;;  %2140 = vmatmul.bf16.vlgmr.msra.gmra.mxu0 %v4036_v42  ;;  %v3589_v42 = vld [vmem:[%s3903_s27 + $0x68c] sm:$0xf] }
 0x11d   : > { %2184 = vmatpush.bf16.msrb.mxu0 %v2992_v27  ;;  %v3200_v9 = vor.u32 %v3589_v42, %v3197_v4  ;;  %v3549_v25 = vld [vmem:[%s3903_s27 + $0x54c] sm:$0xf]  ;;  %v3133_v4 = vld [vmem:[%s3903_s27 + $0x618] sm:$0xf0] }
 0x11e   : > { %2166 = vmatmul.bf16.vlgmr.msra.gmra.mxu2 %v4023_v26  ;;  %2153 = vmatmul.bf16.vlgmr.msra.gmra.mxu1 %v4038_v43  ;;  %v3088_v26 = vor.u32 %v3561_v55, %v3085_v57  ;;  %v2944_v43 = vor.u32 %v3525_v0, %v2941_v1  ;;  %v3021_v55 = vld [vmem:[%s3903_s27 + $0x538] sm:$0xf0]  ;;  %v3541_v1 = vld [vmem:[%s3903_s27 + $0x50c] sm:$0xf] }
 0x11f   : > { %2197 = vmatpush.bf16.msrb.mxu1 %v3120_v28  ;;  %2210 = vmatpush.bf16.msrb.mxu2 %v3248_v30  ;;  %v3312_v28 = vor.u32 %v3617_v18, %v3309_v19  ;;  %v3037_v30 = vld [vmem:[%s3903_s27 + $0x558] sm:$0xf0]  ;;  %v3573_v42 = vld [vmem:[%s3903_s27 + $0x60c] sm:$0xf] }
 0x120   : > { %2223 = vmatpush.bf16.msrb.mxu3 %v3376_v35  ;;  %v3613_v35 = vld [vmem:[%s3903_s27 + $0x74c] sm:$0xf]  ;;  %v3040_v46 = vor.u32 %v3549_v25, %v3037_v30  ;;  %v3149_v57 = vld [vmem:[%s3903_s27 + $0x638] sm:$0xf0]  ;;  %v3136_v11 = vor.u32 %v3573_v42, %v3133_v4  ;;  %v534_v25 = vperm.slane %v4335_v49, 2 }
 0x121   : > { %2179 = vmatmul.bf16.vlgmr.msra.gmra.mxu3 %v4027_v29  ;;  %2185 = vmatpush.bf16.msrb.mxu0 %v2976_v48  ;;  %v3557_v29 = vld [vmem:[%s3903_s27 + $0x58c] sm:$0xf]  ;;  %v1959_v27 = vpop.f32.mrf.mxu2  ;;  %v1935_v44 = vpop.f32.mrf.mxu0  ;;  %v3296_v54 = vor.u32 %v3613_v35, %v3293_v38  ;;  %v2877_v0 = vld [vmem:[%s3903_s27 + $0x418] sm:$0xf0] }
 0x122   : > { %v3072_v8 = vor.u32 %v3557_v29, %v3069_v3  ;;  %v3513_v48 = vld [vmem:[%s3903_s27 + $0x42c] sm:$0xf]  ;;  %v3005_v3 = vld [vmem:[%s3903_s27 + $0x518] sm:$0xf0] }
 0x123   : > { %2198 = vmatpush.bf16.msrb.mxu1 %v3104_v51  ;;  %2211 = vmatpush.bf16.msrb.mxu2 %v3232_v52  ;;  %v2893_v51 = vld [vmem:[%s3903_s27 + $0x438] sm:$0xf0]  ;;  %v3545_v52 = vld [vmem:[%s3903_s27 + $0x52c] sm:$0xf]  ;;  %v1948_v53 = vpop.f32.mrf.mxu1  ;;  %v3008_v10 = vor.u32 %v3541_v1, %v3005_v3 }
 0x124   : > { %2224 = vmatpush.bf16.msrb.mxu3 %v3360_v56  ;;  %v1972_v33 = vpop.f32.mrf.mxu3  ;;  %v3577_v56 = vld [vmem:[%s3903_s27 + $0x62c] sm:$0xf]  ;;  %v2896_v61 = vor.u32 %v3513_v48, %v2893_v51 }
 0x125   : > { %2186 = vmatpush.bf16.msrb.mxu0 %v2960_v62  ;;  %v3024_v62 = vor.u32 %v3545_v52, %v3021_v55 }
 0x127   : > { %2199 = vmatpush.bf16.msrb.mxu1 %v3088_v26  ;;  %2212 = vmatpush.bf16.msrb.mxu2 %v3216_v63  ;;  %v3152_v26 = vor.u32 %v3577_v56, %v3149_v57  ;;  %v3509_v63 = vld [vmem:[%s3903_s27 + $0x40c] sm:$0xf] }
 0x128   : > { %2225 = vmatpush.bf16.msrb.mxu3 %v3344_v2  ;;  %v3280_v2 = vor.u32 %v3609_v58, %v3277_v59 }
 0x129   : > { %2187 = vmatpush.bf16.msrb.mxu0 %v2944_v43  ;;  %v1961_v29 = vpop.f32.mrf.mxu2  ;;  %v3605_v43 = vld [vmem:[%s3903_s27 + $0x70c] sm:$0xf] }
 0x12b   : > { %2200 = vmatpush.bf16.msrb.mxu1 %v3072_v8  ;;  %2213 = vmatpush.bf16.msrb.mxu2 %v3200_v9  ;;  %v3261_v8 = vld [vmem:[%s3903_s27 + $0x718] sm:$0xf0]  ;;  %v2880_v9 = vor.u32 %v3509_v63, %v2877_v0  ;;  %v535_v0 = vperm.slane %v4335_v49, 3 }
 0x12c   : > { %2226 = vmatpush.bf16.msrb.mxu3 %v3328_v14  ;;  %v1974_v5 = vpop.f32.mrf.mxu3  ;;  %v3264_v12 = vor.u32 %v3605_v43, %v3261_v8  ;;  %v1947_v14 = vadd.f32 %v4466_v13, %v1934_v6 }
 0x12d   : > { %2188 = vmatpush.bf16.msrb.mxu0 %v2928_v20  ;;  %v1908_v20 = vadd.f32 %v4398_v34, %v4400_v37 }
 0x12e   : > { %v1960_v15 = vadd.f32 %v1959_v27, %v1947_v14 }
 0x12f   : > { %2201 = vmatpush.bf16.msrb.mxu1 %v3056_v21  ;;  %2214 = vmatpush.bf16.msrb.mxu2 %v3184_v22  ;;  %v1921_v22 = vadd.f32 %v4405_v45, %v1908_v20 }
 0x130   : > { %2227 = vmatpush.bf16.msrb.mxu3 %v3312_v28  ;;  %v1973_v7 = vadd.f32 %v1972_v33, %v1960_v15 }
 0x131   : > { %2189 = vmatpush.bf16.msrb.mxu0 %v2912_v41 }
 0x133   : > { %2202 = vmatpush.bf16.msrb.mxu1 %v3040_v46  ;;  %2215 = vmatpush.bf16.msrb.mxu2 %v3168_v47 }
 0x134   : > { %2228 = vmatpush.bf16.msrb.mxu3 %v3296_v54 }
 0x135   : > { %2190 = vmatpush.bf16.msrb.mxu0 %v2896_v61 }
 0x137   : > { %2203 = vmatpush.bf16.msrb.mxu1 %v3024_v62  ;;  %2216 = vmatpush.bf16.msrb.mxu2 %v3152_v26 }
 0x138   : > { %2229 = vmatpush.bf16.msrb.mxu3 %v3280_v2 }
 0x139   : > { %2191 = vmatpush.bf16.msrb.mxu0 %v2880_v9  ;;  %v1985_v16 = vpop.f32.mrf.mxu0 }
 0x13a   : > { %v1986_v17 = vadd.f32 %v1985_v16, %v1973_v7 }
 0x13b   : > { %2204 = vmatpush.bf16.msrb.mxu1 %v3008_v10  ;;  %2217 = vmatpush.bf16.msrb.mxu2 %v3136_v11  ;;  %v1998_v13 = vpop.f32.mrf.mxu1 }
 0x13c   : > { %2230 = vmatpush.bf16.msrb.mxu3 %v3264_v12  ;;  %2192 = vmatmul.bf16.vlgmr.msrb.gmra.mxu0 %v4093_v50  ;;  %v1999_v18 = vadd.f32 %v1998_v13, %v1986_v17 }
 0x13e   : > { %2205 = vmatmul.bf16.vlgmr.msrb.gmra.mxu1 %v4087_v40  ;;  %2218 = vmatmul.bf16.vlgmr.msrb.gmra.mxu2 %v4082_v36 }
 0x13f   : > { %2231 = vmatmul.bf16.vlgmr.msrb.gmra.mxu3 %v4085_v39 }
 0x141   : > { %v2011_v19 = vpop.f32.mrf.mxu2  ;;  %v1987_v36 = vpop.f32.mrf.mxu0 }
 0x142   : > { %v2012_v50 = vadd.f32 %v2011_v19, %v1999_v18 }
 0x143   : > { %v2000_v39 = vpop.f32.mrf.mxu1 }
 0x144   : > { %v2024_v21 = vpop.f32.mrf.mxu3 }
 0x145   : > { %v2025_v40 = vadd.f32 %v2024_v21, %v2012_v50 }
 0x147   : > { %v2240_v23 = vrot.slane %v2025_v40, 4 }
 0x149   : > { %v2243_v24 = vsel %vm2242_vm0, %v1921_v22, %v2240_v23  ;;  %v2013_v34 = vpop.f32.mrf.mxu2 }
 0x14a   : > { %2247 = vst [vmem:[%s4512_s12] sm:$0xff] %v2243_v24 }
 0x14c   : > { %v2026_v37 = vpop.f32.mrf.mxu3 }
 0x159   : > { %v2037_v27 = vpop.f32.mrf.mxu0 }
 0x15a   : > { %v2038_v28 = vadd.f32 %v2037_v27, %v534_v25 }
 0x15b   : > { %v2050_v30 = vpop.f32.mrf.mxu1 }
 0x15c   : > { %v2051_v31 = vadd.f32 %v2050_v30, %v2038_v28 }
 0x161   : > { %v2063_v32 = vpop.f32.mrf.mxu2  ;;  %v2039_v38 = vpop.f32.mrf.mxu0 }
 0x162   : > { %v2064_v45 = vadd.f32 %v2063_v32, %v2051_v31 }
 0x163   : > { %v2052_v41 = vpop.f32.mrf.mxu1 }
 0x164   : > { %v2076_v33 = vpop.f32.mrf.mxu3 }
 0x165   : > { %v2077_v35 = vadd.f32 %v2076_v33, %v2064_v45 }
 0x169   : > { %v2065_v44 = vpop.f32.mrf.mxu2 }
 0x16c   : > { %v2078_v46 = vpop.f32.mrf.mxu3 }
 0x179   : > { %v2089_v47 = vpop.f32.mrf.mxu0 }
 0x17a   : > { %v2090_v48 = vadd.f32 %v2089_v47, %v2077_v35 }
 0x17b   : > { %v2102_v51 = vpop.f32.mrf.mxu1 }
 0x17c   : > { %v2103_v52 = vadd.f32 %v2102_v51, %v2090_v48 }
 0x181   : > { %v2115_v53 = vpop.f32.mrf.mxu2  ;;  %v2091_v55 = vpop.f32.mrf.mxu0 }
 0x182   : > { %v2116_v10 = vadd.f32 %v2115_v53, %v2103_v52 }
 0x183   : > { %v2104_v56 = vpop.f32.mrf.mxu1 }
 0x184   : > { %v2128_v54 = vpop.f32.mrf.mxu3 }
 0x185   : > { %v2129_v16 = vadd.f32 %v2128_v54, %v2116_v10 }
 0x189   : > { %v2117_v57 = vpop.f32.mrf.mxu2 }
 0x18c   : > { %v2130_v58 = vpop.f32.mrf.mxu3 }
 0x199   : > { %v2141_v59 = vpop.f32.mrf.mxu0 }
 0x19a   : > { %v2142_v2 = vadd.f32 %v2141_v59, %v535_v0 }
 0x19b   : > { %v2154_v60 = vpop.f32.mrf.mxu1 }
 0x19c   : > { %v2155_v3 = vadd.f32 %v2154_v60, %v2142_v2 }
 0x1a1   : > { %v2167_v61 = vpop.f32.mrf.mxu2  ;;  %v2143_v26 = vpop.f32.mrf.mxu0 }
 0x1a2   : > { %v2168_v42 = vadd.f32 %v2167_v61, %v2155_v3 }
 0x1a3   : > { %v2156_v63 = vpop.f32.mrf.mxu1 }
 0x1a4   : > { %v2180_v62 = vpop.f32.mrf.mxu3 }
 0x1a5   : > { %v2181_v4 = vadd.f32 %v2180_v62, %v2168_v42 }
 0x1a9   : > { %v2169_v1 = vpop.f32.mrf.mxu2 }
 0x1ac   : > { %v2182_v29 = vpop.f32.mrf.mxu3 }
 0x1b9   : > { %v2193_v5 = vpop.f32.mrf.mxu0 }
 0x1ba   : > { %v2194_v43 = vadd.f32 %v2193_v5, %v2181_v4 }
 0x1bb   : > { %v2206_v6 = vpop.f32.mrf.mxu1 }
 0x1bc   : > { %v2207_v8 = vadd.f32 %v2206_v6, %v2194_v43 }
 0x1c1   : > { %v2219_v9 = vpop.f32.mrf.mxu2  ;;  %v2195_v14 = vpop.f32.mrf.mxu0 }
 0x1c2   : > { %v2220_v11 = vadd.f32 %v2219_v9, %v2207_v8  ;;  %v2232_v12 = vpop.f32.mrf.mxu3 }
 0x1c3   : > { %v2208_v15 = vpop.f32.mrf.mxu1 }
 0x1c4   : > { %v2233_v7 = vadd.f32 %v2232_v12, %v2220_v11 }
 0x1c6   : > { %v2241_v49 = vrot.slane %v2233_v7, 4 }
 0x1c8   : > { %v2244_v17 = vsel %vm2242_vm0, %v2129_v16, %v2241_v49 }
 0x1c9   : > { %2248 = vst [vmem:[%s4512_s12 + $0x8] sm:$0xff] %v2244_v17  ;;  %v2221_v13 = vpop.f32.mrf.mxu2 }
 0x1ca   : > { %v2234_v18 = vpop.f32.mrf.mxu3 }
 0x1cb PF: > { %p16_p8 = scmp.ge.s32.totalorder %s3826_s17, 6   ;;  %s4541_s12 = smov %s3773_s13 }
 0x1cc   : > { %s4542_s13 = smov %s3777_s14  ;;  %s4543_s14 = smov %s3836_s20 }
 0x1cd   : > { %s4544_s15 = smov %s3826_s17  ;;  %18 = sbr.rel (!%p16_p8) target bundleno = 5 (0x5), region = 88 }
 0x1d2   :  { %2271 = vsyncpa [#allocation3], 1 }
 0x1d3   :  { %2273 = vsyncpa [#allocation3 + $0x1], 1 }
 0x1d4   :  { %2274 = vsyncpa [#allocation5], 1 }
 0x1d5   :  { %2276 = vsyncpa [#allocation5 + $0x1], 1 }

</bundles_post_ra>
